<compile_context>
chip_gen: v6e
topology: v6e:2x2x1
jax: 0.10.0
libtpu: 0.0.40
codegen_flags: <defaults>
</compile_context>

<pallas_src>
import functools

import jax
import jax.numpy as jnp
from jax import lax
from jax.experimental import pallas as pl
from jax.experimental.pallas import tpu as pltpu


RATES = (6, 12, 18)   # output_stride == 16


# --------------------------- static tap planning -----------------------------


def _atrous_plan(H, W, r):
    """Static plan for one dilation rate.

    Returns (taps, kpos) where taps lists, for every surviving off-center tap,
    the output/input slice bounds (oy0, ox0, iy0, ix0, hy, hx), and kpos lists
    the matching (ki, kj) positions into the (3, 3, Cin, R) weight.  Taps whose
    offset is >= the spatial extent only read zero padding and are pruned.
    """
    taps, kpos = [], []
    for i in range(3):
        dy = (i - 1) * r
        if abs(dy) >= H:
            continue
        for j in range(3):
            dx = (j - 1) * r
            if abs(dx) >= W or (i == 1 and j == 1):   # center handled batched
                continue
            taps.append((max(0, -dy), max(0, -dx), max(0, dy), max(0, dx),
                         H - abs(dy), W - abs(dx)))
            kpos.append((i, j))
    return tuple(taps), tuple(kpos)


# ------------------------------ Pallas kernel --------------------------------


def _aspp_kernel(x_ref, eup_ref, w_img_ref, w_edge_ref, w_center_ref, *rest,
                 H, W, R, branch_taps):
    n_off = sum(1 for taps in branch_taps if taps)
    off_refs = rest[:n_off]
    out_ref = rest[n_off]
    acc_ref = rest[n_off + 1]
    f32 = jnp.float32

    x32 = x_ref[0]                                        # (H, W, Cin) f32
    x_bf = x32.astype(jnp.bfloat16)                       # MXU input

    # ---- image pooling branch: GAP -> 1x1 conv -> ReLU -> broadcast --------
    gap = jnp.mean(x32, axis=(0, 1), keepdims=True)       # (1, 1, Cin), f32
    img = jnp.maximum(jnp.einsum("hwc,cd->hwd", gap, w_img_ref[...],
                                 preferred_element_type=f32), 0.0)   # (1,1,R)
    out_ref[0, :, :, 0:R] = jnp.broadcast_to(img, (H, W, R)).astype(out_ref.dtype)

    # ---- edge branch: (pre-resized) edge map * weight vector -> ReLU -------
    # Cin=1 1x1 conv == outer product, VPU broadcast-multiply (no MXU).
    edge_feat = jnp.maximum(eup_ref[0] * w_edge_ref[...], 0.0)       # (H,W,R)
    out_ref[0, :, :, R:2 * R] = edge_feat.astype(out_ref.dtype)

    # ---- batched center matmul: [f0 | f1_ctr | f2_ctr | f3_ctr] ------------
    center = jnp.einsum("hwc,cd->hwd", x_bf, w_center_ref[...],
                        preferred_element_type=f32)       # (H, W, (1+B)*R)
    out_ref[0, :, :, 2 * R:3 * R] = (
        jnp.maximum(center[:, :, 0:R], 0.0).astype(out_ref.dtype))   # f0

    # ---- atrous branches: per-tap K=Cin matmuls into an f32 accumulator ----
    off_i = 0
    for b, taps in enumerate(branch_taps):
        c_lo = (b + 1) * R                                # slice in `center`
        o_lo = (b + 3) * R                                # slice in the output
        c_slice = center[:, :, c_lo:c_lo + R]
        if not taps:
            # Every off-center tap of this rate reads only zero padding at
            # this spatial size -> the branch is exactly its center 1x1 conv.
            out_ref[0, :, :, o_lo:o_lo + R] = (
                jnp.maximum(c_slice, 0.0).astype(out_ref.dtype))
            continue
        w_off = off_refs[off_i]
        off_i += 1
        acc_ref[...] = c_slice                            # init with center tap
        for t, (oy0, ox0, iy0, ix0, hy, hx) in enumerate(taps):
            part = jnp.einsum("hwc,cd->hwd", x_bf, w_off[t],
                              preferred_element_type=f32)            # (H,W,R)
            acc_ref[oy0:oy0 + hy, ox0:ox0 + hx, :] += (
                part[iy0:iy0 + hy, ix0:ix0 + hx, :])
        out_ref[0, :, :, o_lo:o_lo + R] = (
            jnp.maximum(acc_ref[...], 0.0).astype(out_ref.dtype))


# -------------------------------- Wrapper ------------------------------------


def bilinear_matrix(out_size, in_size):
    """Interpolation matrix M (out,in) such that y = M @ x matches
    F.interpolate(..., mode='bilinear', align_corners=True) along one axis."""
    if out_size == 1:
        coords = jnp.zeros((1,), jnp.float32)
    else:
        coords = (jnp.arange(out_size, dtype=jnp.float32)
                  * (in_size - 1) / (out_size - 1))
    i0 = jnp.clip(jnp.floor(coords).astype(jnp.int32), 0, in_size - 1)
    i1 = jnp.clip(i0 + 1, 0, in_size - 1)
    frac = coords - i0.astype(jnp.float32)
    m = jnp.zeros((out_size, in_size), jnp.float32)
    rows = jnp.arange(out_size)
    m = m.at[rows, i0].add(1.0 - frac)
    m = m.at[rows, i1].add(frac)
    return m


def _const_spec(shape):
    return pl.BlockSpec(shape, lambda *_: (0,) * len(shape))


def aspp_forward(params, x, edge, rates=RATES):
    """x: (N,H,W,Cin), edge: (N,He,We,1), NHWC.  Returns (N,H,W,6*R)."""
    N, H, W, Cin = x.shape
    He, We = edge.shape[1], edge.shape[2]
    R = params["w_img"].shape[1]
    B = len(rates)

    # Tiny align_corners bilinear resize of the 1-channel edge map in XLA:
    # the (N, H, W, 1) intermediate is ~2 KiB, negligible HBM traffic.
    mh = bilinear_matrix(H, He)
    mw = bilinear_matrix(W, We)
    e_up = jnp.einsum("Hh,nhwc,Ww->nHWc", mh, edge, mw,
                      precision=lax.Precision.HIGHEST)

    # Static per-rate tap plans (prunes taps that only read zero padding).
    plans = [_atrous_plan(H, W, r) for r in rates]
    branch_taps = tuple(p[0] for p in plans)

    # Batched "center" RHS: [1x1 conv | center tap of each atrous branch].
    centers = [params["w_f0"]]
    off_ws = []
    for b, (taps, kpos) in enumerate(plans):
        w = params[f"w_f{b + 1}"]                       # (3, 3, Cin, R)
        centers.append(w[1, 1])
        if kpos:
            off_ws.append(
                jnp.stack([w[i, j] for (i, j) in kpos], 0).astype(jnp.bfloat16))
    w_center = jnp.concatenate(centers, axis=-1).astype(jnp.bfloat16)

    kern = functools.partial(_aspp_kernel, H=H, W=W, R=R,
                             branch_taps=branch_taps)
    in_specs = [
        pl.BlockSpec((1, H, W, Cin), lambda n: (n, 0, 0, 0)),
        pl.BlockSpec((1, H, W, 1), lambda n: (n, 0, 0, 0)),
        _const_spec((Cin, R)),
        _const_spec((1, R)),
        _const_spec((Cin, (1 + B) * R)),
    ] + [_const_spec(w.shape) for w in off_ws]

    return pl.pallas_call(
        kern,
        out_shape=jax.ShapeDtypeStruct((N, H, W, (3 + B) * R), x.dtype),
        grid=(N,),
        in_specs=in_specs,
        out_specs=pl.BlockSpec((1, H, W, (3 + B) * R), lambda n: (n, 0, 0, 0)),
        scratch_shapes=[pltpu.VMEM((H, W, R), jnp.float32)],
        compiler_params=pltpu.CompilerParams(
            dimension_semantics=("parallel",),
            vmem_limit_bytes=32 * 1024 * 1024),
    )(x, e_up, params["w_img"], params["w_edge"], w_center, *off_ws)


def init_params(key, in_dim=128, reduction_dim=128):
    ks = jax.random.split(key, 6)
    s = 0.05

    def w(k, shape):
        return s * jax.random.normal(k, shape, jnp.float32)

    return {
        "w_img":  w(ks[0], (in_dim, reduction_dim)),                 # 1x1, no bias
        "w_edge": w(ks[1], (1, reduction_dim)),                      # 1x1, Cin=1
        "w_f0":   w(ks[2], (in_dim, reduction_dim)),                 # 1x1 branch
        "w_f1":   w(ks[3], (3, 3, in_dim, reduction_dim)),           # rate 6
        "w_f2":   w(ks[4], (3, 3, in_dim, reduction_dim)),           # rate 12
        "w_f3":   w(ks[5], (3, 3, in_dim, reduction_dim)),           # rate 18
    }


# ----------------------------- Pure-JAX reference ----------------------------


def ref_forward(params, x, edge, rates=RATES, matmul_dtype=None):
    """Pure-JAX reference.  If matmul_dtype is set, the x-path conv inputs are
    rounded through that dtype (mirroring the kernel's bf16 MXU inputs) while
    accumulation stays f32, so the comparison is apples-to-apples."""
    N, H, W, Cin = x.shape
    R = params["w_img"].shape[1]
    dn = ("NHWC", "HWIO", "NHWC")
    hi = lax.Precision.HIGHEST

    def rnd(a):
        return a if matmul_dtype is None else a.astype(matmul_dtype).astype(jnp.float32)

    # image pooling branch (kernel keeps this path f32)
    gap = jnp.mean(x, axis=(1, 2), keepdims=True)                    # (N,1,1,Cin)
    img = lax.conv_general_dilated(gap, params["w_img"][None, None], (1, 1),
                                   "VALID", dimension_numbers=dn, precision=hi)
    img = jnp.maximum(img, 0.0)
    img = jnp.broadcast_to(img, (N, H, W, R))   # bilinear from 1x1 == broadcast

    # edge branch (f32)
    mh = bilinear_matrix(H, edge.shape[1])
    mw = bilinear_matrix(W, edge.shape[2])
    e_up = jnp.einsum("Hh,nhwc,Ww->nHWc", mh, edge, mw, precision=hi)
    e_feat = jnp.maximum(e_up * params["w_edge"][0], 0.0)            # 1x1, Cin=1

    xq = rnd(x)

    # 1x1 branch
    f0 = lax.conv_general_dilated(xq, rnd(params["w_f0"])[None, None], (1, 1),
                                  "VALID", dimension_numbers=dn, precision=hi)
    f0 = jnp.maximum(f0, 0.0)

    outs = [img, e_feat, f0]
    for r, k in zip(rates, ("w_f1", "w_f2", "w_f3")):
        y = lax.conv_general_dilated(
            xq, rnd(params[k]), (1, 1), ((r, r), (r, r)),
            rhs_dilation=(r, r), dimension_numbers=dn, precision=hi)
        outs.append(jnp.maximum(y, 0.0))
    return jnp.concatenate(outs, axis=-1)


# ------------------------------------ Main ------------------------------------


if __name__ == "__main__":
    key = jax.random.PRNGKey(0)
    k_x, k_e, k_p = jax.random.split(key, 3)

    N, H, W = 2, 16, 16
    in_dim, reduction_dim = 128, 128
    He, We = 32, 32                       # edge map at 2x the feature resolution

    # Example inputs in PyTorch NCHW convention, transposed to NHWC.
    x_nchw = jax.random.normal(k_x, (N, in_dim, H, W), jnp.float32)
    edge_nchw = jax.random.normal(k_e, (N, 1, He, We), jnp.float32)
    x = jnp.transpose(x_nchw, (0, 2, 3, 1))
    edge = jnp.transpose(edge_nchw, (0, 2, 3, 1))

    params = init_params(k_p, in_dim=in_dim, reduction_dim=reduction_dim)

    out = jax.block_until_ready(aspp_forward(params, x, edge))
    assert out.shape == (N, H, W, 6 * reduction_dim), out.shape

    ref = jax.block_until_ready(
        ref_forward(params, x, edge, matmul_dtype=jnp.bfloat16))
    max_err = float(jnp.max(jnp.abs(out - ref)))
    assert jnp.allclose(out, ref, atol=2e-3, rtol=2e-3), (
        f"mismatch vs JAX reference (max abs err {max_err:.3e})")

    # Convert back to PyTorch NCHW output convention: (N, 6*reduction_dim, H, W)
    _ = jnp.transpose(out, (0, 3, 1, 2))

    print("KERNEL_OK")
</pallas_src>

<mosaic_0001>
module attributes {stable_mosaic.version = 11 : i64} {
  func.func @_aspp_kernel(%arg0: i32, %arg1: memref<1x16x16x128xf32, #tpu.memory_space<vmem>>, %arg2: memref<1x16x16x1xf32, #tpu.memory_space<vmem>>, %arg3: memref<128x128xf32, #tpu.memory_space<vmem>>, %arg4: memref<1x128xf32, #tpu.memory_space<vmem>>, %arg5: memref<128x512xbf16, #tpu.memory_space<vmem>>, %arg6: memref<8x128x128xbf16, #tpu.memory_space<vmem>>, %arg7: memref<8x128x128xbf16, #tpu.memory_space<vmem>>, %arg8: memref<1x16x16x768xf32, #tpu.memory_space<vmem>>, %arg9: memref<16x16x128xf32, #tpu.memory_space<vmem>>) attributes {dimension_semantics = [#tpu.dimension_semantics<parallel>], iteration_bounds = array<i64: 2>, scalar_prefetch = 0 : i64, scratch_operands = 1 : i64, tpu.core_type = #tpu.core_type<tc>, window_params = [{transform_indices = @transform_0, window_bounds = array<i64: 1, 16, 16, 128>}, {transform_indices = @transform_1, window_bounds = array<i64: 1, 16, 16, 1>}, {pipeline_mode = #tpu.pipeline_mode<synchronous>, transform_indices = @transform_2, window_bounds = array<i64: 128, 128>}, {pipeline_mode = #tpu.pipeline_mode<synchronous>, transform_indices = @transform_3, window_bounds = array<i64: 1, 128>}, {pipeline_mode = #tpu.pipeline_mode<synchronous>, transform_indices = @transform_4, window_bounds = array<i64: 128, 512>}, {pipeline_mode = #tpu.pipeline_mode<synchronous>, transform_indices = @transform_5, window_bounds = array<i64: 8, 128, 128>}, {pipeline_mode = #tpu.pipeline_mode<synchronous>, transform_indices = @transform_6, window_bounds = array<i64: 8, 128, 128>}, {transform_indices = @transform_7, window_bounds = array<i64: 1, 16, 16, 768>}]} {
    %c0 = arith.constant 0 : index
    %c0_0 = arith.constant 0 : index
    %c0_1 = arith.constant 0 : index
    %c0_2 = arith.constant 0 : index
    %0 = vector.load %arg1[%c0, %c0_0, %c0_1, %c0_2] : memref<1x16x16x128xf32, #tpu.memory_space<vmem>>, vector<1x16x16x128xf32>
    %1 = vector.shape_cast %0 : vector<1x16x16x128xf32> to vector<16x16x128xf32>
    %2 = arith.truncf %1 : vector<16x16x128xf32> to vector<16x16x128xbf16>
    %cst = arith.constant dense<0.000000e+00> : vector<128xf32>
    %3 = vector.multi_reduction <add>, %1, %cst [0, 1] : vector<16x16x128xf32> to vector<128xf32>
    %4 = vector.shape_cast %3 : vector<128xf32> to vector<1x1x128xf32>
    %cst_3 = arith.constant 2.560000e+02 : f32
    %5 = vector.broadcast %cst_3 : f32 to vector<1x1x128xf32>
    %6 = arith.divf %4, %5 : vector<1x1x128xf32>
    %c0_4 = arith.constant 0 : index
    %c0_5 = arith.constant 0 : index
    %7 = vector.load %arg3[%c0_4, %c0_5] : memref<128x128xf32, #tpu.memory_space<vmem>>, vector<128x128xf32>
    "tpu.trace_start"() <{level = 10 : i32, message = "hwc,cd->hwd"}> : () -> ()
    %cst_6 = arith.constant dense<0.000000e+00> : vector<1x1x128xf32>
    %8 = tpu.matmul %6, %7, %cst_6 {dimension_numbers = #tpu.dot_dimension_numbers<[2], [0], [0, 1], [1], [0, 0, 0, 1, 1, 1], [], []>} : vector<1x1x128xf32>, vector<128x128xf32>, vector<1x1x128xf32> -> vector<1x1x128xf32>
    "tpu.trace_stop"() : () -> ()
    %cst_7 = arith.constant 0.000000e+00 : f32
    %9 = vector.broadcast %cst_7 : f32 to vector<1x1x128xf32>
    %10 = arith.maximumf %8, %9 : vector<1x1x128xf32>
    %11 = vector.shape_cast %10 : vector<1x1x128xf32> to vector<1x1x128xf32>
    %12 = vector.broadcast %11 : vector<1x1x128xf32> to vector<16x16x128xf32>
    %c0_8 = arith.constant 0 : index
    %c0_9 = arith.constant 0 : index
    %c0_10 = arith.constant 0 : index
    %c0_11 = arith.constant 0 : index
    %13 = vector.load %arg8[%c0_8, %c0_9, %c0_10, %c0_11] : memref<1x16x16x768xf32, #tpu.memory_space<vmem>>, vector<1x16x16x128xf32>
    %14 = vector.shape_cast %13 : vector<1x16x16x128xf32> to vector<16x16x128xf32>
    %15 = vector.shape_cast %12 : vector<16x16x128xf32> to vector<1x16x16x128xf32>
    tpu.vector_store %arg8[%c0_8, %c0_9, %c0_10, %c0_11], %15 {strides = array<i32>} : memref<1x16x16x768xf32, #tpu.memory_space<vmem>>, vector<1x16x16x128xf32>,
    %c0_12 = arith.constant 0 : index
    %c0_13 = arith.constant 0 : index
    %c0_14 = arith.constant 0 : index
    %c0_15 = arith.constant 0 : index
    %16 = vector.load %arg2[%c0_12, %c0_13, %c0_14, %c0_15] : memref<1x16x16x1xf32, #tpu.memory_space<vmem>>, vector<1x16x16x1xf32>
    %17 = vector.shape_cast %16 : vector<1x16x16x1xf32> to vector<16x16x1xf32>
    %c0_16 = arith.constant 0 : index
    %c0_17 = arith.constant 0 : index
    %18 = vector.load %arg4[%c0_16, %c0_17] : memref<1x128xf32, #tpu.memory_space<vmem>>, vector<1x128xf32>
    %19 = vector.shape_cast %18 : vector<1x128xf32> to vector<1x1x128xf32>
    %20 = vector.broadcast %17 : vector<16x16x1xf32> to vector<16x16x128xf32>
    %21 = vector.broadcast %19 : vector<1x1x128xf32> to vector<16x16x128xf32>
    %22 = arith.mulf %20, %21 : vector<16x16x128xf32>
    %cst_18 = arith.constant 0.000000e+00 : f32
    %23 = vector.broadcast %cst_18 : f32 to vector<16x16x128xf32>
    %24 = arith.maximumf %22, %23 : vector<16x16x128xf32>
    %c0_19 = arith.constant 0 : index
    %c0_20 = arith.constant 0 : index
    %c0_21 = arith.constant 0 : index
    %c128 = arith.constant 128 : index
    %25 = vector.load %arg8[%c0_19, %c0_20, %c0_21, %c128] : memref<1x16x16x768xf32, #tpu.memory_space<vmem>>, vector<1x16x16x128xf32>
    %26 = vector.shape_cast %25 : vector<1x16x16x128xf32> to vector<16x16x128xf32>
    %27 = vector.shape_cast %24 : vector<16x16x128xf32> to vector<1x16x16x128xf32>
    tpu.vector_store %arg8[%c0_19, %c0_20, %c0_21, %c128], %27 {strides = array<i32>} : memref<1x16x16x768xf32, #tpu.memory_space<vmem>>, vector<1x16x16x128xf32>,
    %c0_22 = arith.constant 0 : index
    %c0_23 = arith.constant 0 : index
    %28 = vector.load %arg5[%c0_22, %c0_23] : memref<128x512xbf16, #tpu.memory_space<vmem>>, vector<128x512xbf16>
    "tpu.trace_start"() <{level = 10 : i32, message = "hwc,cd->hwd"}> : () -> ()
    %cst_24 = arith.constant dense<0.000000e+00> : vector<16x16x512xf32>
    %29 = tpu.matmul %2, %28, %cst_24 {dimension_numbers = #tpu.dot_dimension_numbers<[2], [0], [0, 1], [1], [0, 0, 0, 1, 1, 1], [], []>} : vector<16x16x128xbf16>, vector<128x512xbf16>, vector<16x16x512xf32> -> vector<16x16x512xf32>
    "tpu.trace_stop"() : () -> ()
    %30 = vector.extract_strided_slice %29 {offsets = [0, 0, 0], sizes = [16, 16, 128], strides = [1, 1, 1]} : vector<16x16x512xf32> to vector<16x16x128xf32>
    %cst_25 = arith.constant 0.000000e+00 : f32
    %31 = vector.broadcast %cst_25 : f32 to vector<16x16x128xf32>
    %32 = arith.maximumf %30, %31 : vector<16x16x128xf32>
    %c0_26 = arith.constant 0 : index
    %c0_27 = arith.constant 0 : index
    %c0_28 = arith.constant 0 : index
    %c256 = arith.constant 256 : index
    %33 = vector.load %arg8[%c0_26, %c0_27, %c0_28, %c256] : memref<1x16x16x768xf32, #tpu.memory_space<vmem>>, vector<1x16x16x128xf32>
    %34 = vector.shape_cast %33 : vector<1x16x16x128xf32> to vector<16x16x128xf32>
    %35 = vector.shape_cast %32 : vector<16x16x128xf32> to vector<1x16x16x128xf32>
    tpu.vector_store %arg8[%c0_26, %c0_27, %c0_28, %c256], %35 {strides = array<i32>} : memref<1x16x16x768xf32, #tpu.memory_space<vmem>>, vector<1x16x16x128xf32>,
    %36 = vector.extract_strided_slice %29 {offsets = [0, 0, 128], sizes = [16, 16, 128], strides = [1, 1, 1]} : vector<16x16x512xf32> to vector<16x16x128xf32>
    %c0_29 = arith.constant 0 : index
    %c0_30 = arith.constant 0 : index
    %c0_31 = arith.constant 0 : index
    %37 = vector.load %arg9[%c0_29, %c0_30, %c0_31] : memref<16x16x128xf32, #tpu.memory_space<vmem>>, vector<16x16x128xf32>
    tpu.vector_store %arg9[%c0_29, %c0_30, %c0_31], %36 {strides = array<i32>} : memref<16x16x128xf32, #tpu.memory_space<vmem>>, vector<16x16x128xf32>,
    %c0_32 = arith.constant 0 : index
    %c0_33 = arith.constant 0 : index
    %c0_34 = arith.constant 0 : index
    %38 = vector.load %arg6[%c0_32, %c0_33, %c0_34] : memref<8x128x128xbf16, #tpu.memory_space<vmem>>, vector<1x128x128xbf16>
    %39 = vector.shape_cast %38 : vector<1x128x128xbf16> to vector<128x128xbf16>
    "tpu.trace_start"() <{level = 10 : i32, message = "hwc,cd->hwd"}> : () -> ()
    %cst_35 = arith.constant dense<0.000000e+00> : vector<16x16x128xf32>
    %40 = tpu.matmul %2, %39, %cst_35 {dimension_numbers = #tpu.dot_dimension_numbers<[2], [0], [0, 1], [1], [0, 0, 0, 1, 1, 1], [], []>} : vector<16x16x128xbf16>, vector<128x128xbf16>, vector<16x16x128xf32> -> vector<16x16x128xf32>
    "tpu.trace_stop"() : () -> ()
    %c6 = arith.constant 6 : index
    %c6_36 = arith.constant 6 : index
    %c0_37 = arith.constant 0 : index
    %41 = vector.load %arg9[%c6, %c6_36, %c0_37] : memref<16x16x128xf32, #tpu.memory_space<vmem>>, vector<10x10x128xf32>
    %42 = vector.extract_strided_slice %40 {offsets = [0, 0, 0], sizes = [10, 10, 128], strides = [1, 1, 1]} : vector<16x16x128xf32> to vector<10x10x128xf32>
    %43 = arith.addf %41, %42 : vector<10x10x128xf32>
    %c6_38 = arith.constant 6 : index
    %c6_39 = arith.constant 6 : index
    %c0_40 = arith.constant 0 : index
    %44 = vector.load %arg9[%c6_38, %c6_39, %c0_40] : memref<16x16x128xf32, #tpu.memory_space<vmem>>, vector<10x10x128xf32>
    tpu.vector_store %arg9[%c6_38, %c6_39, %c0_40], %43 {strides = array<i32>} : memref<16x16x128xf32, #tpu.memory_space<vmem>>, vector<10x10x128xf32>,
    %c1 = arith.constant 1 : index
    %c0_41 = arith.constant 0 : index
    %c0_42 = arith.constant 0 : index
    %45 = vector.load %arg6[%c1, %c0_41, %c0_42] : memref<8x128x128xbf16, #tpu.memory_space<vmem>>, vector<1x128x128xbf16>
    %46 = vector.shape_cast %45 : vector<1x128x128xbf16> to vector<128x128xbf16>
    "tpu.trace_start"() <{level = 10 : i32, message = "hwc,cd->hwd"}> : () -> ()
    %cst_43 = arith.constant dense<0.000000e+00> : vector<16x16x128xf32>
    %47 = tpu.matmul %2, %46, %cst_43 {dimension_numbers = #tpu.dot_dimension_numbers<[2], [0], [0, 1], [1], [0, 0, 0, 1, 1, 1], [], []>} : vector<16x16x128xbf16>, vector<128x128xbf16>, vector<16x16x128xf32> -> vector<16x16x128xf32>
    "tpu.trace_stop"() : () -> ()
    %c6_44 = arith.constant 6 : index
    %c0_45 = arith.constant 0 : index
    %c0_46 = arith.constant 0 : index
    %48 = vector.load %arg9[%c6_44, %c0_45, %c0_46] : memref<16x16x128xf32, #tpu.memory_space<vmem>>, vector<10x16x128xf32>
    %49 = vector.extract_strided_slice %47 {offsets = [0, 0, 0], sizes = [10, 16, 128], strides = [1, 1, 1]} : vector<16x16x128xf32> to vector<10x16x128xf32>
    %50 = arith.addf %48, %49 : vector<10x16x128xf32>
    %c6_47 = arith.constant 6 : index
    %c0_48 = arith.constant 0 : index
    %c0_49 = arith.constant 0 : index
    %51 = vector.load %arg9[%c6_47, %c0_48, %c0_49] : memref<16x16x128xf32, #tpu.memory_space<vmem>>, vector<10x16x128xf32>
    tpu.vector_store %arg9[%c6_47, %c0_48, %c0_49], %50 {strides = array<i32>} : memref<16x16x128xf32, #tpu.memory_space<vmem>>, vector<10x16x128xf32>,
    %c2 = arith.constant 2 : index
    %c0_50 = arith.constant 0 : index
    %c0_51 = arith.constant 0 : index
    %52 = vector.load %arg6[%c2, %c0_50, %c0_51] : memref<8x128x128xbf16, #tpu.memory_space<vmem>>, vector<1x128x128xbf16>
    %53 = vector.shape_cast %52 : vector<1x128x128xbf16> to vector<128x128xbf16>
    "tpu.trace_start"() <{level = 10 : i32, message = "hwc,cd->hwd"}> : () -> ()
    %cst_52 = arith.constant dense<0.000000e+00> : vector<16x16x128xf32>
    %54 = tpu.matmul %2, %53, %cst_52 {dimension_numbers = #tpu.dot_dimension_numbers<[2], [0], [0, 1], [1], [0, 0, 0, 1, 1, 1], [], []>} : vector<16x16x128xbf16>, vector<128x128xbf16>, vector<16x16x128xf32> -> vector<16x16x128xf32>
    "tpu.trace_stop"() : () -> ()
    %c6_53 = arith.constant 6 : index
    %c0_54 = arith.constant 0 : index
    %c0_55 = arith.constant 0 : index
    %55 = vector.load %arg9[%c6_53, %c0_54, %c0_55] : memref<16x16x128xf32, #tpu.memory_space<vmem>>, vector<10x10x128xf32>
    %56 = vector.extract_strided_slice %54 {offsets = [0, 6, 0], sizes = [10, 10, 128], strides = [1, 1, 1]} : vector<16x16x128xf32> to vector<10x10x128xf32>
    %57 = arith.addf %55, %56 : vector<10x10x128xf32>
    %c6_56 = arith.constant 6 : index
    %c0_57 = arith.constant 0 : index
    %c0_58 = arith.constant 0 : index
    %58 = vector.load %arg9[%c6_56, %c0_57, %c0_58] : memref<16x16x128xf32, #tpu.memory_space<vmem>>, vector<10x10x128xf32>
    tpu.vector_store %arg9[%c6_56, %c0_57, %c0_58], %57 {strides = array<i32>} : memref<16x16x128xf32, #tpu.memory_space<vmem>>, vector<10x10x128xf32>,
    %c3 = arith.constant 3 : index
    %c0_59 = arith.constant 0 : index
    %c0_60 = arith.constant 0 : index
    %59 = vector.load %arg6[%c3, %c0_59, %c0_60] : memref<8x128x128xbf16, #tpu.memory_space<vmem>>, vector<1x128x128xbf16>
    %60 = vector.shape_cast %59 : vector<1x128x128xbf16> to vector<128x128xbf16>
    "tpu.trace_start"() <{level = 10 : i32, message = "hwc,cd->hwd"}> : () -> ()
    %cst_61 = arith.constant dense<0.000000e+00> : vector<16x16x128xf32>
    %61 = tpu.matmul %2, %60, %cst_61 {dimension_numbers = #tpu.dot_dimension_numbers<[2], [0], [0, 1], [1], [0, 0, 0, 1, 1, 1], [], []>} : vector<16x16x128xbf16>, vector<128x128xbf16>, vector<16x16x128xf32> -> vector<16x16x128xf32>
    "tpu.trace_stop"() : () -> ()
    %c0_62 = arith.constant 0 : index
    %c6_63 = arith.constant 6 : index
    %c0_64 = arith.constant 0 : index
    %62 = vector.load %arg9[%c0_62, %c6_63, %c0_64] : memref<16x16x128xf32, #tpu.memory_space<vmem>>, vector<16x10x128xf32>
    %63 = vector.extract_strided_slice %61 {offsets = [0, 0, 0], sizes = [16, 10, 128], strides = [1, 1, 1]} : vector<16x16x128xf32> to vector<16x10x128xf32>
    %64 = arith.addf %62, %63 : vector<16x10x128xf32>
    %c0_65 = arith.constant 0 : index
    %c6_66 = arith.constant 6 : index
    %c0_67 = arith.constant 0 : index
    %65 = vector.load %arg9[%c0_65, %c6_66, %c0_67] : memref<16x16x128xf32, #tpu.memory_space<vmem>>, vector<16x10x128xf32>
    tpu.vector_store %arg9[%c0_65, %c6_66, %c0_67], %64 {strides = array<i32>} : memref<16x16x128xf32, #tpu.memory_space<vmem>>, vector<16x10x128xf32>,
    %c4 = arith.constant 4 : index
    %c0_68 = arith.constant 0 : index
    %c0_69 = arith.constant 0 : index
    %66 = vector.load %arg6[%c4, %c0_68, %c0_69] : memref<8x128x128xbf16, #tpu.memory_space<vmem>>, vector<1x128x128xbf16>
    %67 = vector.shape_cast %66 : vector<1x128x128xbf16> to vector<128x128xbf16>
    "tpu.trace_start"() <{level = 10 : i32, message = "hwc,cd->hwd"}> : () -> ()
    %cst_70 = arith.constant dense<0.000000e+00> : vector<16x16x128xf32>
    %68 = tpu.matmul %2, %67, %cst_70 {dimension_numbers = #tpu.dot_dimension_numbers<[2], [0], [0, 1], [1], [0, 0, 0, 1, 1, 1], [], []>} : vector<16x16x128xbf16>, vector<128x128xbf16>, vector<16x16x128xf32> -> vector<16x16x128xf32>
    "tpu.trace_stop"() : () -> ()
    %c0_71 = arith.constant 0 : index
    %c0_72 = arith.constant 0 : index
    %c0_73 = arith.constant 0 : index
    %69 = vector.load %arg9[%c0_71, %c0_72, %c0_73] : memref<16x16x128xf32, #tpu.memory_space<vmem>>, vector<16x10x128xf32>
    %70 = vector.extract_strided_slice %68 {offsets = [0, 6, 0], sizes = [16, 10, 128], strides = [1, 1, 1]} : vector<16x16x128xf32> to vector<16x10x128xf32>
    %71 = arith.addf %69, %70 : vector<16x10x128xf32>
    %c0_74 = arith.constant 0 : index
    %c0_75 = arith.constant 0 : index
    %c0_76 = arith.constant 0 : index
    %72 = vector.load %arg9[%c0_74, %c0_75, %c0_76] : memref<16x16x128xf32, #tpu.memory_space<vmem>>, vector<16x10x128xf32>
    tpu.vector_store %arg9[%c0_74, %c0_75, %c0_76], %71 {strides = array<i32>} : memref<16x16x128xf32, #tpu.memory_space<vmem>>, vector<16x10x128xf32>,
    %c5 = arith.constant 5 : index
    %c0_77 = arith.constant 0 : index
    %c0_78 = arith.constant 0 : index
    %73 = vector.load %arg6[%c5, %c0_77, %c0_78] : memref<8x128x128xbf16, #tpu.memory_space<vmem>>, vector<1x128x128xbf16>
    %74 = vector.shape_cast %73 : vector<1x128x128xbf16> to vector<128x128xbf16>
    "tpu.trace_start"() <{level = 10 : i32, message = "hwc,cd->hwd"}> : () -> ()
    %cst_79 = arith.constant dense<0.000000e+00> : vector<16x16x128xf32>
    %75 = tpu.matmul %2, %74, %cst_79 {dimension_numbers = #tpu.dot_dimension_numbers<[2], [0], [0, 1], [1], [0, 0, 0, 1, 1, 1], [], []>} : vector<16x16x128xbf16>, vector<128x128xbf16>, vector<16x16x128xf32> -> vector<16x16x128xf32>
    "tpu.trace_stop"() : () -> ()
    %c0_80 = arith.constant 0 : index
    %c6_81 = arith.constant 6 : index
    %c0_82 = arith.constant 0 : index
    %76 = vector.load %arg9[%c0_80, %c6_81, %c0_82] : memref<16x16x128xf32, #tpu.memory_space<vmem>>, vector<10x10x128xf32>
    %77 = vector.extract_strided_slice %75 {offsets = [6, 0, 0], sizes = [10, 10, 128], strides = [1, 1, 1]} : vector<16x16x128xf32> to vector<10x10x128xf32>
    %78 = arith.addf %76, %77 : vector<10x10x128xf32>
    %c0_83 = arith.constant 0 : index
    %c6_84 = arith.constant 6 : index
    %c0_85 = arith.constant 0 : index
    %79 = vector.load %arg9[%c0_83, %c6_84, %c0_85] : memref<16x16x128xf32, #tpu.memory_space<vmem>>, vector<10x10x128xf32>
    tpu.vector_store %arg9[%c0_83, %c6_84, %c0_85], %78 {strides = array<i32>} : memref<16x16x128xf32, #tpu.memory_space<vmem>>, vector<10x10x128xf32>,
    %c6_86 = arith.constant 6 : index
    %c0_87 = arith.constant 0 : index
    %c0_88 = arith.constant 0 : index
    %80 = vector.load %arg6[%c6_86, %c0_87, %c0_88] : memref<8x128x128xbf16, #tpu.memory_space<vmem>>, vector<1x128x128xbf16>
    %81 = vector.shape_cast %80 : vector<1x128x128xbf16> to vector<128x128xbf16>
    "tpu.trace_start"() <{level = 10 : i32, message = "hwc,cd->hwd"}> : () -> ()
    %cst_89 = arith.constant dense<0.000000e+00> : vector<16x16x128xf32>
    %82 = tpu.matmul %2, %81, %cst_89 {dimension_numbers = #tpu.dot_dimension_numbers<[2], [0], [0, 1], [1], [0, 0, 0, 1, 1, 1], [], []>} : vector<16x16x128xbf16>, vector<128x128xbf16>, vector<16x16x128xf32> -> vector<16x16x128xf32>
    "tpu.trace_stop"() : () -> ()
    %c0_90 = arith.constant 0 : index
    %c0_91 = arith.constant 0 : index
    %c0_92 = arith.constant 0 : index
    %83 = vector.load %arg9[%c0_90, %c0_91, %c0_92] : memref<16x16x128xf32, #tpu.memory_space<vmem>>, vector<10x16x128xf32>
    %84 = vector.extract_strided_slice %82 {offsets = [6, 0, 0], sizes = [10, 16, 128], strides = [1, 1, 1]} : vector<16x16x128xf32> to vector<10x16x128xf32>
    %85 = arith.addf %83, %84 : vector<10x16x128xf32>
    %c0_93 = arith.constant 0 : index
    %c0_94 = arith.constant 0 : index
    %c0_95 = arith.constant 0 : index
    %86 = vector.load %arg9[%c0_93, %c0_94, %c0_95] : memref<16x16x128xf32, #tpu.memory_space<vmem>>, vector<10x16x128xf32>
    tpu.vector_store %arg9[%c0_93, %c0_94, %c0_95], %85 {strides = array<i32>} : memref<16x16x128xf32, #tpu.memory_space<vmem>>, vector<10x16x128xf32>,
    %c7 = arith.constant 7 : index
    %c0_96 = arith.constant 0 : index
    %c0_97 = arith.constant 0 : index
    %87 = vector.load %arg6[%c7, %c0_96, %c0_97] : memref<8x128x128xbf16, #tpu.memory_space<vmem>>, vector<1x128x128xbf16>
    %88 = vector.shape_cast %87 : vector<1x128x128xbf16> to vector<128x128xbf16>
    "tpu.trace_start"() <{level = 10 : i32, message = "hwc,cd->hwd"}> : () -> ()
    %cst_98 = arith.constant dense<0.000000e+00> : vector<16x16x128xf32>
    %89 = tpu.matmul %2, %88, %cst_98 {dimension_numbers = #tpu.dot_dimension_numbers<[2], [0], [0, 1], [1], [0, 0, 0, 1, 1, 1], [], []>} : vector<16x16x128xbf16>, vector<128x128xbf16>, vector<16x16x128xf32> -> vector<16x16x128xf32>
    "tpu.trace_stop"() : () -> ()
    %c0_99 = arith.constant 0 : index
    %c0_100 = arith.constant 0 : index
    %c0_101 = arith.constant 0 : index
    %90 = vector.load %arg9[%c0_99, %c0_100, %c0_101] : memref<16x16x128xf32, #tpu.memory_space<vmem>>, vector<10x10x128xf32>
    %91 = vector.extract_strided_slice %89 {offsets = [6, 6, 0], sizes = [10, 10, 128], strides = [1, 1, 1]} : vector<16x16x128xf32> to vector<10x10x128xf32>
    %92 = arith.addf %90, %91 : vector<10x10x128xf32>
    %c0_102 = arith.constant 0 : index
    %c0_103 = arith.constant 0 : index
    %c0_104 = arith.constant 0 : index
    %93 = vector.load %arg9[%c0_102, %c0_103, %c0_104] : memref<16x16x128xf32, #tpu.memory_space<vmem>>, vector<10x10x128xf32>
    tpu.vector_store %arg9[%c0_102, %c0_103, %c0_104], %92 {strides = array<i32>} : memref<16x16x128xf32, #tpu.memory_space<vmem>>, vector<10x10x128xf32>,
    %c0_105 = arith.constant 0 : index
    %c0_106 = arith.constant 0 : index
    %c0_107 = arith.constant 0 : index
    %94 = vector.load %arg9[%c0_105, %c0_106, %c0_107] : memref<16x16x128xf32, #tpu.memory_space<vmem>>, vector<16x16x128xf32>
    %cst_108 = arith.constant 0.000000e+00 : f32
    %95 = vector.broadcast %cst_108 : f32 to vector<16x16x128xf32>
    %96 = arith.maximumf %94, %95 : vector<16x16x128xf32>
    %c0_109 = arith.constant 0 : index
    %c0_110 = arith.constant 0 : index
    %c0_111 = arith.constant 0 : index
    %c384 = arith.constant 384 : index
    %97 = vector.load %arg8[%c0_109, %c0_110, %c0_111, %c384] : memref<1x16x16x768xf32, #tpu.memory_space<vmem>>, vector<1x16x16x128xf32>
    %98 = vector.shape_cast %97 : vector<1x16x16x128xf32> to vector<16x16x128xf32>
    %99 = vector.shape_cast %96 : vector<16x16x128xf32> to vector<1x16x16x128xf32>
    tpu.vector_store %arg8[%c0_109, %c0_110, %c0_111, %c384], %99 {strides = array<i32>} : memref<1x16x16x768xf32, #tpu.memory_space<vmem>>, vector<1x16x16x128xf32>,
    %100 = vector.extract_strided_slice %29 {offsets = [0, 0, 256], sizes = [16, 16, 128], strides = [1, 1, 1]} : vector<16x16x512xf32> to vector<16x16x128xf32>
    %c0_112 = arith.constant 0 : index
    %c0_113 = arith.constant 0 : index
    %c0_114 = arith.constant 0 : index
    %101 = vector.load %arg9[%c0_112, %c0_113, %c0_114] : memref<16x16x128xf32, #tpu.memory_space<vmem>>, vector<16x16x128xf32>
    tpu.vector_store %arg9[%c0_112, %c0_113, %c0_114], %100 {strides = array<i32>} : memref<16x16x128xf32, #tpu.memory_space<vmem>>, vector<16x16x128xf32>,
    %c0_115 = arith.constant 0 : index
    %c0_116 = arith.constant 0 : index
    %c0_117 = arith.constant 0 : index
    %102 = vector.load %arg7[%c0_115, %c0_116, %c0_117] : memref<8x128x128xbf16, #tpu.memory_space<vmem>>, vector<1x128x128xbf16>
    %103 = vector.shape_cast %102 : vector<1x128x128xbf16> to vector<128x128xbf16>
    "tpu.trace_start"() <{level = 10 : i32, message = "hwc,cd->hwd"}> : () -> ()
    %cst_118 = arith.constant dense<0.000000e+00> : vector<16x16x128xf32>
    %104 = tpu.matmul %2, %103, %cst_118 {dimension_numbers = #tpu.dot_dimension_numbers<[2], [0], [0, 1], [1], [0, 0, 0, 1, 1, 1], [], []>} : vector<16x16x128xbf16>, vector<128x128xbf16>, vector<16x16x128xf32> -> vector<16x16x128xf32>
    "tpu.trace_stop"() : () -> ()
    %c12 = arith.constant 12 : index
    %c12_119 = arith.constant 12 : index
    %c0_120 = arith.constant 0 : index
    %105 = vector.load %arg9[%c12, %c12_119, %c0_120] : memref<16x16x128xf32, #tpu.memory_space<vmem>>, vector<4x4x128xf32>
    %106 = vector.extract_strided_slice %104 {offsets = [0, 0, 0], sizes = [4, 4, 128], strides = [1, 1, 1]} : vector<16x16x128xf32> to vector<4x4x128xf32>
    %107 = arith.addf %105, %106 : vector<4x4x128xf32>
    %c12_121 = arith.constant 12 : index
    %c12_122 = arith.constant 12 : index
    %c0_123 = arith.constant 0 : index
    %108 = vector.load %arg9[%c12_121, %c12_122, %c0_123] : memref<16x16x128xf32, #tpu.memory_space<vmem>>, vector<4x4x128xf32>
    tpu.vector_store %arg9[%c12_121, %c12_122, %c0_123], %107 {strides = array<i32>} : memref<16x16x128xf32, #tpu.memory_space<vmem>>, vector<4x4x128xf32>,
    %c1_124 = arith.constant 1 : index
    %c0_125 = arith.constant 0 : index
    %c0_126 = arith.constant 0 : index
    %109 = vector.load %arg7[%c1_124, %c0_125, %c0_126] : memref<8x128x128xbf16, #tpu.memory_space<vmem>>, vector<1x128x128xbf16>
    %110 = vector.shape_cast %109 : vector<1x128x128xbf16> to vector<128x128xbf16>
    "tpu.trace_start"() <{level = 10 : i32, message = "hwc,cd->hwd"}> : () -> ()
    %cst_127 = arith.constant dense<0.000000e+00> : vector<16x16x128xf32>
    %111 = tpu.matmul %2, %110, %cst_127 {dimension_numbers = #tpu.dot_dimension_numbers<[2], [0], [0, 1], [1], [0, 0, 0, 1, 1, 1], [], []>} : vector<16x16x128xbf16>, vector<128x128xbf16>, vector<16x16x128xf32> -> vector<16x16x128xf32>
    "tpu.trace_stop"() : () -> ()
    %c12_128 = arith.constant 12 : index
    %c0_129 = arith.constant 0 : index
    %c0_130 = arith.constant 0 : index
    %112 = vector.load %arg9[%c12_128, %c0_129, %c0_130] : memref<16x16x128xf32, #tpu.memory_space<vmem>>, vector<4x16x128xf32>
    %113 = vector.extract_strided_slice %111 {offsets = [0, 0, 0], sizes = [4, 16, 128], strides = [1, 1, 1]} : vector<16x16x128xf32> to vector<4x16x128xf32>
    %114 = arith.addf %112, %113 : vector<4x16x128xf32>
    %c12_131 = arith.constant 12 : index
    %c0_132 = arith.constant 0 : index
    %c0_133 = arith.constant 0 : index
    %115 = vector.load %arg9[%c12_131, %c0_132, %c0_133] : memref<16x16x128xf32, #tpu.memory_space<vmem>>, vector<4x16x128xf32>
    tpu.vector_store %arg9[%c12_131, %c0_132, %c0_133], %114 {strides = array<i32>} : memref<16x16x128xf32, #tpu.memory_space<vmem>>, vector<4x16x128xf32>,
    %c2_134 = arith.constant 2 : index
    %c0_135 = arith.constant 0 : index
    %c0_136 = arith.constant 0 : index
    %116 = vector.load %arg7[%c2_134, %c0_135, %c0_136] : memref<8x128x128xbf16, #tpu.memory_space<vmem>>, vector<1x128x128xbf16>
    %117 = vector.shape_cast %116 : vector<1x128x128xbf16> to vector<128x128xbf16>
    "tpu.trace_start"() <{level = 10 : i32, message = "hwc,cd->hwd"}> : () -> ()
    %cst_137 = arith.constant dense<0.000000e+00> : vector<16x16x128xf32>
    %118 = tpu.matmul %2, %117, %cst_137 {dimension_numbers = #tpu.dot_dimension_numbers<[2], [0], [0, 1], [1], [0, 0, 0, 1, 1, 1], [], []>} : vector<16x16x128xbf16>, vector<128x128xbf16>, vector<16x16x128xf32> -> vector<16x16x128xf32>
    "tpu.trace_stop"() : () -> ()
    %c12_138 = arith.constant 12 : index
    %c0_139 = arith.constant 0 : index
    %c0_140 = arith.constant 0 : index
    %119 = vector.load %arg9[%c12_138, %c0_139, %c0_140] : memref<16x16x128xf32, #tpu.memory_space<vmem>>, vector<4x4x128xf32>
    %120 = vector.extract_strided_slice %118 {offsets = [0, 12, 0], sizes = [4, 4, 128], strides = [1, 1, 1]} : vector<16x16x128xf32> to vector<4x4x128xf32>
    %121 = arith.addf %119, %120 : vector<4x4x128xf32>
    %c12_141 = arith.constant 12 : index
    %c0_142 = arith.constant 0 : index
    %c0_143 = arith.constant 0 : index
    %122 = vector.load %arg9[%c12_141, %c0_142, %c0_143] : memref<16x16x128xf32, #tpu.memory_space<vmem>>, vector<4x4x128xf32>
    tpu.vector_store %arg9[%c12_141, %c0_142, %c0_143], %121 {strides = array<i32>} : memref<16x16x128xf32, #tpu.memory_space<vmem>>, vector<4x4x128xf32>,
    %c3_144 = arith.constant 3 : index
    %c0_145 = arith.constant 0 : index
    %c0_146 = arith.constant 0 : index
    %123 = vector.load %arg7[%c3_144, %c0_145, %c0_146] : memref<8x128x128xbf16, #tpu.memory_space<vmem>>, vector<1x128x128xbf16>
    %124 = vector.shape_cast %123 : vector<1x128x128xbf16> to vector<128x128xbf16>
    "tpu.trace_start"() <{level = 10 : i32, message = "hwc,cd->hwd"}> : () -> ()
    %cst_147 = arith.constant dense<0.000000e+00> : vector<16x16x128xf32>
    %125 = tpu.matmul %2, %124, %cst_147 {dimension_numbers = #tpu.dot_dimension_numbers<[2], [0], [0, 1], [1], [0, 0, 0, 1, 1, 1], [], []>} : vector<16x16x128xbf16>, vector<128x128xbf16>, vector<16x16x128xf32> -> vector<16x16x128xf32>
    "tpu.trace_stop"() : () -> ()
    %c0_148 = arith.constant 0 : index
    %c12_149 = arith.constant 12 : index
    %c0_150 = arith.constant 0 : index
    %126 = vector.load %arg9[%c0_148, %c12_149, %c0_150] : memref<16x16x128xf32, #tpu.memory_space<vmem>>, vector<16x4x128xf32>
    %127 = vector.extract_strided_slice %125 {offsets = [0, 0, 0], sizes = [16, 4, 128], strides = [1, 1, 1]} : vector<16x16x128xf32> to vector<16x4x128xf32>
    %128 = arith.addf %126, %127 : vector<16x4x128xf32>
    %c0_151 = arith.constant 0 : index
    %c12_152 = arith.constant 12 : index
    %c0_153 = arith.constant 0 : index
    %129 = vector.load %arg9[%c0_151, %c12_152, %c0_153] : memref<16x16x128xf32, #tpu.memory_space<vmem>>, vector<16x4x128xf32>
    tpu.vector_store %arg9[%c0_151, %c12_152, %c0_153], %128 {strides = array<i32>} : memref<16x16x128xf32, #tpu.memory_space<vmem>>, vector<16x4x128xf32>,
    %c4_154 = arith.constant 4 : index
    %c0_155 = arith.constant 0 : index
    %c0_156 = arith.constant 0 : index
    %130 = vector.load %arg7[%c4_154, %c0_155, %c0_156] : memref<8x128x128xbf16, #tpu.memory_space<vmem>>, vector<1x128x128xbf16>
    %131 = vector.shape_cast %130 : vector<1x128x128xbf16> to vector<128x128xbf16>
    "tpu.trace_start"() <{level = 10 : i32, message = "hwc,cd->hwd"}> : () -> ()
    %cst_157 = arith.constant dense<0.000000e+00> : vector<16x16x128xf32>
    %132 = tpu.matmul %2, %131, %cst_157 {dimension_numbers = #tpu.dot_dimension_numbers<[2], [0], [0, 1], [1], [0, 0, 0, 1, 1, 1], [], []>} : vector<16x16x128xbf16>, vector<128x128xbf16>, vector<16x16x128xf32> -> vector<16x16x128xf32>
    "tpu.trace_stop"() : () -> ()
    %c0_158 = arith.constant 0 : index
    %c0_159 = arith.constant 0 : index
    %c0_160 = arith.constant 0 : index
    %133 = vector.load %arg9[%c0_158, %c0_159, %c0_160] : memref<16x16x128xf32, #tpu.memory_space<vmem>>, vector<16x4x128xf32>
    %134 = vector.extract_strided_slice %132 {offsets = [0, 12, 0], sizes = [16, 4, 128], strides = [1, 1, 1]} : vector<16x16x128xf32> to vector<16x4x128xf32>
    %135 = arith.addf %133, %134 : vector<16x4x128xf32>
    %c0_161 = arith.constant 0 : index
    %c0_162 = arith.constant 0 : index
    %c0_163 = arith.constant 0 : index
    %136 = vector.load %arg9[%c0_161, %c0_162, %c0_163] : memref<16x16x128xf32, #tpu.memory_space<vmem>>, vector<16x4x128xf32>
    tpu.vector_store %arg9[%c0_161, %c0_162, %c0_163], %135 {strides = array<i32>} : memref<16x16x128xf32, #tpu.memory_space<vmem>>, vector<16x4x128xf32>,
    %c5_164 = arith.constant 5 : index
    %c0_165 = arith.constant 0 : index
    %c0_166 = arith.constant 0 : index
    %137 = vector.load %arg7[%c5_164, %c0_165, %c0_166] : memref<8x128x128xbf16, #tpu.memory_space<vmem>>, vector<1x128x128xbf16>
    %138 = vector.shape_cast %137 : vector<1x128x128xbf16> to vector<128x128xbf16>
    "tpu.trace_start"() <{level = 10 : i32, message = "hwc,cd->hwd"}> : () -> ()
    %cst_167 = arith.constant dense<0.000000e+00> : vector<16x16x128xf32>
    %139 = tpu.matmul %2, %138, %cst_167 {dimension_numbers = #tpu.dot_dimension_numbers<[2], [0], [0, 1], [1], [0, 0, 0, 1, 1, 1], [], []>} : vector<16x16x128xbf16>, vector<128x128xbf16>, vector<16x16x128xf32> -> vector<16x16x128xf32>
    "tpu.trace_stop"() : () -> ()
    %c0_168 = arith.constant 0 : index
    %c12_169 = arith.constant 12 : index
    %c0_170 = arith.constant 0 : index
    %140 = vector.load %arg9[%c0_168, %c12_169, %c0_170] : memref<16x16x128xf32, #tpu.memory_space<vmem>>, vector<4x4x128xf32>
    %141 = vector.extract_strided_slice %139 {offsets = [12, 0, 0], sizes = [4, 4, 128], strides = [1, 1, 1]} : vector<16x16x128xf32> to vector<4x4x128xf32>
    %142 = arith.addf %140, %141 : vector<4x4x128xf32>
    %c0_171 = arith.constant 0 : index
    %c12_172 = arith.constant 12 : index
    %c0_173 = arith.constant 0 : index
    %143 = vector.load %arg9[%c0_171, %c12_172, %c0_173] : memref<16x16x128xf32, #tpu.memory_space<vmem>>, vector<4x4x128xf32>
    tpu.vector_store %arg9[%c0_171, %c12_172, %c0_173], %142 {strides = array<i32>} : memref<16x16x128xf32, #tpu.memory_space<vmem>>, vector<4x4x128xf32>,
    %c6_174 = arith.constant 6 : index
    %c0_175 = arith.constant 0 : index
    %c0_176 = arith.constant 0 : index
    %144 = vector.load %arg7[%c6_174, %c0_175, %c0_176] : memref<8x128x128xbf16, #tpu.memory_space<vmem>>, vector<1x128x128xbf16>
    %145 = vector.shape_cast %144 : vector<1x128x128xbf16> to vector<128x128xbf16>
    "tpu.trace_start"() <{level = 10 : i32, message = "hwc,cd->hwd"}> : () -> ()
    %cst_177 = arith.constant dense<0.000000e+00> : vector<16x16x128xf32>
    %146 = tpu.matmul %2, %145, %cst_177 {dimension_numbers = #tpu.dot_dimension_numbers<[2], [0], [0, 1], [1], [0, 0, 0, 1, 1, 1], [], []>} : vector<16x16x128xbf16>, vector<128x128xbf16>, vector<16x16x128xf32> -> vector<16x16x128xf32>
    "tpu.trace_stop"() : () -> ()
    %c0_178 = arith.constant 0 : index
    %c0_179 = arith.constant 0 : index
    %c0_180 = arith.constant 0 : index
    %147 = vector.load %arg9[%c0_178, %c0_179, %c0_180] : memref<16x16x128xf32, #tpu.memory_space<vmem>>, vector<4x16x128xf32>
    %148 = vector.extract_strided_slice %146 {offsets = [12, 0, 0], sizes = [4, 16, 128], strides = [1, 1, 1]} : vector<16x16x128xf32> to vector<4x16x128xf32>
    %149 = arith.addf %147, %148 : vector<4x16x128xf32>
    %c0_181 = arith.constant 0 : index
    %c0_182 = arith.constant 0 : index
    %c0_183 = arith.constant 0 : index
    %150 = vector.load %arg9[%c0_181, %c0_182, %c0_183] : memref<16x16x128xf32, #tpu.memory_space<vmem>>, vector<4x16x128xf32>
    tpu.vector_store %arg9[%c0_181, %c0_182, %c0_183], %149 {strides = array<i32>} : memref<16x16x128xf32, #tpu.memory_space<vmem>>, vector<4x16x128xf32>,
    %c7_184 = arith.constant 7 : index
    %c0_185 = arith.constant 0 : index
    %c0_186 = arith.constant 0 : index
    %151 = vector.load %arg7[%c7_184, %c0_185, %c0_186] : memref<8x128x128xbf16, #tpu.memory_space<vmem>>, vector<1x128x128xbf16>
    %152 = vector.shape_cast %151 : vector<1x128x128xbf16> to vector<128x128xbf16>
    "tpu.trace_start"() <{level = 10 : i32, message = "hwc,cd->hwd"}> : () -> ()
    %cst_187 = arith.constant dense<0.000000e+00> : vector<16x16x128xf32>
    %153 = tpu.matmul %2, %152, %cst_187 {dimension_numbers = #tpu.dot_dimension_numbers<[2], [0], [0, 1], [1], [0, 0, 0, 1, 1, 1], [], []>} : vector<16x16x128xbf16>, vector<128x128xbf16>, vector<16x16x128xf32> -> vector<16x16x128xf32>
    "tpu.trace_stop"() : () -> ()
    %c0_188 = arith.constant 0 : index
    %c0_189 = arith.constant 0 : index
    %c0_190 = arith.constant 0 : index
    %154 = vector.load %arg9[%c0_188, %c0_189, %c0_190] : memref<16x16x128xf32, #tpu.memory_space<vmem>>, vector<4x4x128xf32>
    %155 = vector.extract_strided_slice %153 {offsets = [12, 12, 0], sizes = [4, 4, 128], strides = [1, 1, 1]} : vector<16x16x128xf32> to vector<4x4x128xf32>
    %156 = arith.addf %154, %155 : vector<4x4x128xf32>
    %c0_191 = arith.constant 0 : index
    %c0_192 = arith.constant 0 : index
    %c0_193 = arith.constant 0 : index
    %157 = vector.load %arg9[%c0_191, %c0_192, %c0_193] : memref<16x16x128xf32, #tpu.memory_space<vmem>>, vector<4x4x128xf32>
    tpu.vector_store %arg9[%c0_191, %c0_192, %c0_193], %156 {strides = array<i32>} : memref<16x16x128xf32, #tpu.memory_space<vmem>>, vector<4x4x128xf32>,
    %c0_194 = arith.constant 0 : index
    %c0_195 = arith.constant 0 : index
    %c0_196 = arith.constant 0 : index
    %158 = vector.load %arg9[%c0_194, %c0_195, %c0_196] : memref<16x16x128xf32, #tpu.memory_space<vmem>>, vector<16x16x128xf32>
    %cst_197 = arith.constant 0.000000e+00 : f32
    %159 = vector.broadcast %cst_197 : f32 to vector<16x16x128xf32>
    %160 = arith.maximumf %158, %159 : vector<16x16x128xf32>
    %c0_198 = arith.constant 0 : index
    %c0_199 = arith.constant 0 : index
    %c0_200 = arith.constant 0 : index
    %c512 = arith.constant 512 : index
    %161 = vector.load %arg8[%c0_198, %c0_199, %c0_200, %c512] : memref<1x16x16x768xf32, #tpu.memory_space<vmem>>, vector<1x16x16x128xf32>
    %162 = vector.shape_cast %161 : vector<1x16x16x128xf32> to vector<16x16x128xf32>
    %163 = vector.shape_cast %160 : vector<16x16x128xf32> to vector<1x16x16x128xf32>
    tpu.vector_store %arg8[%c0_198, %c0_199, %c0_200, %c512], %163 {strides = array<i32>} : memref<1x16x16x768xf32, #tpu.memory_space<vmem>>, vector<1x16x16x128xf32>,
    %164 = vector.extract_strided_slice %29 {offsets = [0, 0, 384], sizes = [16, 16, 128], strides = [1, 1, 1]} : vector<16x16x512xf32> to vector<16x16x128xf32>
    %cst_201 = arith.constant 0.000000e+00 : f32
    %165 = vector.broadcast %cst_201 : f32 to vector<16x16x128xf32>
    %166 = arith.maximumf %164, %165 : vector<16x16x128xf32>
    %c0_202 = arith.constant 0 : index
    %c0_203 = arith.constant 0 : index
    %c0_204 = arith.constant 0 : index
    %c640 = arith.constant 640 : index
    %167 = vector.load %arg8[%c0_202, %c0_203, %c0_204, %c640] : memref<1x16x16x768xf32, #tpu.memory_space<vmem>>, vector<1x16x16x128xf32>
    %168 = vector.shape_cast %167 : vector<1x16x16x128xf32> to vector<16x16x128xf32>
    %169 = vector.shape_cast %166 : vector<16x16x128xf32> to vector<1x16x16x128xf32>
    tpu.vector_store %arg8[%c0_202, %c0_203, %c0_204, %c640], %169 {strides = array<i32>} : memref<1x16x16x768xf32, #tpu.memory_space<vmem>>, vector<1x16x16x128xf32>,
    return
  }
  func.func @transform_0(%arg0: i32) -> (i32, i32, i32, i32) {
    %c0_i32 = arith.constant 0 : i32
    %c0_i32_0 = arith.constant 0 : i32
    %c0_i32_1 = arith.constant 0 : i32
    %c0_i32_2 = arith.constant 0 : i32
    return %arg0, %c0_i32, %c0_i32_0, %c0_i32_1 : i32, i32, i32, i32
  }
  func.func @transform_1(%arg0: i32) -> (i32, i32, i32, i32) {
    %c0_i32 = arith.constant 0 : i32
    %c0_i32_0 = arith.constant 0 : i32
    %c0_i32_1 = arith.constant 0 : i32
    %c0_i32_2 = arith.constant 0 : i32
    return %arg0, %c0_i32, %c0_i32_0, %c0_i32_1 : i32, i32, i32, i32
  }
  func.func @transform_2(%arg0: i32) -> (i32, i32) {
    %c0_i32 = arith.constant 0 : i32
    %c0_i32_0 = arith.constant 0 : i32
    %c0_i32_1 = arith.constant 0 : i32
    return %c0_i32, %c0_i32_0 : i32, i32
  }
  func.func @transform_3(%arg0: i32) -> (i32, i32) {
    %c0_i32 = arith.constant 0 : i32
    %c0_i32_0 = arith.constant 0 : i32
    %c0_i32_1 = arith.constant 0 : i32
    return %c0_i32, %c0_i32_0 : i32, i32
  }
  func.func @transform_4(%arg0: i32) -> (i32, i32) {
    %c0_i32 = arith.constant 0 : i32
    %c0_i32_0 = arith.constant 0 : i32
    %c0_i32_1 = arith.constant 0 : i32
    return %c0_i32, %c0_i32_0 : i32, i32
  }
  func.func @transform_5(%arg0: i32) -> (i32, i32, i32) {
    %c0_i32 = arith.constant 0 : i32
    %c0_i32_0 = arith.constant 0 : i32
    %c0_i32_1 = arith.constant 0 : i32
    %c0_i32_2 = arith.constant 0 : i32
    return %c0_i32, %c0_i32_0, %c0_i32_1 : i32, i32, i32
  }
  func.func @transform_6(%arg0: i32) -> (i32, i32, i32) {
    %c0_i32 = arith.constant 0 : i32
    %c0_i32_0 = arith.constant 0 : i32
    %c0_i32_1 = arith.constant 0 : i32
    %c0_i32_2 = arith.constant 0 : i32
    return %c0_i32, %c0_i32_0, %c0_i32_1 : i32, i32, i32
  }
  func.func @transform_7(%arg0: i32) -> (i32, i32, i32, i32) {
    %c0_i32 = arith.constant 0 : i32
    %c0_i32_0 = arith.constant 0 : i32
    %c0_i32_1 = arith.constant 0 : i32
    %c0_i32_2 = arith.constant 0 : i32
    return %arg0, %c0_i32, %c0_i32_0, %c0_i32_1 : i32, i32, i32, i32
  }
}

</mosaic_0001>

<bundles_post_ra>
// kernel: tpu_custom_call.1
= control target key start
LH: loop header
LB: loop body
LE: loop exit
PB: predicated region body
PF: predicated region fallthrough
CT: control target
= control target key end

     0   :  { %s9994_s0 = inlined_call_operand.hbm [shape: f32[2,16,16,128], index: 0, kind: input, shape index: {}]   ;;  %s9995_s1 = inlined_call_operand.vmem [shape: f32[2,16,16,1], index: 1, kind: input, shape index: {}]   ;;  %s9996_s2 = inlined_call_operand.hbm [shape: f32[128,128], index: 2, kind: input, shape index: {}]   ;;  %s9997_s3 = inlined_call_operand.hbm [shape: f32[1,128], index: 3, kind: input, shape index: {}]   ;;  %s9998_s4 = inlined_call_operand.hbm [shape: bf16[128,512], index: 4, kind: input, shape index: {}]   ;;  %s9999_s5 = inlined_call_operand.hbm [shape: bf16[8,128,128], index: 5, kind: input, shape index: {}]   ;;  %s10000_s6 = inlined_call_operand.hbm [shape: bf16[8,128,128], index: 6, kind: input, shape index: {}]   ;;  %s10001_s7 = inlined_call_operand.hbm [shape: f32[2,16,16,768], index: 7, kind: output, shape index: {}]  }
   0x1   :  { %10010 = sst [smem:[#allocation41_spill]] %s9996_s2 }
   0x2   :  { %12 = vsyncpa [#allocation4], 0 }
   0x3   :  { %14 = vsyncpa [#allocation4 + $0x1], 0 }
   0x4   :  { %15 = vsyncpa [#allocation7], 0 }
   0x5   :  { %16 = vsyncpa [#allocation10], 0 }
   0x6   :  { %17 = vsyncpa [#allocation13], 0 }
   0x7   :  { %18 = vsyncpa [#allocation5], 0 }
   0x8   :  { %20 = vsyncpa [#allocation5 + $0x1], 0  ;;  %s8412_s24 = smov 0   ;;  %s8414_s25 = smov 0  }
   0x9   :  { %s8416_s26 = smov 0   ;;  %s8418_s27 = smov 0  }
   0xa LB: > { %s8354_s28 = smov [#allocation6]   ;;  %s8433_s30 = sadd.s32 4294967295, %s8352_s27   ;;  %s8352_s27 = sphi %s8418_s27, %s10087_s27   ;;  %s8348_s26 = sphi %s8416_s26, %s10086_s26   ;;  %s8344_s25 = sphi %s8414_s25, %s10085_s25   ;;  %s8340_s24 = sphi %s8412_s24, %s10084_s24  }
   0xb   : > { %s226_s29 = sshll.u32 %s8354_s28, 4  ;;  %p6425_p0 = scmp.ge.s32.totalorder %s8352_s27, 1  ;;  %s227_s29 = int_to_ptr.vmem [resolvable:$true] %s226_s29 }
   0xc   : > { %p10003_p1 = scmp.eq.s32.totalorder %s8433_s30, 0  ;;  %p214_p2 = scmp.lt.s32.totalorder %s8352_s27, 3 }
   0xd   : > { %s8355_s9 = smov [#allocation9]   ;;  %s8356_s12 = smov [#allocation8]  }
   0xe   : > { %p8438_p3 = pnand %p6425_p0, %p214_p2  ;;  %s250_s10 = sshll.u32 %s8355_s9, 4  ;;  %s8451_s10 = int_to_ptr.vmem [resolvable:$true] %s250_s10 }
   0xf   : > { %s8453_s13 = sshll.u32 %s8356_s12, 4  ;;  %s8129_s15 = scalar_lea.vmem %s227_s29, 2048  ;;  %s241_s13 = int_to_ptr.vmem [resolvable:$true] %s8453_s13 }
  0x10   : > { %s10011_s8 = scalar_select %p8438_p3, 1, 0 }
  0x11   : > { %p7856_p5 = pneg %p8438_p3  ;;  %p8130_p8 = scmp.ne.s32.totalorder %s227_s29, %s8129_s15 }
  0x12   : > { %p8137_p11 = scmp.lt.s32.totalorder %s227_s29, %s227_s29  ;;  %p8138_p12 = scmp.lt.s32.totalorder %s8129_s15, %s8129_s15 }
  0x13   : > { %p8447_p6 = pnand %p7856_p5, %p10003_p1 }
  0x14   : > { %p8139_p13 = por %p8138_p12, %p8137_p11 }
  0x15   : > { %p8457_p7 = pneg %p8447_p6 }
  0x17   : > { %p8132_p9 = pnand %p8130_p8, %p8457_p7 }
  0x19   : > { %p8133_p10 = pneg %p8132_p9 }
  0x1b   : > { %p8140_p0 = pnand %p8139_p13, %p8133_p10 }
  0x1d   : > { %8143 = shalt.err (!%p8140_p0)
}
  0x1e   : > { %s10002_s16 = smov 128   ;;  %s10004_s17 = smov 8  }
  0x1f   : > { %s10014_s2 = sld [smem:[#allocation41_spill]]  ;;  %s8155_s20 = scalar_lea.vmem %s8451_s10, 4096 }
  0x20   : > { %p8156_p2 = scmp.ne.s32.totalorder %s8451_s10, %s8155_s20  ;;  %p8163_p9 = scmp.lt.s32.totalorder %s8451_s10, %s8451_s10 }
  0x21   : > { %p8164_p10 = scmp.lt.s32.totalorder %s8155_s20, %s8155_s20 }
  0x22   : > { %p8158_p5 = pnand %p8156_p2, %p8457_p7 }
  0x23   : > { %p8165_p11 = por %p8164_p10, %p8163_p9 }
  0x24   : > { %p8159_p8 = pneg %p8158_p5 }
  0x25   : > { %7859 = dma.hbm_to_vmem [thread:$0]  (!%p8447_p6), %s10014_s2, 2048, %s227_s29, [#allocation7], %s10002_s16, %s10002_s16, %s10004_s17  }
  0x26   : > { %p8166_p12 = pnand %p8165_p11, %p8159_p8 }
  0x28   : > { %8169 = shalt.err (!%p8166_p12)
}
  0x29   : > { %s8359_s21 = smov 256   ;;  %s8360_s22 = smov 16  }
  0x2a   : > { %7865 = dma.hbm_to_vmem [thread:$0]  (!%p8447_p6), %s9998_s4, 4096, %s8451_s10, [#allocation10], %s8359_s21, %s8359_s21, %s8360_s22  }
  0x2b   : > { %s8181_s29 = scalar_lea.vmem %s241_s13, 16  ;;  %s8188_s9 = scalar_lea.vmem %s241_s13, 32 }
  0x2c   : > { %p8182_p13 = scmp.ne.s32.totalorder %s241_s13, %s8181_s29  ;;  %p8189_p5 = scmp.lt.s32.totalorder %s241_s13, %s241_s13 }
  0x2d   : > { %p8190_p8 = scmp.lt.s32.totalorder %s8188_s9, %s8181_s29 }
  0x2e   : > { %p8184_p0 = pnand %p8182_p13, %p8457_p7 }
  0x2f   : > { %p8191_p9 = por %p8190_p8, %p8189_p5 }
  0x30   : > { %p8185_p2 = pneg %p8184_p0 }
  0x32   : > { %p8192_p10 = pnand %p8191_p9, %p8185_p2 }
  0x34   : > { %8195 = shalt.err (!%p8192_p10)
}
  0x35   : > { %7862 = dma.hbm_to_vmem [thread:$0]  (!%p8447_p6), %s9997_s3, 16, %s241_s13, [#allocation7]  }
  0x36   : > { %s8361_s10 = smov [#allocation11]  }
  0x37   : > { %s263_s18 = sshll.u32 %s8361_s10, 4  ;;  %s264_s18 = int_to_ptr.vmem [resolvable:$true] %s263_s18 }
  0x38   : > { %s8207_s19 = scalar_lea.vmem %s264_s18, 8192  ;;  %p8215_p0 = scmp.lt.s32.totalorder %s264_s18, %s264_s18 }
  0x39   : > { %p8208_p11 = scmp.ne.s32.totalorder %s264_s18, %s8207_s19  ;;  %p8216_p4 = scmp.lt.s32.totalorder %s8207_s19, %s8207_s19 }
  0x3b   : > { %p8210_p12 = pnand %p8208_p11, %p8457_p7  ;;  %p8217_p5 = por %p8216_p4, %p8215_p0 }
  0x3d   : > { %p8211_p13 = pneg %p8210_p12 }
  0x3f   : > { %p8218_p2 = pnand %p8217_p5, %p8211_p13 }
  0x41   : > { %8221 = shalt.err (!%p8218_p2)
}
  0x42   : > { %s8362_s20 = smov 64   ;;  %s8363_s21 = smov 4  }
  0x43   : > { %7868 = dma.hbm_to_vmem [thread:$0]  (!%p8447_p6), %s9999_s5, 8192, %s264_s18, [#allocation10], %s8362_s20, %s8362_s20, %s8363_s21  }
  0x44   : > { %s8364_s23 = smov [#allocation12]  }
  0x45   : > { %s276_s28 = sshll.u32 %s8364_s23, 4  ;;  %s277_s28 = int_to_ptr.vmem [resolvable:$true] %s276_s28 }
  0x46   : > { %s8233_s29 = scalar_lea.vmem %s277_s28, 8192  ;;  %p8241_p4 = scmp.lt.s32.totalorder %s277_s28, %s277_s28 }
  0x47   : > { %p8234_p8 = scmp.ne.s32.totalorder %s277_s28, %s8233_s29  ;;  %p8242_p11 = scmp.lt.s32.totalorder %s8233_s29, %s8233_s29 }
  0x49   : > { %p8236_p9 = pnand %p8234_p8, %p8457_p7  ;;  %p8243_p12 = por %p8242_p11, %p8241_p4 }
  0x4b   : > { %p8237_p10 = pneg %p8236_p9 }
  0x4d   : > { %p8244_p13 = pnand %p8243_p12, %p8237_p10 }
  0x4f   : > { %8247 = shalt.err (!%p8244_p13)
}
  0x50   : > { %7871 = dma.hbm_to_vmem [thread:$0]  (!%p8447_p6), %s10000_s6, 8192, %s277_s28, [#allocation13], %s8362_s20, %s8362_s20, %s8363_s21  }
  0x51   : > { %s6424_s14 = sadd.s32 4294967294, %s8352_s27   ;;  %s8507_s11 = sadd.s32 1, %s8352_s27  }
  0x52   : > { %s33_s15 = sadd.s32 1, %s8348_s26  ;;  %s30_s10 = ssub.s32 %s8352_s27, %s8507_s11 }
  0x53   : > { %p40_p7 = scmp.ne.s32.totalorder %s8348_s26, %s8344_s25  ;;  %p31_p0 = scmp.eq.s32.totalorder %s30_s10, 0 }
  0x54   : > { %p41_p5 = scmp.eq.s32.totalorder %s8352_s27, 0  ;;  %p46_p2 = scmp.ne.s32.totalorder %s8344_s25, %s8340_s24 }
  0x55   : > { %p201_p8 = scmp.eq.s32.totalorder %s8433_s30, 1  ;;  %p207_p4 = scmp.eq.s32.totalorder %s6424_s14, 1 }
  0x56   : > { %s8519_s18 = scalar_select %p31_p0, %s8348_s26, %s33_s15  }
  0x57   : > { %p42_p9 = por %p41_p5, %p40_p7  ;;  %p8523_p10 = por %p10003_p1, %p46_p2 }
  0x58   : > { %p8527_p6 = por %p201_p8, %p40_p7  ;;  %p7885_p11 = scmp.lt.s32.totalorder %s8352_s27, 2 }
  0x59   : > { %s10015_s19 = scalar_select %p8523_p10, 1, 0 }
  0x5a   : > { %s10016_s20 = scalar_select %p8527_p6, 1, 0 }
  0x5b   : > { %s290_s21 = sand.u32 1, %s8348_s26   ;;  %p8533_p12 = por %p207_p4, %p46_p2 }
  0x5c   : > { %s6432_s13 = sshll.u32 %s290_s21, 8  ;;  %s6608_s23 = sshll.u32 %s8352_s27, 12 }
  0x5d   : > { %s10017_s22 = scalar_select %p8533_p12, 1, 0 }
  0x5e   : > { %s8541_s9 = scalar_lea.hbm %s9994_s0, %s6608_s23  ;;  %s294_s12 = scalar_lea.vmem [#allocation3], %s6432_s13 }
  0x5f   : > { %s301_s15 = sshll.u32 %s294_s12, 4  ;;  %p8543_p13 = pnand %p7885_p11, %p42_p9  ;;  %s8547_s15 = int_to_ptr.vmem [resolvable:$true] %s301_s15 }
  0x60   : > { %s8549_s10 = scalar_lea.sflag [#allocation4], %s290_s21  ;;  %s8248_s16 = scalar_lea.hbm %s8541_s9, 4096 }
  0x61   : > { %p8249_p7 = scmp.ne.s32.totalorder %s8541_s9, %s8248_s16  ;;  %p8250_p0 = pneg %p8543_p13 }
  0x62   : > { %s8253_s13 = scalar_lea.hbm %s9994_s0, 8192  ;;  %p8254_p8 = scmp.lt.s32.totalorder %s8541_s9, %s9994_s0 }
  0x63   : > { %p8251_p5 = pnand %p8250_p0, %p8249_p7  ;;  %p8255_p9 = scmp.lt.s32.totalorder %s8253_s13, %s8248_s16 }
  0x65   : > { %p8252_p2 = pneg %p8251_p5  ;;  %p8256_p4 = por %p8255_p9, %p8254_p8 }
  0x67   : > { %p8257_p11 = pnand %p8256_p4, %p8252_p2 }
  0x69   : > { %8260 = shalt.err (!%p8257_p11)
}
  0x6a   : > { %s8261_s21 = scalar_lea.vmem %s8547_s15, 4096  ;;  %s8365_s17 = smov [#allocation3]  }
  0x6b   : > { %p8262_p1 = scmp.ne.s32.totalorder %s8547_s15, %s8261_s21  ;;  %s8266_s2 = sshll.u32 %s8365_s17, 4  ;;  %s8267_s2 = int_to_ptr.vmem [resolvable:$false] %s8266_s2 }
  0x6c   : > { %s8268_s23 = scalar_lea.vmem %s8267_s2, 8192  ;;  %p8269_p5 = scmp.lt.s32.totalorder %s8547_s15, %s8267_s2 }
  0x6d   : > { %p8264_p12 = pnand %p8262_p1, %p8250_p0  ;;  %p8270_p6 = scmp.lt.s32.totalorder %s8268_s23, %s8261_s21 }
  0x6f   : > { %p8265_p7 = pneg %p8264_p12  ;;  %p8271_p10 = por %p8270_p6, %p8269_p5 }
  0x71   : > { %p8272_p3 = pnand %p8271_p10, %p8265_p7 }
  0x73   : > { %8275 = shalt.err (!%p8272_p3)
}
  0x74   : > { %s10019_s16 = smov 8   ;;  %s10020_s28 = smov 128  }
  0x75   : > { %7875 = dma.hbm_to_vmem [thread:$0]  (!%p8543_p13), %s8541_s9, 4096, %s8547_s15, %s8549_s10, %s10020_s28, %s10020_s28, %s10019_s16  }
  0x76   : > { %p10021_p1 = scmp.ne.s32.totalorder %s10011_s8, 0 }
  0x78   : > { %321 = sbr.rel (%p10021_p1) target bundleno = 1082 (0x43a), region = 48 }
  0x7d   : > { %s8576_s17 = sand.u32 1, %s8344_s25   ;;  %p10022_p3 = scmp.ne.s32.totalorder %s10015_s19, 0 }
  0x7e   : > { %s6436_s2 = sshll.u32 %s8576_s17, 8  ;;  %s324_s13 = scalar_lea.sflag [#allocation4], %s8576_s17 }
  0x7f   : > { %s8580_s29 = scalar_lea.vmem [#allocation3], %s6436_s2 }
  0x80   : > { %8319 = dma.done.wait (%p10022_p3), %s324_s13, 4096  }
  0x81   : > { %8321 = vsyncadd (%p10022_p3), %s324_s13, 4294963200  ;;  %p10023_p10 = scmp.eq.s32.totalorder %s8433_s30, 0 }
  0x83   : > { %8323 = dma.done.wait (%p10023_p10), [#allocation7], 2064   ;;  %p10024_p6 = pmov %p10023_p10 }
  0x85   : > { %8325 = vsyncadd (%p10024_p6), [#allocation7], 4294965232  ;;  %p10025_p12 = pmov %p10024_p6 }
  0x86   : > { %p10026_p13 = pmov %p10024_p6 }
  0x87   : > { %8327 = dma.done.wait (%p10025_p12), [#allocation10], 12288  }
  0x88   : > { %8329 = vsyncadd (%p10026_p13), [#allocation10], 4294955008  ;;  %p10027_p0 = pmov %p10024_p6 }
  0x8a   : > { %8331 = dma.done.wait (%p10027_p0), [#allocation13], 8192   ;;  %p10028_p2 = pmov %p10027_p0 }
  0x8b   : > { %v8366_v0 = vmov 0   ;;  %v8367_v1 = vmov 0.0   ;;  %vm8368_vm0 = vmmov 0   ;;  %v7942_v2 = vld [vmem:[#allocation9 + $0xe4] ss:$16 sps:$4 sm:$0xff]   ;;  %v7966_v44 = vld [vmem:[#allocation11 + $0x38] sm:$0xff]  }
  0x8c   : > { %8333 = vsyncadd (%p10028_p2), [#allocation13], 4294959104  ;;  %1118 = vmatprep.mubr.bf16.mxu1 %v8366_v0  ;;  %7011 = vmatprep.subr.mxu0 %v8367_v1  ;;  %v7944_v3 = vld [vmem:[#allocation9 + $0xe0] ss:$16 sps:$4 sm:$0xff]   ;;  %v7945_v4 = vld [vmem:[#allocation9 + $0xc4] ss:$16 sps:$4 sm:$0xff]  }
  0x8d   : > { %7043 = vmatprep.mubr.msk.f32.mxu0 %vm8368_vm0, %v8367_v1  ;;  %7941 = vset.pattern.permute.xlu1 %v8366_v0  ;;  %v7947_v5 = vld [vmem:[#allocation9 + $0xc0] ss:$16 sps:$4 sm:$0xff]   ;;  %v7948_v6 = vld [vmem:[#allocation9 + $0xa4] ss:$16 sps:$4 sm:$0xff]   ;;  %s7830_s8 = smul.u32 1536, %s8576_s17  ;;  %vm2370_vm1 = vcmask 1041408  }
  0x8e   : > { %7940 = vset.pattern.permute.xlu0 %v8366_v0  ;;  %1086 = vmatprep.subr.bf16.mxu1 %v7942_v2  ;;  %v7950_v7 = vld [vmem:[#allocation9 + $0xa0] ss:$16 sps:$4 sm:$0xff]   ;;  %v7951_v8 = vld [vmem:[#allocation9 + $0x84] ss:$16 sps:$4 sm:$0xff]   ;;  %p383_p8 = scmp.lt.s32.totalorder %s8433_s30, 1  ;;  %s7831_s21 = smul.u32 24576, %s8433_s30 }
  0x8f   : > { %1087 = vmatpush1.bf16.msra.mxu1 %v7944_v3  ;;  %v8604_v9 = vld [vmem:[%s8580_s29] sm:$0xff]  ;;  %v8607_v11 = vld [vmem:[%s8580_s29 + $0x8] sm:$0xff]  ;;  %v8610_v12 = vld [vmem:[%s8580_s29 + $0x10] sm:$0xff]  ;;  %s8897_s19 = scalar_lea.vmem [#allocation14], %s7830_s8  ;;  %s6278_s2 = scalar_lea.sflag [#allocation5], %s8576_s17 }
  0x90   : > { %1088 = vmatprep.subr.bf16.mxu1 %v7945_v4  ;;  %v7953_v10 = vld [vmem:[#allocation9 + $0x80] ss:$16 sps:$4 sm:$0xff]   ;;  %v7954_v13 = vld [vmem:[#allocation9 + $0x64] ss:$16 sps:$4 sm:$0xff]   ;;  %v437_v16 = vadd.f32 %v8607_v11, %v8604_v9  ;;  %v8701_v63 = vpack.c.bf16 %v8607_v11, %v8604_v9  ;;  %s384_s9 = scalar_select %p383_p8, %s8433_s30, 1 }
  0x91   : > { %v491_v14 = vld [vmem:[#allocation6 + $0x78] sm:$0xff]  ;;  %v490_v15 = vld [vmem:[#allocation6 + $0x70] sm:$0xff]  ;;  %v489_v18 = vld [vmem:[#allocation6 + $0x68] sm:$0xff]  ;;  %s6291_s23 = sshll.u32 %s8897_s19, 4  ;;  %s9946_s28 = scalar_lea.hbm %s10001_s7, %s7831_s21  ;;  %s9948_s23 = int_to_ptr.vmem [resolvable:$true] %s6291_s23 }
  0x92   : > { %v8615_v17 = vld [vmem:[%s8580_s29 + $0x18] sm:$0xff]  ;;  %7012 = vmatpush3.msra.mxu0 %v491_v14  ;;  %v438_v19 = vadd.f32 %v437_v16, %v8610_v12  ;;  %v7956_v20 = vld [vmem:[#allocation9 + $0x60] ss:$16 sps:$4 sm:$0xff]   ;;  %v8625_v25 = vld [vmem:[%s8580_s29 + $0x28] sm:$0xff]  ;;  %s6609_s15 = sshll.u32 %s384_s9, 8  ;;  %s8276_s13 = scalar_lea.vmem %s9948_s23, 24576 }
  0x93   : > { %1089 = vmatpush1.bf16.msra.mxu1 %v7947_v5  ;;  %7013 = vmatprep.subr.mxu0 %v8367_v1  ;;  %v7957_v21 = vld [vmem:[#allocation9 + $0x44] ss:$16 sps:$4 sm:$0xff]   ;;  %v7959_v28 = vld [vmem:[#allocation9 + $0x40] ss:$16 sps:$4 sm:$0xff]   ;;  %v7983_v16 = vld [vmem:[#allocation11 + $0x28] sm:$0xff]   ;;  %s9478_s12 = scalar_lea.vmem %s9995_s1, %s6609_s15  ;;  %p8277_p9 = scmp.ne.s32.totalorder %s9948_s23, %s8276_s13 }
  0x94   : > { %1090 = vmatprep.subr.bf16.mxu1 %v7948_v6  ;;  %7014 = vmatpush3.msra.mxu0 %v490_v15  ;;  %v8620_v22 = vld [vmem:[%s8580_s29 + $0x20] sm:$0xff]  ;;  %v439_v24 = vadd.f32 %v438_v19, %v8615_v17  ;;  %v487_v26 = vld [vmem:[#allocation6 + $0x58] sm:$0xff]  ;;  %v8630_v29 = vld [vmem:[%s8580_s29 + $0x30] sm:$0xff]  ;;  %p10081_p4 = scmp.ne.s32.totalorder %s10016_s20, 0 }
  0x95   : > { %7015 = vmatprep.subr.mxu0 %v8367_v1  ;;  %v488_v23 = vld [vmem:[#allocation6 + $0x60] sm:$0xff]  ;;  %v486_v31 = vld [vmem:[#allocation6 + $0x50] sm:$0xff]  ;;  %v8635_v33 = vld [vmem:[%s8580_s29 + $0x38] sm:$0xff] }
  0x96   : > { %7016 = vmatpush3.msra.mxu0 %v489_v18  ;;  %v440_v27 = vadd.f32 %v439_v24, %v8620_v22  ;;  %v7960_v30 = vld [vmem:[#allocation9 + $0x24] ss:$16 sps:$4 sm:$0xff]   ;;  %v7962_v36 = vld [vmem:[#allocation9 + $0x20] ss:$16 sps:$4 sm:$0xff]   ;;  %p8278_p11 = pnand %p8277_p9, %p10081_p4 }
  0x97   : > { %1091 = vmatpush1.bf16.msra.mxu1 %v7950_v7  ;;  %7017 = vmatprep.subr.mxu0 %v8367_v1  ;;  %v485_v34 = vld [vmem:[#allocation6 + $0x48] sm:$0xff]  ;;  %v8640_v37 = vld [vmem:[%s8580_s29 + $0x40] sm:$0xff]  ;;  %v483_v42 = vld [vmem:[#allocation6 + $0x38] sm:$0xff] }
  0x98   : > { %1092 = vmatprep.subr.bf16.mxu1 %v7951_v8  ;;  %7018 = vmatpush3.msra.mxu0 %v488_v23  ;;  %v441_v32 = vadd.f32 %v440_v27, %v8625_v25  ;;  %v7963_v38 = vld [vmem:[#allocation9 + $0x4] ss:$16 sps:$4 sm:$0xff]   ;;  %v7965_v41 = vld [vmem:[#allocation9] ss:$16 sps:$4 sm:$0xff]   ;;  %p8279_p7 = pneg %p8278_p11 }
  0x99   : > { %7019 = vmatprep.subr.mxu0 %v8367_v1  ;;  %v484_v39 = vld [vmem:[#allocation6 + $0x40] sm:$0xff]  ;;  %v8645_v43 = vld [vmem:[%s8580_s29 + $0x48] sm:$0xff]  ;;  %v482_v45 = vld [vmem:[#allocation6 + $0x30] sm:$0xff] }
  0x9a   : > { %7020 = vmatpush3.msra.mxu0 %v487_v26  ;;  %v442_v35 = vadd.f32 %v441_v32, %v8630_v29  ;;  %v8649_v46 = vld [vmem:[%s8580_s29 + $0x50] sm:$0xff]  ;;  %v8656_v49 = vld [vmem:[%s8580_s29 + $0x58] sm:$0xff]  ;;  %v8662_v51 = vld [vmem:[%s8580_s29 + $0xc0] sm:$0xff] }
  0x9b   : > { %1093 = vmatpush1.bf16.msra.mxu1 %v7953_v10  ;;  %7021 = vmatprep.subr.mxu0 %v8367_v1  ;;  %v8652_v47 = vld [vmem:[%s8580_s29 + $0xb0] sm:$0xff]  ;;  %v8659_v50 = vld [vmem:[%s8580_s29 + $0xb8] sm:$0xff]  ;;  %v8665_v52 = vld [vmem:[%s8580_s29 + $0xc8] sm:$0xff] }
  0x9c   : > { %1094 = vmatprep.subr.bf16.mxu1 %v7954_v13  ;;  %7022 = vmatpush3.msra.mxu0 %v486_v31  ;;  %v443_v40 = vadd.f32 %v442_v35, %v8635_v33  ;;  %v8669_v53 = vld [vmem:[%s8580_s29 + $0xd0] sm:$0xff]  ;;  %v8672_v54 = vld [vmem:[%s8580_s29 + $0xd8] sm:$0xff]  ;;  %v8675_v55 = vld [vmem:[%s8580_s29 + $0xe0] sm:$0xff]  ;;  %v8679_v56 = vpack.c.bf16 %v8659_v50, %v8652_v47  ;;  %v8683_v57 = vpack.c.bf16 %v8665_v52, %v8662_v51 }
  0x9d   : > { %7023 = vmatprep.subr.mxu0 %v8367_v1  ;;  %v8687_v59 = vld [vmem:[%s8580_s29 + $0xe8] sm:$0xff]  ;;  %v8690_v60 = vld [vmem:[%s8580_s29 + $0xf0] sm:$0xff]  ;;  %v8693_v61 = vld [vmem:[%s8580_s29 + $0xf8] sm:$0xff]  ;;  %v8697_v62 = vpack.c.bf16 %v8672_v54, %v8669_v53 }
  0x9e   : > { %7024 = vmatpush3.msra.mxu0 %v485_v34  ;;  %v444_v48 = vadd.f32 %v443_v40, %v8640_v37  ;;  %v481_v2 = vld [vmem:[#allocation6 + $0x28] sm:$0xff]  ;;  %v8706_v3 = vpack.c.bf16 %v8687_v59, %v8675_v55  ;;  %v8710_v4 = vpack.c.bf16 %v8693_v61, %v8690_v60  ;;  %v8714_v6 = vld [vmem:[%s8580_s29 + $0x60] sm:$0xff]  ;;  %v7970_v7 = vld [vmem:[#allocation11 + $0x30] sm:$0xff]  }
  0x9f   : > { %1095 = vmatpush1.bf16.msra.mxu1 %v7956_v20  ;;  %7025 = vmatprep.subr.mxu0 %v8367_v1  ;;  %v480_v9 = vld [vmem:[#allocation6 + $0x20] sm:$0xff]  ;;  %v8719_v10 = vld [vmem:[%s8580_s29 + $0x68] sm:$0xff]  ;;  %v479_v11 = vld [vmem:[#allocation6 + $0x18] sm:$0xff]  ;;  %v8735_v20 = vpack.c.bf16 %v8615_v17, %v8610_v12 }
  0xa0   : > { %1096 = vmatprep.subr.bf16.mxu1 %v7957_v21  ;;  %7026 = vmatpush3.msra.mxu0 %v484_v39  ;;  %v445_v58 = vadd.f32 %v444_v48, %v8645_v43  ;;  %v8726_v14 = vld [vmem:[%s8580_s29 + $0x70] sm:$0xff]  ;;  %v8731_v19 = vld [vmem:[%s8580_s29 + $0x78] sm:$0xff]  ;;  %v477_v21 = vld [vmem:[#allocation6 + $0x8] sm:$0xff] }
  0xa1   : > { %7027 = vmatprep.subr.mxu0 %v8367_v1  ;;  %v478_v18 = vld [vmem:[#allocation6 + $0x10] sm:$0xff]  ;;  %v476_v24 = vld [vmem:[#allocation6] sm:$0xff]  ;;  %v8755_v32 = vld [vmem:[%s8580_s29 + $0x98] sm:$0xff] }
  0xa2   : > { %7028 = vmatpush3.msra.mxu0 %v483_v42  ;;  %v446_v5 = vadd.f32 %v445_v58, %v8649_v46  ;;  %v7969_v26 = vld [vmem:[#allocation9 + $0xec] ss:$16 sps:$4 sm:$0xff]   ;;  %v7993_v12 = vld [vmem:[#allocation11 + $0x20] sm:$0xff]  }
  0xa3   : > { %1097 = vmatpush1.bf16.msra.mxu1 %v7959_v28  ;;  %7029 = vmatprep.subr.mxu0 %v8367_v1  ;;  %v8740_v27 = vld [vmem:[%s8580_s29 + $0x80] sm:$0xff]  ;;  %v8743_v28 = vld [vmem:[%s8580_s29 + $0x88] sm:$0xff]  ;;  %v8752_v31 = vld [vmem:[%s8580_s29 + $0x90] sm:$0xff] }
  0xa4   : > { %1098 = vmatprep.subr.bf16.mxu1 %v7960_v30  ;;  %7030 = vmatpush3.msra.mxu0 %v482_v45  ;;  %v447_v8 = vadd.f32 %v446_v5, %v8656_v49  ;;  %v7995_v35 = vld [vmem:[#allocation11 + $0x18] sm:$0xff]   ;;  %v8001_v58 = vld [vmem:[#allocation11] sm:$0xff]  }
  0xa5   : > { %7031 = vmatprep.subr.mxu0 %v8367_v1  ;;  %v8764_v39 = vld [vmem:[%s8580_s29 + $0xa0] sm:$0xff] }
  0xa6   : > { %7032 = vmatpush3.msra.mxu0 %v481_v2  ;;  %v448_v13 = vadd.f32 %v447_v8, %v8714_v6  ;;  %v7973_v8 = vld [vmem:[#allocation9 + $0xcc] ss:$16 sps:$4 sm:$0xff]  }
  0xa7   : > { %1099 = vmatpush1.bf16.msra.mxu1 %v7962_v36  ;;  %7033 = vmatprep.subr.mxu0 %v8367_v1  ;;  %v8760_v36 = vpack.c.bf16 %v8625_v25, %v8620_v22  ;;  %v8776_v25 = vpack.c.bf16 %v8635_v33, %v8630_v29  ;;  %v8786_v29 = vpack.c.bf16 %v8645_v43, %v8640_v37 }
  0xa8   : > { %1100 = vmatprep.subr.bf16.mxu1 %v7963_v38  ;;  %7034 = vmatpush3.msra.mxu0 %v480_v9  ;;  %v449_v15 = vadd.f32 %v448_v13, %v8719_v10  ;;  %v8813_v9 = vpack.c.bf16 %v8731_v19, %v8726_v14  ;;  %v7971_v13 = vld [vmem:[#allocation9 + $0xc8] ss:$16 sps:$4 sm:$0xff]  }
  0xa9   : > { %7035 = vmatprep.subr.mxu0 %v8367_v1 }
  0xaa   : > { %7036 = vmatpush3.msra.mxu0 %v479_v11  ;;  %v450_v23 = vadd.f32 %v449_v15, %v8726_v14  ;;  %v7979_v15 = vld [vmem:[#allocation9 + $0x8c] ss:$16 sps:$4 sm:$0xff]   ;;  %v7977_v14 = vld [vmem:[#allocation9 + $0x88] ss:$16 sps:$4 sm:$0xff]  }
  0xab   : > { %1101 = vmatpush1.bf16.msra.mxu1 %v7965_v41  ;;  %7037 = vmatprep.subr.mxu0 %v8367_v1  ;;  %v7997_v41 = vld [vmem:[#allocation11 + $0x10] sm:$0xff]  }
  0xac   : > { %7046 = vmatprep.subr.bf16.mxu1 %v7966_v44  ;;  %7038 = vmatpush3.msra.mxu0 %v478_v18  ;;  %v451_v30 = vadd.f32 %v450_v23, %v8731_v19  ;;  %v7982_v18 = vld [vmem:[#allocation9 + $0x6c] ss:$16 sps:$4 sm:$0xff]   ;;  %v7980_v19 = vld [vmem:[#allocation9 + $0x68] ss:$16 sps:$4 sm:$0xff]   ;;  %v8826_v23 = vpack.c.bf16 %v8755_v32, %v8752_v31 }
  0xad   : > { %7039 = vmatprep.subr.mxu0 %v8367_v1 }
  0xae   : > { %1119 = vmatmul.mubr.bf16.vlgmr.msra.gmra.mxu1 %v8701_v63  ;;  %7040 = vmatpush3.msra.mxu0 %v477_v21  ;;  %v452_v17 = vadd.f32 %v451_v30, %v8740_v27  ;;  %v7986_v21 = vld [vmem:[#allocation9 + $0x4c] ss:$16 sps:$4 sm:$0xff]  }
  0xaf   : > { %1128 = vmatprep.mubr.bf16.mxu1 %v8366_v0  ;;  %7047 = vmatpush3.bf16.msra.mxu1 %v7966_v44  ;;  %v7999_v44 = vld [vmem:[#allocation11 + $0x8] sm:$0xff]  }
  0xb0   : > { %7048 = vmatprep.subr.bf16.mxu1 %v7970_v7  ;;  %7041 = vmatprep.subr.mxu0 %v8367_v1  ;;  %v453_v34 = vadd.f32 %v452_v17, %v8743_v28  ;;  %v8767_v1 = vld [vmem:[%s8580_s29 + $0xa8] sm:$0xff]  ;;  %v7994_v17 = vld [vmem:[#allocation11 + $0x78] sm:$0xff]   ;;  %s8369_s29 = smov [#allocation14]  }
  0xb1   : > { %7042 = vmatpush3.msra.mxu0 %v476_v24  ;;  %v7984_v24 = vld [vmem:[#allocation9 + $0x48] ss:$16 sps:$4 sm:$0xff]   ;;  %v8832_v30 = vpack.c.bf16 %v8767_v1, %v8764_v39  ;;  %s8280_s8 = sshll.u32 %s8369_s29, 4  ;;  %s8281_s8 = int_to_ptr.vmem [resolvable:$false] %s8280_s8 }
  0xb2   : > { %1279 = vmatprep.subr.bf16.mxu0 %v7969_v26  ;;  %v454_v38 = vadd.f32 %v453_v34, %v8752_v31  ;;  %v7989_v26 = vld [vmem:[#allocation9 + $0x2c] ss:$16 sps:$4 sm:$0xff]   ;;  %v7996_v31 = vld [vmem:[#allocation11 + $0x70] sm:$0xff]   ;;  %v8000_v34 = vld [vmem:[#allocation11 + $0x60] sm:$0xff]   ;;  %s8282_s9 = scalar_lea.vmem %s8281_s8, 49152  ;;  %p8283_p5 = scmp.lt.s32.totalorder %s9948_s23, %s8281_s8 }
  0xb3   : > { %7049 = vmatpush3.bf16.msra.mxu1 %v7970_v7  ;;  %p8284_p1 = scmp.lt.s32.totalorder %s8282_s9, %s8276_s13 }
  0xb4   : > { %7050 = vmatprep.subr.bf16.mxu1 %v7983_v16  ;;  %v455_v40 = vadd.f32 %v454_v38, %v8755_v32  ;;  %v7998_v32 = vld [vmem:[#allocation11 + $0x68] sm:$0xff]   ;;  %v8003_v38 = vld [vmem:[#allocation11 + $0x50] sm:$0xff]  }
  0xb5   : > { %p8285_p3 = por %p8284_p1, %p8283_p5 }
  0xb6   : > { %1129 = vmatmul.mubr.bf16.gmra.mxu1 %v8735_v20  ;;  %v456_v42 = vadd.f32 %v455_v40, %v8764_v39  ;;  %v8007_v39 = vld [vmem:[#allocation11 + $0x48] sm:$0xff]   ;;  %v8851_v40 = vld [vmem:[#allocation11 + $0xf8] sm:$0xff]  }
  0xb7   : > { %1138 = vmatprep.mubr.bf16.mxu1 %v8366_v0  ;;  %7051 = vmatpush3.bf16.msra.mxu1 %v7983_v16  ;;  %v8820_v16 = vpack.c.bf16 %v8743_v28, %v8740_v27  ;;  %v7987_v27 = vld [vmem:[#allocation9 + $0x28] ss:$16 sps:$4 sm:$0xff]   ;;  %v7992_v28 = vld [vmem:[#allocation9 + $0xc] ss:$16 sps:$4 sm:$0xff]   ;;  %p8286_p10 = pnand %p8285_p3, %p8279_p7 }
  0xb8   : > { %7052 = vmatprep.subr.bf16.mxu1 %v7993_v12  ;;  %v457_v22 = vadd.f32 %v456_v42, %v8767_v1  ;;  %v8012_v1 = vld [vmem:[#allocation11 + $0x40] sm:$0xff]   ;;  %v8006_v42 = vld [vmem:[#allocation11 + $0xa8] sm:$0xff]  }
  0xba   : > { %v458_v45 = vadd.f32 %v457_v22, %v8652_v47  ;;  %v8009_v22 = vld [vmem:[#allocation11 + $0x98] sm:$0xff]  }
  0xbb   : > { %7053 = vmatpush3.bf16.msra.mxu1 %v7993_v12  ;;  %v7990_v12 = vld [vmem:[#allocation9 + $0x8] ss:$16 sps:$4 sm:$0xff]  }
  0xbc   : > { %7054 = vmatprep.subr.bf16.mxu1 %v7995_v35  ;;  %v459_v48 = vadd.f32 %v458_v45, %v8659_v50  ;;  %v8010_v45 = vld [vmem:[#allocation11 + $0x90] sm:$0xff]  }
  0xbe   : > { %1139 = vmatmul.mubr.bf16.gmra.mxu1 %v8760_v36  ;;  %v460_v2 = vadd.f32 %v459_v48, %v8662_v51  ;;  %v8011_v48 = vld [vmem:[#allocation11 + $0x88] sm:$0xff]  }
  0xbf   : > { %1148 = vmatprep.mubr.bf16.mxu1 %v8366_v0  ;;  %7055 = vmatpush3.bf16.msra.mxu1 %v7995_v35  ;;  %v8002_v35 = vld [vmem:[#allocation11 + $0x58] sm:$0xff]  }
  0xc0   : > { %7056 = vmatprep.subr.bf16.mxu1 %v7997_v41  ;;  %v461_v5 = vadd.f32 %v460_v2, %v8665_v52  ;;  %v8796_v52 = vpack.c.bf16 %v8656_v49, %v8649_v46  ;;  %v8017_v2 = vld [vmem:[#allocation11 + $0x138] sm:$0xff]  }
  0xc2   : > { %v462_v33 = vadd.f32 %v461_v5, %v8669_v53  ;;  %v8800_v53 = vld [vmem:[#allocation11 + $0xb8] sm:$0xff]   ;;  %v8019_v5 = vld [vmem:[#allocation11 + $0x130] sm:$0xff]  }
  0xc3   : > { %7057 = vmatpush3.bf16.msra.mxu1 %v7997_v41  ;;  %v8005_v41 = vld [vmem:[#allocation11 + $0xb0] sm:$0xff]  }
  0xc4   : > { %7058 = vmatprep.subr.bf16.mxu1 %v7999_v44  ;;  %v463_v47 = vadd.f32 %v462_v33, %v8672_v54 }
  0xc6   : > { %1149 = vmatmul.mubr.bf16.gmra.mxu1 %v8776_v25  ;;  %v464_v50 = vadd.f32 %v463_v47, %v8675_v55 }
  0xc7   : > { %1158 = vmatprep.mubr.bf16.mxu1 %v8366_v0  ;;  %7059 = vmatpush3.bf16.msra.mxu1 %v7999_v44  ;;  %v8008_v44 = vld [vmem:[#allocation11 + $0xa0] sm:$0xff]  }
  0xc8   : > { %7060 = vmatprep.subr.bf16.mxu1 %v8001_v58  ;;  %v465_v51 = vadd.f32 %v464_v50, %v8687_v59  ;;  %v8807_v59 = vpack.c.bf16 %v8719_v10, %v8714_v6  ;;  %v7976_v6 = vld [vmem:[#allocation9 + $0xac] ss:$16 sps:$4 sm:$0xff]   ;;  %v7974_v10 = vld [vmem:[#allocation9 + $0xa8] ss:$16 sps:$4 sm:$0xff]  }
  0xca   : > { %v466_v37 = vadd.f32 %v465_v51, %v8690_v60  ;;  %v7967_v60 = vld [vmem:[#allocation9 + $0xe8] ss:$16 sps:$4 sm:$0xff]  }
  0xcb   : > { %7061 = vmatpush3.bf16.msra.mxu1 %v8001_v58  ;;  %v8013_v58 = vld [vmem:[#allocation11 + $0x80] sm:$0xff]   ;;  %v8020_v51 = vld [vmem:[#allocation11 + $0x128] sm:$0xff]  }
  0xcc   : > { %v467_v43 = vadd.f32 %v466_v37, %v8693_v61  ;;  %7142 = vmatprep.subr.bf16.mxu1 %v8800_v53 }
  0xce   : > { %1159 = vmatmul.mubr.bf16.gmra.mxu1 %v8786_v29  ;;  %v468_v54 = vrot.slane %v467_v43, 4 }
  0xcf   : > { %1168 = vmatprep.mubr.bf16.mxu1 %v8366_v0 }
  0xd0   : > { %v469_v55 = vadd.f32 %v468_v54, %v467_v43  ;;  %v8022_v54 = vld [vmem:[#allocation11 + $0x120] sm:$0xff]  }
  0xd2   : > { %v470_v46 = vrot.slane %v469_v55, 2 }
  0xd4   : > { %v471_v49 = vadd.f32 %v470_v46, %v469_v55 }
  0xd6   : > { %1169 = vmatmul.mubr.bf16.gmra.mxu1 %v8796_v52  ;;  %v472_v7 = vrot.slane %v471_v49, 1 }
  0xd7   : > { %1178 = vmatprep.mubr.bf16.mxu1 %v8366_v0 }
  0xd8   : > { %v473_v61 = vadd.f32 %v472_v7, %v471_v49  ;;  %v8023_v7 = vld [vmem:[#allocation11 + $0x118] sm:$0xff]  }
  0xda   : > { %v475_v11 = vmul.f32 0.00390625, %v473_v61 }
  0xdc   : > { %7044 = vmatmul.mubr.f32.vlgmr.msra.gmra.mxu0 %v475_v11 }
  0xdd   : > { %1280 = vmatpush1.bf16.msra.mxu0 %v7967_v60  ;;  %1311 = vmatprep.mubr.bf16.mxu0 %v8366_v0 }
  0xde   : > { %1179 = vmatmul.mubr.bf16.gmra.mxu1 %v8807_v59  ;;  %1281 = vmatprep.subr.bf16.mxu0 %v7973_v8  ;;  %v8025_v8 = vld [vmem:[#allocation11 + $0x110] sm:$0xff]  }
  0xdf   : > { %1188 = vmatprep.mubr.bf16.mxu1 %v8366_v0 }
  0xe1   : > { %1282 = vmatpush1.bf16.msra.mxu0 %v7971_v13 }
  0xe2   : > { %1283 = vmatprep.subr.bf16.mxu0 %v7976_v6 }
  0xe5   : > { %1284 = vmatpush1.bf16.msra.mxu0 %v7974_v10  ;;  %v8026_v10 = vld [vmem:[#allocation11 + $0x108] sm:$0xff]  }
  0xe6   : > { %1189 = vmatmul.mubr.bf16.gmra.mxu1 %v8813_v9  ;;  %1285 = vmatprep.subr.bf16.mxu0 %v7979_v15  ;;  %v8015_v15 = vld [vmem:[#allocation11 + $0xf0] sm:$0xff]  }
  0xe7   : > { %1198 = vmatprep.mubr.bf16.mxu1 %v8366_v0 }
  0xe9   : > { %1286 = vmatpush1.bf16.msra.mxu0 %v7977_v14 }
  0xea   : > { %1287 = vmatprep.subr.bf16.mxu0 %v7982_v18 }
  0xed   : > { %1288 = vmatpush1.bf16.msra.mxu0 %v7980_v19 }
  0xee   : > { %1199 = vmatmul.mubr.bf16.gmra.mxu1 %v8820_v16  ;;  %1289 = vmatprep.subr.bf16.mxu0 %v7986_v21  ;;  %v8028_v21 = vld [vmem:[#allocation11 + $0x100] sm:$0xff]  }
  0xef   : > { %1208 = vmatprep.mubr.bf16.mxu1 %v8366_v0 }
  0xf1   : > { %1290 = vmatpush1.bf16.msra.mxu0 %v7984_v24 }
  0xf2   : > { %1291 = vmatprep.subr.bf16.mxu0 %v7989_v26  ;;  %v8016_v26 = vld [vmem:[#allocation11 + $0xe8] sm:$0xff]  }
  0xf5   : > { %1292 = vmatpush1.bf16.msra.mxu0 %v7987_v27 }
  0xf6   : > { %1209 = vmatmul.mubr.bf16.gmra.mxu1 %v8826_v23  ;;  %1293 = vmatprep.subr.bf16.mxu0 %v7992_v28 }
  0xf7   : > { %1218 = vmatprep.mubr.bf16.mxu1 %v8366_v0 }
  0xf9   : > { %1294 = vmatpush1.bf16.msra.mxu0 %v7990_v12  ;;  %v8918_v12 = vld [vmem:[#allocation11 + $0x1b8] sm:$0xff]  }
  0xfa   : > { %7094 = vmatprep.subr.bf16.mxu0 %v7994_v17 }
  0xfc   : > { %1312 = vmatmul.mubr.bf16.vlgmr.msra.gmra.mxu0 %v8701_v63 }
  0xfd   : > { %7095 = vmatpush3.bf16.msra.mxu0 %v7994_v17  ;;  %1321 = vmatprep.mubr.bf16.mxu0 %v8366_v0 }
  0xfe   : > { %1219 = vmatmul.mubr.bf16.gmra.mxu1 %v8832_v30  ;;  %7096 = vmatprep.subr.bf16.mxu0 %v7996_v31 }
  0xff   : > { %1228 = vmatprep.mubr.bf16.mxu1 %v8366_v0 }
 0x101   : > { %7097 = vmatpush3.bf16.msra.mxu0 %v7996_v31  ;;  %v8018_v31 = vld [vmem:[#allocation11 + $0xe0] sm:$0xff]  }
 0x102   : > { %7098 = vmatprep.subr.bf16.mxu0 %v7998_v32 }
 0x104   : > { %1322 = vmatmul.mubr.bf16.gmra.mxu0 %v8735_v20 }
 0x105   : > { %1331 = vmatprep.mubr.bf16.mxu0 %v8366_v0  ;;  %7099 = vmatpush3.bf16.msra.mxu0 %v7998_v32 }
 0x106   : > { %1229 = vmatmul.mubr.bf16.gmra.mxu1 %v8679_v56  ;;  %7100 = vmatprep.subr.bf16.mxu0 %v8000_v34 }
 0x107   : > { %1238 = vmatprep.mubr.bf16.mxu1 %v8366_v0 }
 0x109   : > { %7101 = vmatpush3.bf16.msra.mxu0 %v8000_v34 }
 0x10a   : > { %7102 = vmatprep.subr.bf16.mxu0 %v8002_v35 }
 0x10c   : > { %1332 = vmatmul.mubr.bf16.gmra.mxu0 %v8760_v36 }
 0x10d   : > { %1341 = vmatprep.mubr.bf16.mxu0 %v8366_v0  ;;  %7103 = vmatpush3.bf16.msra.mxu0 %v8002_v35 }
 0x10e   : > { %1239 = vmatmul.mubr.bf16.gmra.mxu1 %v8683_v57  ;;  %7104 = vmatprep.subr.bf16.mxu0 %v8003_v38 }
 0x10f   : > { %1248 = vmatprep.mubr.bf16.mxu1 %v8366_v0 }
 0x111   : > { %7105 = vmatpush3.bf16.msra.mxu0 %v8003_v38  ;;  %v8021_v38 = vld [vmem:[#allocation11 + $0xd8] sm:$0xff]  }
 0x112   : > { %7106 = vmatprep.subr.bf16.mxu0 %v8007_v39 }
 0x114   : > { %1342 = vmatmul.mubr.bf16.gmra.mxu0 %v8776_v25 }
 0x115   : > { %1351 = vmatprep.mubr.bf16.mxu0 %v8366_v0  ;;  %7107 = vmatpush3.bf16.msra.mxu0 %v8007_v39 }
 0x116   : > { %1249 = vmatmul.mubr.bf16.gmra.mxu1 %v8697_v62  ;;  %7108 = vmatprep.subr.bf16.mxu0 %v8012_v1 }
 0x117   : > { %1258 = vmatprep.mubr.bf16.mxu1 %v8366_v0 }
 0x119   : > { %7109 = vmatpush3.bf16.msra.mxu0 %v8012_v1 }
 0x11a   : > { %7190 = vmatprep.subr.bf16.mxu0 %v8851_v40 }
 0x11c   : > { %1352 = vmatmul.mubr.bf16.gmra.mxu0 %v8786_v29 }
 0x11d   : > { %1361 = vmatprep.mubr.bf16.mxu0 %v8366_v0 }
 0x11e   : > { %1259 = vmatmul.mubr.bf16.gmra.mxu1 %v8706_v3 }
 0x11f   : > { %1268 = vmatprep.mubr.bf16.mxu1 %v8366_v0 }
 0x124   : > { %1362 = vmatmul.mubr.bf16.gmra.mxu0 %v8796_v52 }
 0x125   : > { %1371 = vmatprep.mubr.bf16.mxu0 %v8366_v0 }
 0x126   : > { %1269 = vmatmul.mubr.bf16.gmra.mxu1 %v8710_v4 }
 0x127   : > { %7062 = vmatprep.mubr.bf16.mxu1 %v8701_v63 }
 0x12c   : > { %1372 = vmatmul.mubr.bf16.gmra.mxu0 %v8807_v59 }
 0x12d   : > { %1381 = vmatprep.mubr.bf16.mxu0 %v8366_v0 }
 0x12e   : > { %7063 = vmatmul.mubr.bf16.vlgmr.msra.gmra.mxu1 %v8735_v20 }
 0x12f   : > { %7066 = vmatprep.mubr.bf16.mxu1 %v8760_v36  ;;  %7143 = vmatpush3.bf16.msra.mxu1 %v8800_v53 }
 0x130   : > { %7144 = vmatprep.subr.bf16.mxu1 %v8005_v41 }
 0x133   : > { %7145 = vmatpush3.bf16.msra.mxu1 %v8005_v41  ;;  %v8024_v41 = vld [vmem:[#allocation11 + $0xd0] sm:$0xff]  }
 0x134   : > { %7146 = vmatprep.subr.bf16.mxu1 %v8006_v42  ;;  %1382 = vmatmul.mubr.bf16.gmra.mxu0 %v8813_v9 }
 0x135   : > { %1391 = vmatprep.mubr.bf16.mxu0 %v8366_v0 }
 0x136   : > { %7067 = vmatmul.mubr.bf16.gmra.mxu1 %v8776_v25 }
 0x137   : > { %7070 = vmatprep.mubr.bf16.mxu1 %v8786_v29  ;;  %7147 = vmatpush3.bf16.msra.mxu1 %v8006_v42 }
 0x138   : > { %7148 = vmatprep.subr.bf16.mxu1 %v8008_v44 }
 0x13b   : > { %7149 = vmatpush3.bf16.msra.mxu1 %v8008_v44 }
 0x13c   : > { %7150 = vmatprep.subr.bf16.mxu1 %v8009_v22  ;;  %1392 = vmatmul.mubr.bf16.gmra.mxu0 %v8820_v16 }
 0x13d   : > { %1401 = vmatprep.mubr.bf16.mxu0 %v8366_v0 }
 0x13e   : > { %7071 = vmatmul.mubr.bf16.gmra.mxu1 %v8796_v52 }
 0x13f   : > { %7074 = vmatprep.mubr.bf16.mxu1 %v8807_v59  ;;  %7151 = vmatpush3.bf16.msra.mxu1 %v8009_v22 }
 0x140   : > { %7152 = vmatprep.subr.bf16.mxu1 %v8010_v45 }
 0x143   : > { %7153 = vmatpush3.bf16.msra.mxu1 %v8010_v45  ;;  %v8027_v45 = vld [vmem:[#allocation11 + $0xc8] sm:$0xff]  }
 0x144   : > { %7154 = vmatprep.subr.bf16.mxu1 %v8011_v48  ;;  %1402 = vmatmul.mubr.bf16.gmra.mxu0 %v8826_v23 }
 0x145   : > { %1411 = vmatprep.mubr.bf16.mxu0 %v8366_v0 }
 0x146   : > { %7075 = vmatmul.mubr.bf16.gmra.mxu1 %v8813_v9 }
 0x147   : > { %7078 = vmatprep.mubr.bf16.mxu1 %v8820_v16  ;;  %7155 = vmatpush3.bf16.msra.mxu1 %v8011_v48 }
 0x148   : > { %7156 = vmatprep.subr.bf16.mxu1 %v8013_v58 }
 0x14b   : > { %7157 = vmatpush3.bf16.msra.mxu1 %v8013_v58 }
 0x14c   : > { %7238 = vmatprep.subr.bf16.mxu1 %v8017_v2  ;;  %1412 = vmatmul.mubr.bf16.gmra.mxu0 %v8832_v30 }
 0x14d   : > { %1421 = vmatprep.mubr.bf16.mxu0 %v8366_v0 }
 0x14e   : > { %7079 = vmatmul.mubr.bf16.gmra.mxu1 %v8826_v23 }
 0x14f   : > { %7082 = vmatprep.mubr.bf16.mxu1 %v8832_v30 }
 0x154   : > { %1422 = vmatmul.mubr.bf16.gmra.mxu0 %v8679_v56 }
 0x155   : > { %1431 = vmatprep.mubr.bf16.mxu0 %v8366_v0 }
 0x156   : > { %7083 = vmatmul.mubr.bf16.gmra.mxu1 %v8679_v56 }
 0x157   : > { %7086 = vmatprep.mubr.bf16.mxu1 %v8683_v57 }
 0x15c   : > { %1432 = vmatmul.mubr.bf16.gmra.mxu0 %v8683_v57 }
 0x15d   : > { %1441 = vmatprep.mubr.bf16.mxu0 %v8366_v0 }
 0x15e   : > { %7087 = vmatmul.mubr.bf16.gmra.mxu1 %v8697_v62 }
 0x15f   : > { %7090 = vmatprep.mubr.bf16.mxu1 %v8706_v3 }
 0x164   : > { %1442 = vmatmul.mubr.bf16.gmra.mxu0 %v8697_v62 }
 0x165   : > { %1451 = vmatprep.mubr.bf16.mxu0 %v8366_v0 }
 0x166   : > { %7091 = vmatmul.mubr.bf16.gmra.mxu1 %v8710_v4 }
 0x167   : > { %7158 = vmatprep.mubr.bf16.mxu1 %v8701_v63 }
 0x16c   : > { %1452 = vmatmul.mubr.bf16.gmra.mxu0 %v8706_v3 }
 0x16d   : > { %1461 = vmatprep.mubr.bf16.mxu0 %v8366_v0 }
 0x16e   : > { %v1120_v33 = vpop.f32.mrf.mxu1  ;;  %7159 = vmatmul.mubr.bf16.vlgmr.msra.gmra.mxu1 %v8735_v20 }
 0x16f   : > { %v1472_v47 = vmax.f32 %v1120_v33, 0.0  ;;  %7162 = vmatprep.mubr.bf16.mxu1 %v8760_v36  ;;  %7239 = vmatpush3.bf16.msra.mxu1 %v8017_v2  ;;  %v563_v33 = vlaneseq }
 0x170   : > { %v1122_v50 = vpop.f32.mrf.mxu1  ;;  %7240 = vmatprep.subr.bf16.mxu1 %v8019_v5 }
 0x171   : > { %1504 = vst [vmem:[%s8897_s19 + $0x10] sm:$0xff] %v1472_v47  ;;  %1536 = vst [vmem:[#allocation2] sm:$0xff] %v1122_v50 }
 0x172   : > { %v1124_v37 = vpop.f32.mrf.mxu1 }
 0x173   : > { %v1473_v43 = vmax.f32 %v1124_v37, 0.0  ;;  %7241 = vmatpush3.bf16.msra.mxu1 %v8019_v5  ;;  %v8029_v5 = vld [vmem:[#allocation11 + $0xc0] sm:$0xff]   ;;  %v8938_v37 = vld [vmem:[#allocation11 + $0x178] sm:$0xff]  }
 0x174   : > { %v1126_v53 = vpop.f32.mrf.mxu1  ;;  %7242 = vmatprep.subr.bf16.mxu1 %v8020_v51  ;;  %1462 = vmatmul.mubr.bf16.gmra.mxu0 %v8710_v4 }
 0x175   : > { %1505 = vst [vmem:[%s8897_s19 + $0x40] sm:$0xff] %v1473_v43  ;;  %1537 = vst [vmem:[#allocation2 + $0x8] sm:$0xff] %v1126_v53  ;;  %7110 = vmatprep.mubr.bf16.mxu0 %v8701_v63  ;;  %v564_v43 = vshrl.u32 %v563_v33, 7  ;;  %v8044_v33 = vld [vmem:[#allocation11 + $0x180] sm:$0xff]  }
 0x176   : > { %v1130_v55 = vpop.f32.mrf.mxu1  ;;  %7163 = vmatmul.mubr.bf16.gmra.mxu1 %v8776_v25 }
 0x177   : > { %v1474_v46 = vmax.f32 %v1130_v55, 0.0  ;;  %7166 = vmatprep.mubr.bf16.mxu1 %v8786_v29  ;;  %7243 = vmatpush3.bf16.msra.mxu1 %v8020_v51 }
 0x178   : > { %v1132_v49 = vpop.f32.mrf.mxu1  ;;  %7244 = vmatprep.subr.bf16.mxu1 %v8022_v54 }
 0x179   : > { %1506 = vst [vmem:[%s8897_s19 + $0x70] sm:$0xff] %v1474_v46  ;;  %1538 = vst [vmem:[#allocation2 + $0x10] sm:$0xff] %v1132_v49  ;;  %v565_v46 = vsub.s32 0, %v564_v43 }
 0x17a   : > { %v1134_v60 = vpop.f32.mrf.mxu1 }
 0x17b   : > { %v1475_v61 = vmax.f32 %v1134_v60, 0.0  ;;  %7245 = vmatpush3.bf16.msra.mxu1 %v8022_v54 }
 0x17c   : > { %v1136_v0 = vpop.f32.mrf.mxu1  ;;  %7246 = vmatprep.subr.bf16.mxu1 %v8023_v7  ;;  %7111 = vmatmul.mubr.bf16.vlgmr.msra.gmra.mxu0 %v8735_v20 }
 0x17d   : > { %1507 = vst [vmem:[%s8897_s19 + $0xa0] sm:$0xff] %v1475_v61  ;;  %1539 = vst [vmem:[#allocation2 + $0x18] sm:$0xff] %v1136_v0  ;;  %7191 = vmatpush3.bf16.msra.mxu0 %v8851_v40  ;;  %7114 = vmatprep.mubr.bf16.mxu0 %v8760_v36 }
 0x17e   : > { %v1140_v11 = vpop.f32.mrf.mxu1  ;;  %7167 = vmatmul.mubr.bf16.gmra.mxu1 %v8796_v52  ;;  %7192 = vmatprep.subr.bf16.mxu0 %v8015_v15 }
 0x17f   : > { %v1476_v13 = vmax.f32 %v1140_v11, 0.0  ;;  %7170 = vmatprep.mubr.bf16.mxu1 %v8807_v59  ;;  %7247 = vmatpush3.bf16.msra.mxu1 %v8023_v7 }
 0x180   : > { %v1142_v6 = vpop.f32.mrf.mxu1  ;;  %7248 = vmatprep.subr.bf16.mxu1 %v8025_v8 }
 0x181   : > { %1508 = vst [vmem:[%s8897_s19 + $0xd0] sm:$0xff] %v1476_v13  ;;  %1540 = vst [vmem:[#allocation2 + $0x20] sm:$0xff] %v1142_v6  ;;  %7193 = vmatpush3.bf16.msra.mxu0 %v8015_v15 }
 0x182   : > { %v1144_v14 = vpop.f32.mrf.mxu1  ;;  %7194 = vmatprep.subr.bf16.mxu0 %v8016_v26 }
 0x183   : > { %v1477_v18 = vmax.f32 %v1144_v14, 0.0  ;;  %7249 = vmatpush3.bf16.msra.mxu1 %v8025_v8 }
 0x184   : > { %v1146_v19 = vpop.f32.mrf.mxu1  ;;  %7250 = vmatprep.subr.bf16.mxu1 %v8026_v10  ;;  %7115 = vmatmul.mubr.bf16.gmra.mxu0 %v8776_v25 }
 0x185   : > { %1509 = vst [vmem:[%s8897_s19 + $0x100] sm:$0xff] %v1477_v18  ;;  %1541 = vst [vmem:[#allocation2 + $0x28] sm:$0xff] %v1146_v19  ;;  %7118 = vmatprep.mubr.bf16.mxu0 %v8786_v29  ;;  %7195 = vmatpush3.bf16.msra.mxu0 %v8016_v26  ;;  %v8035_v18 = vld [vmem:[#allocation11 + $0x1b0] sm:$0xff]   ;;  %v8036_v26 = vld [vmem:[#allocation11 + $0x1a8] sm:$0xff]  }
 0x186   : > { %v1150_v24 = vpop.f32.mrf.mxu1  ;;  %7171 = vmatmul.mubr.bf16.gmra.mxu1 %v8813_v9  ;;  %7196 = vmatprep.subr.bf16.mxu0 %v8018_v31 }
 0x187   : > { %v1478_v27 = vmax.f32 %v1150_v24, 0.0  ;;  %7174 = vmatprep.mubr.bf16.mxu1 %v8820_v16  ;;  %7251 = vmatpush3.bf16.msra.mxu1 %v8026_v10 }
 0x188   : > { %v1152_v28 = vpop.f32.mrf.mxu1  ;;  %7252 = vmatprep.subr.bf16.mxu1 %v8028_v21 }
 0x189   : > { %1510 = vst [vmem:[%s8897_s19 + $0x130] sm:$0xff] %v1478_v27  ;;  %1542 = vst [vmem:[#allocation2 + $0x30] sm:$0xff] %v1152_v28  ;;  %7197 = vmatpush3.bf16.msra.mxu0 %v8018_v31  ;;  %v8038_v31 = vld [vmem:[#allocation11 + $0x1a0] sm:$0xff]  }
 0x18a   : > { %v1154_v17 = vpop.f32.mrf.mxu1  ;;  %7198 = vmatprep.subr.bf16.mxu0 %v8021_v38 }
 0x18b   : > { %v1479_v32 = vmax.f32 %v1154_v17, 0.0  ;;  %7253 = vmatpush3.bf16.msra.mxu1 %v8028_v21 }
 0x18c   : > { %v1156_v34 = vpop.f32.mrf.mxu1  ;;  %7334 = vmatprep.subr.bf16.mxu1 %v8918_v12  ;;  %7119 = vmatmul.mubr.bf16.gmra.mxu0 %v8796_v52 }
 0x18d   : > { %1511 = vst [vmem:[%s8897_s19 + $0x160] sm:$0xff] %v1479_v32  ;;  %1543 = vst [vmem:[#allocation2 + $0x38] sm:$0xff] %v1156_v34  ;;  %7122 = vmatprep.mubr.bf16.mxu0 %v8807_v59  ;;  %7199 = vmatpush3.bf16.msra.mxu0 %v8021_v38 }
 0x18e   : > { %v1160_v35 = vpop.f32.mrf.mxu1  ;;  %7175 = vmatmul.mubr.bf16.gmra.mxu1 %v8826_v23  ;;  %7200 = vmatprep.subr.bf16.mxu0 %v8024_v41 }
 0x18f   : > { %v1480_v39 = vmax.f32 %v1160_v35, 0.0  ;;  %7178 = vmatprep.mubr.bf16.mxu1 %v8832_v30  ;;  %v8039_v35 = vld [vmem:[#allocation11 + $0x198] sm:$0xff]  }
 0x190   : > { %v1162_v1 = vpop.f32.mrf.mxu1 }
 0x191   : > { %1512 = vst [vmem:[%s8897_s19 + $0x190] sm:$0xff] %v1480_v39  ;;  %1544 = vst [vmem:[#allocation2 + $0x40] sm:$0xff] %v1162_v1  ;;  %7201 = vmatpush3.bf16.msra.mxu0 %v8024_v41 }
 0x192   : > { %v1164_v40 = vpop.f32.mrf.mxu1  ;;  %7202 = vmatprep.subr.bf16.mxu0 %v8027_v45 }
 0x193   : > { %v1481_v42 = vmax.f32 %v1164_v40, 0.0  ;;  %v8041_v40 = vld [vmem:[#allocation11 + $0x190] sm:$0xff]  }
 0x194   : > { %v1166_v44 = vpop.f32.mrf.mxu1  ;;  %7123 = vmatmul.mubr.bf16.gmra.mxu0 %v8813_v9 }
 0x195   : > { %1513 = vst [vmem:[%s8897_s19 + $0x1c0] sm:$0xff] %v1481_v42  ;;  %1545 = vst [vmem:[#allocation2 + $0x48] sm:$0xff] %v1166_v44  ;;  %7126 = vmatprep.mubr.bf16.mxu0 %v8820_v16  ;;  %7203 = vmatpush3.bf16.msra.mxu0 %v8027_v45  ;;  %v8031_v45 = vld [vmem:[#allocation11 + $0x170] sm:$0xff]  }
 0x196   : > { %v1170_v22 = vpop.f32.mrf.mxu1  ;;  %7179 = vmatmul.mubr.bf16.gmra.mxu1 %v8679_v56  ;;  %7204 = vmatprep.subr.bf16.mxu0 %v8029_v5 }
 0x197   : > { %v1482_v48 = vmax.f32 %v1170_v22, 0.0  ;;  %7182 = vmatprep.mubr.bf16.mxu1 %v8683_v57  ;;  %v8042_v22 = vld [vmem:[#allocation11 + $0x188] sm:$0xff]  }
 0x198   : > { %v1172_v58 = vpop.f32.mrf.mxu1 }
 0x199   : > { %1514 = vst [vmem:[%s8897_s19 + $0x1f0] sm:$0xff] %v1482_v48  ;;  %1546 = vst [vmem:[#allocation2 + $0x50] sm:$0xff] %v1172_v58  ;;  %7205 = vmatpush3.bf16.msra.mxu0 %v8029_v5 }
 0x19a   : > { %v1174_v2 = vpop.f32.mrf.mxu1  ;;  %7286 = vmatprep.subr.bf16.mxu0 %v8938_v37 }
 0x19b   : > { %v1483_v47 = vmax.f32 %v1174_v2, 0.0 }
 0x19c   : > { %v1176_v50 = vpop.f32.mrf.mxu1  ;;  %7127 = vmatmul.mubr.bf16.gmra.mxu0 %v8826_v23  ;;  %v558_v7 = vpop.f32.mrf.mxu0 }
 0x19d   : > { %1515 = vst [vmem:[%s8897_s19 + $0x220] sm:$0xff] %v1483_v47  ;;  %1547 = vst [vmem:[#allocation2 + $0x58] sm:$0xff] %v1176_v50  ;;  %v562_v61 = vmax.f32 %v558_v7, 0.0  ;;  %7130 = vmatprep.mubr.bf16.mxu0 %v8832_v30  ;;  %v8034_v7 = vld [vmem:[#allocation11 + $0x160] sm:$0xff]  }
 0x19e   : > { %v1180_v51 = vpop.f32.mrf.mxu1  ;;  %7183 = vmatmul.mubr.bf16.gmra.mxu1 %v8697_v62  ;;  %v7045_v0 = vpop.f32.mrf.mxu0 }
 0x19f   : > { %v1484_v53 = vmax.f32 %v1180_v51, 0.0  ;;  %7186 = vmatprep.mubr.bf16.mxu1 %v8706_v3  ;;  %v566_v11 = vrot.slane %v562_v61, %v565_v46  ;;  %v8032_v51 = vld [vmem:[#allocation11 + $0x168] sm:$0xff]  }
 0x1a0   : > { %v1182_v54 = vpop.f32.mrf.mxu1 }
 0x1a1   : > { %1516 = vst [vmem:[%s8897_s19 + $0x250] sm:$0xff] %v1484_v53  ;;  %1548 = vst [vmem:[#allocation2 + $0x60] sm:$0xff] %v1182_v54 }
 0x1a2   : > { %v1184_v55 = vpop.f32.mrf.mxu1  ;;  %567 = vst [vmem:[%s8897_s19] sm:$0xff] %v566_v11  ;;  %568 = vst [vmem:[%s8897_s19 + $0x30] sm:$0xff] %v566_v11 }
 0x1a3   : > { %v1485_v49 = vmax.f32 %v1184_v55, 0.0  ;;  %569 = vst [vmem:[%s8897_s19 + $0x60] sm:$0xff] %v566_v11  ;;  %570 = vst [vmem:[%s8897_s19 + $0x90] sm:$0xff] %v566_v11  ;;  %v9010_v55 = vld [vmem:[#allocation12 + $0x38] sm:$0xff]  }
 0x1a4   : > { %v1186_v60 = vpop.f32.mrf.mxu1  ;;  %571 = vst [vmem:[%s8897_s19 + $0xc0] sm:$0xff] %v566_v11  ;;  %572 = vst [vmem:[%s8897_s19 + $0xf0] sm:$0xff] %v566_v11  ;;  %7131 = vmatmul.mubr.bf16.gmra.mxu0 %v8679_v56 }
 0x1a5   : > { %1517 = vst [vmem:[%s8897_s19 + $0x280] sm:$0xff] %v1485_v49  ;;  %1549 = vst [vmem:[#allocation2 + $0x68] sm:$0xff] %v1186_v60  ;;  %7134 = vmatprep.mubr.bf16.mxu0 %v8683_v57 }
 0x1a6   : > { %v1190_v8 = vpop.f32.mrf.mxu1  ;;  %7187 = vmatmul.mubr.bf16.gmra.mxu1 %v8710_v4  ;;  %573 = vst [vmem:[%s8897_s19 + $0x120] sm:$0xff] %v566_v11  ;;  %574 = vst [vmem:[%s8897_s19 + $0x150] sm:$0xff] %v566_v11 }
 0x1a7   : > { %v1486_v13 = vmax.f32 %v1190_v8, 0.0  ;;  %7254 = vmatprep.mubr.bf16.mxu1 %v8701_v63  ;;  %575 = vst [vmem:[%s8897_s19 + $0x180] sm:$0xff] %v566_v11  ;;  %576 = vst [vmem:[%s8897_s19 + $0x1b0] sm:$0xff] %v566_v11 }
 0x1a8   : > { %v1192_v6 = vpop.f32.mrf.mxu1  ;;  %577 = vst [vmem:[%s8897_s19 + $0x1e0] sm:$0xff] %v566_v11  ;;  %578 = vst [vmem:[%s8897_s19 + $0x210] sm:$0xff] %v566_v11 }
 0x1a9   : > { %579 = vst [vmem:[%s8897_s19 + $0x240] sm:$0xff] %v566_v11  ;;  %580 = vst [vmem:[%s8897_s19 + $0x270] sm:$0xff] %v566_v11 }
 0x1aa   : > { %581 = vst [vmem:[%s8897_s19 + $0x2a0] sm:$0xff] %v566_v11  ;;  %582 = vst [vmem:[%s8897_s19 + $0x2d0] sm:$0xff] %v566_v11  ;;  %v1194_v10 = vpop.f32.mrf.mxu1 }
 0x1ab   : > { %583 = vst [vmem:[%s8897_s19 + $0x300] sm:$0xff] %v566_v11  ;;  %584 = vst [vmem:[%s8897_s19 + $0x330] sm:$0xff] %v566_v11  ;;  %v1487_v15 = vmax.f32 %v1194_v10, 0.0 }
 0x1ac   : > { %585 = vst [vmem:[%s8897_s19 + $0x360] sm:$0xff] %v566_v11  ;;  %586 = vst [vmem:[%s8897_s19 + $0x390] sm:$0xff] %v566_v11  ;;  %v1196_v14 = vpop.f32.mrf.mxu1  ;;  %7135 = vmatmul.mubr.bf16.gmra.mxu0 %v8697_v62 }
 0x1ad   : > { %587 = vst [vmem:[%s8897_s19 + $0x3c0] sm:$0xff] %v566_v11  ;;  %588 = vst [vmem:[%s8897_s19 + $0x3f0] sm:$0xff] %v566_v11  ;;  %7138 = vmatprep.mubr.bf16.mxu0 %v8706_v3 }
 0x1ae   : > { %589 = vst [vmem:[%s8897_s19 + $0x420] sm:$0xff] %v566_v11  ;;  %590 = vst [vmem:[%s8897_s19 + $0x450] sm:$0xff] %v566_v11  ;;  %v1200_v19 = vpop.f32.mrf.mxu1  ;;  %7255 = vmatmul.mubr.bf16.vlgmr.msra.gmra.mxu1 %v8735_v20 }
 0x1af   : > { %591 = vst [vmem:[%s8897_s19 + $0x480] sm:$0xff] %v566_v11  ;;  %592 = vst [vmem:[%s8897_s19 + $0x4b0] sm:$0xff] %v566_v11  ;;  %v1488_v21 = vmax.f32 %v1200_v19, 0.0  ;;  %7258 = vmatprep.mubr.bf16.mxu1 %v8760_v36  ;;  %7335 = vmatpush3.bf16.msra.mxu1 %v8918_v12 }
 0x1b0   : > { %593 = vst [vmem:[%s8897_s19 + $0x4e0] sm:$0xff] %v566_v11  ;;  %594 = vst [vmem:[%s8897_s19 + $0x510] sm:$0xff] %v566_v11  ;;  %v1202_v24 = vpop.f32.mrf.mxu1  ;;  %7336 = vmatprep.subr.bf16.mxu1 %v8035_v18 }
 0x1b1   : > { %595 = vst [vmem:[%s8897_s19 + $0x540] sm:$0xff] %v566_v11  ;;  %596 = vst [vmem:[%s8897_s19 + $0x570] sm:$0xff] %v566_v11 }
 0x1b2   : > { %597 = vst [vmem:[%s8897_s19 + $0x5a0] sm:$0xff] %v566_v11  ;;  %598 = vst [vmem:[%s8897_s19 + $0x5d0] sm:$0xff] %v566_v11  ;;  %v1204_v27 = vpop.f32.mrf.mxu1 }
 0x1b3   : > { %1518 = vst [vmem:[%s8897_s19 + $0x2b0] sm:$0xff] %v1486_v13  ;;  %1550 = vst [vmem:[#allocation2 + $0x70] sm:$0xff] %v1192_v6  ;;  %v1489_v28 = vmax.f32 %v1204_v27, 0.0  ;;  %7337 = vmatpush3.bf16.msra.mxu1 %v8035_v18  ;;  %v8037_v6 = vld [vmem:[#allocation11 + $0x158] sm:$0xff]  }
 0x1b4   : > { %1519 = vst [vmem:[%s8897_s19 + $0x2e0] sm:$0xff] %v1487_v15  ;;  %1551 = vst [vmem:[#allocation2 + $0x78] sm:$0xff] %v1196_v14  ;;  %v1206_v17 = vpop.f32.mrf.mxu1  ;;  %7338 = vmatprep.subr.bf16.mxu1 %v8036_v26  ;;  %7139 = vmatmul.mubr.bf16.gmra.mxu0 %v8710_v4 }
 0x1b5   : > { %1520 = vst [vmem:[%s8897_s19 + $0x310] sm:$0xff] %v1488_v21  ;;  %1552 = vst [vmem:[#allocation2 + $0x80] sm:$0xff] %v1202_v24  ;;  %7206 = vmatprep.mubr.bf16.mxu0 %v8701_v63  ;;  %v8040_v24 = vld [vmem:[#allocation11 + $0x150] sm:$0xff]  }
 0x1b6   : > { %1521 = vst [vmem:[%s8897_s19 + $0x340] sm:$0xff] %v1489_v28  ;;  %1553 = vst [vmem:[#allocation2 + $0x88] sm:$0xff] %v1206_v17  ;;  %v1210_v32 = vpop.f32.mrf.mxu1  ;;  %7259 = vmatmul.mubr.bf16.gmra.mxu1 %v8776_v25 }
 0x1b7   : > { %v1490_v12 = vmax.f32 %v1210_v32, 0.0  ;;  %7262 = vmatprep.mubr.bf16.mxu1 %v8786_v29  ;;  %7339 = vmatpush3.bf16.msra.mxu1 %v8036_v26 }
 0x1b8   : > { %v1212_v34 = vpop.f32.mrf.mxu1  ;;  %7340 = vmatprep.subr.bf16.mxu1 %v8038_v31 }
 0x1b9   : > { %1522 = vst [vmem:[%s8897_s19 + $0x370] sm:$0xff] %v1490_v12  ;;  %1554 = vst [vmem:[#allocation2 + $0x90] sm:$0xff] %v1212_v34  ;;  %v8043_v12 = vld [vmem:[#allocation11 + $0x148] sm:$0xff]  }
 0x1ba   : > { %v1214_v38 = vpop.f32.mrf.mxu1 }
 0x1bb   : > { %v1491_v39 = vmax.f32 %v1214_v38, 0.0  ;;  %7341 = vmatpush3.bf16.msra.mxu1 %v8038_v31 }
 0x1bc   : > { %v1216_v1 = vpop.f32.mrf.mxu1  ;;  %7342 = vmatprep.subr.bf16.mxu1 %v8039_v35  ;;  %v9000_v2 = vpop.f32.mrf.mxu0  ;;  %7207 = vmatmul.mubr.bf16.vlgmr.msra.gmra.mxu0 %v8735_v20 }
 0x1bd   : > { %1523 = vst [vmem:[%s8897_s19 + $0x3a0] sm:$0xff] %v1491_v39  ;;  %1555 = vst [vmem:[#allocation2 + $0x98] sm:$0xff] %v1216_v1  ;;  %7287 = vmatpush3.bf16.msra.mxu0 %v8938_v37  ;;  %7210 = vmatprep.mubr.bf16.mxu0 %v8760_v36 }
 0x1be   : > { %v1220_v41 = vpop.f32.mrf.mxu1  ;;  %7263 = vmatmul.mubr.bf16.gmra.mxu1 %v8796_v52  ;;  %v1315_v47 = vpop.f32.mrf.mxu0  ;;  %7288 = vmatprep.subr.bf16.mxu0 %v8031_v45 }
 0x1bf   : > { %v1492_v42 = vmax.f32 %v1220_v41, 0.0  ;;  %7266 = vmatprep.mubr.bf16.mxu1 %v8807_v59  ;;  %7343 = vmatpush3.bf16.msra.mxu1 %v8039_v35  ;;  %v6213_v43 = vmax.f32 %v1315_v47, 0.0  ;;  %v8045_v41 = vld [vmem:[#allocation11 + $0x140] sm:$0xff]  }
 0x1c0   : > { %v1222_v44 = vpop.f32.mrf.mxu1  ;;  %7344 = vmatprep.subr.bf16.mxu1 %v8041_v40  ;;  %v9008_v54 = vpop.f32.mrf.mxu0 }
 0x1c1   : > { %1524 = vst [vmem:[%s8897_s19 + $0x3d0] sm:$0xff] %v1492_v42  ;;  %1556 = vst [vmem:[#allocation2 + $0xa0] sm:$0xff] %v1222_v44  ;;  %7289 = vmatpush3.bf16.msra.mxu0 %v8031_v45 }
 0x1c2   : > { %v1224_v48 = vpop.f32.mrf.mxu1  ;;  %10029 = vst [vmem:[#allocation20_spill] sm:$0xff] %v9008_v54  ;;  %6245 = vst [vmem:[%s8897_s19 + $0x28] sm:$0xff] %v6213_v43  ;;  %v1319_v46 = vpop.f32.mrf.mxu0  ;;  %7290 = vmatprep.subr.bf16.mxu0 %v8032_v51 }
 0x1c3   : > { %v1493_v58 = vmax.f32 %v1224_v48, 0.0  ;;  %7345 = vmatpush3.bf16.msra.mxu1 %v8041_v40  ;;  %v6214_v60 = vmax.f32 %v1319_v46, 0.0 }
 0x1c4   : > { %v1226_v5 = vpop.f32.mrf.mxu1  ;;  %7346 = vmatprep.subr.bf16.mxu1 %v8042_v22  ;;  %v9014_v0 = vpop.f32.mrf.mxu0  ;;  %7211 = vmatmul.mubr.bf16.gmra.mxu0 %v8776_v25 }
 0x1c5   : > { %1525 = vst [vmem:[%s8897_s19 + $0x400] sm:$0xff] %v1493_v58  ;;  %1557 = vst [vmem:[#allocation2 + $0xa8] sm:$0xff] %v1226_v5  ;;  %7214 = vmatprep.mubr.bf16.mxu0 %v8786_v29  ;;  %7291 = vmatpush3.bf16.msra.mxu0 %v8032_v51  ;;  %v9046_v5 = vld [vmem:[#allocation11 + $0x1f8] sm:$0xff]  }
 0x1c6   : > { %v1230_v50 = vpop.f32.mrf.mxu1  ;;  %7267 = vmatmul.mubr.bf16.gmra.mxu1 %v8813_v9  ;;  %6246 = vst [vmem:[%s8897_s19 + $0x58] sm:$0xff] %v6214_v60  ;;  %v1325_v11 = vpop.f32.mrf.mxu0  ;;  %7292 = vmatprep.subr.bf16.mxu0 %v8034_v7 }
 0x1c7   : > { %v1494_v53 = vmax.f32 %v1230_v50, 0.0  ;;  %7270 = vmatprep.mubr.bf16.mxu1 %v8820_v16  ;;  %7347 = vmatpush3.bf16.msra.mxu1 %v8042_v22  ;;  %v6215_v10 = vmax.f32 %v1325_v11, 0.0 }
 0x1c8   : > { %v1232_v37 = vpop.f32.mrf.mxu1  ;;  %7348 = vmatprep.subr.bf16.mxu1 %v8044_v33  ;;  %v9023_v14 = vpop.f32.mrf.mxu0 }
 0x1c9   : > { %1526 = vst [vmem:[%s8897_s19 + $0x430] sm:$0xff] %v1494_v53  ;;  %1558 = vst [vmem:[#allocation2 + $0xb0] sm:$0xff] %v1232_v37  ;;  %7293 = vmatpush3.bf16.msra.mxu0 %v8034_v7 }
 0x1ca   : > { %v1234_v49 = vpop.f32.mrf.mxu1  ;;  %10030 = vst [vmem:[#allocation21_spill] sm:$0xff] %v9023_v14  ;;  %6247 = vst [vmem:[%s8897_s19 + $0x88] sm:$0xff] %v6215_v10  ;;  %v1329_v19 = vpop.f32.mrf.mxu0  ;;  %7294 = vmatprep.subr.bf16.mxu0 %v8037_v6 }
 0x1cb   : > { %v1495_v61 = vmax.f32 %v1234_v49, 0.0  ;;  %7349 = vmatpush3.bf16.msra.mxu1 %v8044_v33  ;;  %v6216_v26 = vmax.f32 %v1329_v19, 0.0 }
 0x1cc   : > { %v1236_v8 = vpop.f32.mrf.mxu1  ;;  %7430 = vmatprep.subr.bf16.mxu1 %v9010_v55  ;;  %v9027_v28 = vpop.f32.mrf.mxu0  ;;  %7215 = vmatmul.mubr.bf16.gmra.mxu0 %v8796_v52 }
 0x1cd   : > { %1527 = vst [vmem:[%s8897_s19 + $0x460] sm:$0xff] %v1495_v61  ;;  %1559 = vst [vmem:[#allocation2 + $0xb8] sm:$0xff] %v1236_v8  ;;  %7218 = vmatprep.mubr.bf16.mxu0 %v8807_v59  ;;  %7295 = vmatpush3.bf16.msra.mxu0 %v8037_v6 }
 0x1ce   : > { %v1240_v13 = vpop.f32.mrf.mxu1  ;;  %7271 = vmatmul.mubr.bf16.gmra.mxu1 %v8826_v23  ;;  %10031 = vst [vmem:[#allocation22_spill] sm:$0xff] %v9027_v28  ;;  %6248 = vst [vmem:[%s8897_s19 + $0xb8] sm:$0xff] %v6216_v26  ;;  %v1335_v31 = vpop.f32.mrf.mxu0  ;;  %7296 = vmatprep.subr.bf16.mxu0 %v8040_v24  ;;  %v8051_v26 = vld [vmem:[#allocation12 + $0x30] sm:$0xff]  }
 0x1cf   : > { %v1496_v15 = vmax.f32 %v1240_v13, 0.0  ;;  %7274 = vmatprep.mubr.bf16.mxu1 %v8832_v30  ;;  %v6217_v34 = vmax.f32 %v1335_v31, 0.0  ;;  %v1784_v31 = vld [vmem:[#allocation2 + $0x76] sm:$0xff] }
 0x1d0   : > { %v1242_v18 = vpop.f32.mrf.mxu1  ;;  %v9035_v38 = vpop.f32.mrf.mxu0 }
 0x1d1   : > { %1528 = vst [vmem:[%s8897_s19 + $0x490] sm:$0xff] %v1496_v15  ;;  %1560 = vst [vmem:[#allocation2 + $0xc0] sm:$0xff] %v1242_v18  ;;  %7297 = vmatpush3.bf16.msra.mxu0 %v8040_v24 }
 0x1d2   : > { %v1244_v21 = vpop.f32.mrf.mxu1  ;;  %10032 = vst [vmem:[#allocation23_spill] sm:$0xff] %v9035_v38  ;;  %6249 = vst [vmem:[%s8897_s19 + $0xe8] sm:$0xff] %v6217_v34  ;;  %v1339_v1 = vpop.f32.mrf.mxu0  ;;  %7298 = vmatprep.subr.bf16.mxu0 %v8043_v12 }
 0x1d3   : > { %v1497_v27 = vmax.f32 %v1244_v21, 0.0  ;;  %v6218_v42 = vmax.f32 %v1339_v1, 0.0  ;;  %v8052_v1 = vld [vmem:[#allocation12 + $0x28] sm:$0xff]  }
 0x1d4   : > { %v1246_v17 = vpop.f32.mrf.mxu1  ;;  %v9039_v22 = vpop.f32.mrf.mxu0  ;;  %7219 = vmatmul.mubr.bf16.gmra.mxu0 %v8813_v9 }
 0x1d5   : > { %1529 = vst [vmem:[%s8897_s19 + $0x4c0] sm:$0xff] %v1497_v27  ;;  %1561 = vst [vmem:[#allocation2 + $0xc8] sm:$0xff] %v1246_v17  ;;  %7222 = vmatprep.mubr.bf16.mxu0 %v8820_v16  ;;  %7299 = vmatpush3.bf16.msra.mxu0 %v8043_v12 }
 0x1d6   : > { %v1250_v32 = vpop.f32.mrf.mxu1  ;;  %7275 = vmatmul.mubr.bf16.gmra.mxu1 %v8679_v56  ;;  %6250 = vst [vmem:[%s8897_s19 + $0x118] sm:$0xff] %v6218_v42  ;;  %v1345_v48 = vpop.f32.mrf.mxu0  ;;  %7300 = vmatprep.subr.bf16.mxu0 %v8045_v41 }
 0x1d7   : > { %v1498_v35 = vmax.f32 %v1250_v32, 0.0  ;;  %7278 = vmatprep.mubr.bf16.mxu1 %v8683_v57  ;;  %v6219_v33 = vmax.f32 %v1345_v48, 0.0 }
 0x1d8   : > { %v1252_v39 = vpop.f32.mrf.mxu1  ;;  %v9049_v50 = vpop.f32.mrf.mxu0 }
 0x1d9   : > { %1530 = vst [vmem:[%s8897_s19 + $0x4f0] sm:$0xff] %v1498_v35  ;;  %1562 = vst [vmem:[#allocation2 + $0xd0] sm:$0xff] %v1252_v39  ;;  %7301 = vmatpush3.bf16.msra.mxu0 %v8045_v41  ;;  %v1782_v39 = vld [vmem:[#allocation2 + $0x66] sm:$0xff] }
 0x1da   : > { %v1254_v40 = vpop.f32.mrf.mxu1  ;;  %10033 = vst [vmem:[#allocation24_spill] sm:$0xff] %v9049_v50  ;;  %6251 = vst [vmem:[%s8897_s19 + $0x148] sm:$0xff] %v6219_v33  ;;  %v1349_v43 = vpop.f32.mrf.mxu0  ;;  %7382 = vmatprep.subr.bf16.mxu0 %v9046_v5  ;;  %v1783_v33 = vld [vmem:[#allocation2 + $0x6e] sm:$0x3] }
 0x1db   : > { %v1499_v44 = vmax.f32 %v1254_v40, 0.0  ;;  %v6220_v37 = vmax.f32 %v1349_v43, 0.0 }
 0x1dc   : > { %v1256_v45 = vpop.f32.mrf.mxu1  ;;  %v9054_v49 = vpop.f32.mrf.mxu0  ;;  %7223 = vmatmul.mubr.bf16.gmra.mxu0 %v8826_v23 }
 0x1dd   : > { %1531 = vst [vmem:[%s8897_s19 + $0x520] sm:$0xff] %v1499_v44  ;;  %1563 = vst [vmem:[#allocation2 + $0xd8] sm:$0xff] %v1256_v45  ;;  %7226 = vmatprep.mubr.bf16.mxu0 %v8832_v30  ;;  %v1785_v44 = vld [vmem:[#allocation2 + $0x7e] sm:$0x3] }
 0x1de   : > { %v1260_v58 = vpop.f32.mrf.mxu1  ;;  %7279 = vmatmul.mubr.bf16.gmra.mxu1 %v8697_v62  ;;  %10034 = vst [vmem:[#allocation25_spill] sm:$0xff] %v9054_v49  ;;  %6252 = vst [vmem:[%s8897_s19 + $0x178] sm:$0xff] %v6220_v37  ;;  %v1355_v60 = vpop.f32.mrf.mxu0  ;;  %v1788_v37 = vld [vmem:[#allocation2 + $0x96] sm:$0xff] }
 0x1df   : > { %v1500_v47 = vmax.f32 %v1260_v58, 0.0  ;;  %7282 = vmatprep.mubr.bf16.mxu1 %v8706_v3  ;;  %v6221_v8 = vmax.f32 %v1355_v60, 0.0 }
 0x1e0   : > { %v1262_v51 = vpop.f32.mrf.mxu1  ;;  %v9062_v13 = vpop.f32.mrf.mxu0 }
 0x1e1   : > { %1532 = vst [vmem:[%s8897_s19 + $0x550] sm:$0xff] %v1500_v47  ;;  %1564 = vst [vmem:[#allocation2 + $0xe0] sm:$0xff] %v1262_v51  ;;  %v8054_v47 = vld [vmem:[#allocation12 + $0x20] sm:$0xff]  }
 0x1e2   : > { %v1264_v53 = vpop.f32.mrf.mxu1  ;;  %10035 = vst [vmem:[#allocation26_spill] sm:$0xff] %v9062_v13  ;;  %6253 = vst [vmem:[%s8897_s19 + $0x1a8] sm:$0xff] %v6221_v8  ;;  %v1359_v10 = vpop.f32.mrf.mxu0  ;;  %v1786_v8 = vld [vmem:[#allocation2 + $0x86] sm:$0xff] }
 0x1e3   : > { %v1501_v46 = vmax.f32 %v1264_v53, 0.0  ;;  %v6222_v18 = vmax.f32 %v1359_v10, 0.0 }
 0x1e4   : > { %v1266_v7 = vpop.f32.mrf.mxu1  ;;  %v9066_v21 = vpop.f32.mrf.mxu0  ;;  %7227 = vmatmul.mubr.bf16.gmra.mxu0 %v8679_v56 }
 0x1e5   : > { %1533 = vst [vmem:[%s8897_s19 + $0x580] sm:$0xff] %v1501_v46  ;;  %1565 = vst [vmem:[#allocation2 + $0xe8] sm:$0xff] %v1266_v7  ;;  %7230 = vmatprep.mubr.bf16.mxu0 %v8683_v57 }
 0x1e6   : > { %v1270_v61 = vpop.f32.mrf.mxu1  ;;  %7283 = vmatmul.mubr.bf16.gmra.mxu1 %v8710_v4  ;;  %10036 = vst [vmem:[#allocation27_spill] sm:$0xff] %v9066_v21  ;;  %6254 = vst [vmem:[%s8897_s19 + $0x1d8] sm:$0xff] %v6222_v18  ;;  %v1365_v27 = vpop.f32.mrf.mxu0  ;;  %v1789_v18 = vld [vmem:[#allocation2 + $0x9e] sm:$0x3] }
 0x1e7   : > { %v1502_v11 = vmax.f32 %v1270_v61, 0.0  ;;  %7350 = vmatprep.mubr.bf16.mxu1 %v8701_v63  ;;  %v6223_v32 = vmax.f32 %v1365_v27, 0.0 }
 0x1e8   : > { %v1272_v6 = vpop.f32.mrf.mxu1  ;;  %v9075_v34 = vpop.f32.mrf.mxu0 }
 0x1e9   : > { %1534 = vst [vmem:[%s8897_s19 + $0x5b0] sm:$0xff] %v1502_v11  ;;  %1566 = vst [vmem:[#allocation2 + $0xf0] sm:$0xff] %v1272_v6  ;;  %v8055_v11 = vld [vmem:[#allocation12 + $0x18] sm:$0xff]  }
 0x1ea   : > { %v1274_v15 = vpop.f32.mrf.mxu1  ;;  %10037 = vst [vmem:[#allocation28_spill] sm:$0xff] %v9075_v34  ;;  %6255 = vst [vmem:[%s8897_s19 + $0x208] sm:$0xff] %v6223_v32  ;;  %v1369_v41 = vpop.f32.mrf.mxu0  ;;  %v8064_v34 = vld [vmem:[#allocation12 + $0x68] sm:$0xff]  }
 0x1eb   : > { %v1503_v19 = vmax.f32 %v1274_v15, 0.0  ;;  %v6224_v45 = vmax.f32 %v1369_v41, 0.0 }
 0x1ec   : > { %v1276_v24 = vpop.f32.mrf.mxu1  ;;  %v9078_v58 = vpop.f32.mrf.mxu0  ;;  %7231 = vmatmul.mubr.bf16.gmra.mxu0 %v8697_v62 }
 0x1ed   : > { %1535 = vst [vmem:[%s8897_s19 + $0x5e0] sm:$0xff] %v1503_v19  ;;  %1567 = vst [vmem:[#allocation2 + $0xf8] sm:$0xff] %v1276_v24  ;;  %7234 = vmatprep.mubr.bf16.mxu0 %v8706_v3 }
 0x1ee   : > { %v7064_v17 = vpop.f32.mrf.mxu1  ;;  %7351 = vmatmul.mubr.bf16.vlgmr.msra.gmra.mxu1 %v8735_v20  ;;  %10038 = vst [vmem:[#allocation29_spill] sm:$0xff] %v9078_v58  ;;  %6256 = vst [vmem:[%s8897_s19 + $0x238] sm:$0xff] %v6224_v45  ;;  %v1375_v43 = vpop.f32.mrf.mxu0  ;;  %v8058_v45 = vld [vmem:[#allocation12 + $0x8] sm:$0xff]  }
 0x1ef   : > { %v1804_v12 = vadd.f32 %v7064_v17, %v1784_v31  ;;  %7354 = vmatprep.mubr.bf16.mxu1 %v8760_v36  ;;  %7431 = vmatpush3.bf16.msra.mxu1 %v9010_v55  ;;  %v6225_v46 = vmax.f32 %v1375_v43, 0.0  ;;  %v1787_v17 = vld [vmem:[#allocation2 + $0x8e] sm:$0x3]  ;;  %v8057_v31 = vld [vmem:[#allocation12 + $0x10] sm:$0xff]  }
 0x1f0   : > { %v1666_v35 = vpop.f32.mrf.mxu1  ;;  %7432 = vmatprep.subr.bf16.mxu1 %v8051_v26  ;;  %v9085_v60 = vpop.f32.mrf.mxu0 }
 0x1f1   : > { %1824 = vst [vmem:[#allocation2 + $0x76] sm:$0xff] %v1804_v12  ;;  %v1802_v40 = vadd.f32 %v1782_v39, %v1666_v35  ;;  %10039 = vst [vmem:[#allocation30_spill] sm:$0xff] %v9085_v60  ;;  %v1792_v39 = vld [vmem:[#allocation2 + $0xb6] sm:$0xff] }
 0x1f2   : > { %v7065_v42 = vpop.f32.mrf.mxu1  ;;  %6257 = vst [vmem:[%s8897_s19 + $0x268] sm:$0xff] %v6225_v46  ;;  %v1379_v10 = vpop.f32.mrf.mxu0 }
 0x1f3   : > { %1822 = vst [vmem:[#allocation2 + $0x66] sm:$0xff] %v1802_v40  ;;  %v1805_v48 = vadd.f32 %v7065_v42, %v1785_v44  ;;  %7433 = vmatpush3.bf16.msra.mxu1 %v8051_v26  ;;  %v6226_v19 = vmax.f32 %v1379_v10, 0.0  ;;  %v1790_v44 = vld [vmem:[#allocation2 + $0xa6] sm:$0xff]  ;;  %v1796_v10 = vld [vmem:[#allocation2 + $0xd6] sm:$0xff] }
 0x1f4   : > { %v1669_v55 = vpop.f32.mrf.mxu1  ;;  %7434 = vmatprep.subr.bf16.mxu1 %v8052_v1  ;;  %v9088_v26 = vpop.f32.mrf.mxu0  ;;  %7235 = vmatmul.mubr.bf16.gmra.mxu0 %v8710_v4 }
 0x1f5   : > { %1825 = vst [vmem:[#allocation2 + $0x7e] sm:$0x3] %v1805_v48  ;;  %v1803_v51 = vadd.f32 %v1783_v33, %v1669_v55  ;;  %10040 = vst [vmem:[#allocation31_spill] sm:$0xff] %v9088_v26  ;;  %7302 = vmatprep.mubr.bf16.mxu0 %v8701_v63  ;;  %v8047_v33 = vld [vmem:[#allocation11 + $0x1f0] sm:$0xff]  }
 0x1f6   : > { %v7068_v53 = vpop.f32.mrf.mxu1  ;;  %7355 = vmatmul.mubr.bf16.gmra.mxu1 %v8776_v25  ;;  %6258 = vst [vmem:[%s8897_s19 + $0x298] sm:$0xff] %v6226_v19  ;;  %v1385_v12 = vpop.f32.mrf.mxu0 }
 0x1f7   : > { %1823 = vst [vmem:[#allocation2 + $0x6e] sm:$0x3] %v1803_v51  ;;  %v1808_v7 = vadd.f32 %v7068_v53, %v1788_v37  ;;  %7358 = vmatprep.mubr.bf16.mxu1 %v8786_v29  ;;  %7435 = vmatpush3.bf16.msra.mxu1 %v8052_v1  ;;  %v6227_v1 = vmax.f32 %v1385_v12, 0.0  ;;  %v1793_v51 = vld [vmem:[#allocation2 + $0xbe] sm:$0x3] }
 0x1f8   : > { %v1682_v61 = vpop.f32.mrf.mxu1  ;;  %7436 = vmatprep.subr.bf16.mxu1 %v8054_v47  ;;  %v9095_v41 = vpop.f32.mrf.mxu0 }
 0x1f9   : > { %1828 = vst [vmem:[#allocation2 + $0x96] sm:$0xff] %v1808_v7  ;;  %v1806_v6 = vadd.f32 %v1786_v8, %v1682_v61  ;;  %10041 = vst [vmem:[#allocation32_spill] sm:$0xff] %v9095_v41  ;;  %v1791_v7 = vld [vmem:[#allocation2 + $0xae] sm:$0x3]  ;;  %v8060_v61 = vld [vmem:[#allocation12] sm:$0xff]  }
 0x1fa   : > { %v7069_v15 = vpop.f32.mrf.mxu1  ;;  %6259 = vst [vmem:[%s8897_s19 + $0x2c8] sm:$0xff] %v6227_v1  ;;  %v1389_v55 = vpop.f32.mrf.mxu0  ;;  %v2058_v41 = vld [vmem:[#allocation2 + $0x70] sm:$0xff] }
 0x1fb   : > { %1826 = vst [vmem:[#allocation2 + $0x86] sm:$0xff] %v1806_v6  ;;  %v1809_v24 = vadd.f32 %v7069_v15, %v1789_v18  ;;  %7437 = vmatpush3.bf16.msra.mxu1 %v8054_v47  ;;  %v6228_v43 = vmax.f32 %v1389_v55, 0.0  ;;  %v8048_v15 = vld [vmem:[#allocation11 + $0x1e8] sm:$0xff]  }
 0x1fc   : > { %v1685_v27 = vpop.f32.mrf.mxu1  ;;  %7438 = vmatprep.subr.bf16.mxu1 %v8055_v11  ;;  %v9098_v37 = vpop.f32.mrf.mxu0  ;;  %7303 = vmatmul.mubr.bf16.vlgmr.msra.gmra.mxu0 %v8735_v20 }
 0x1fd   : > { %1829 = vst [vmem:[#allocation2 + $0x9e] sm:$0x3] %v1809_v24  ;;  %v1807_v32 = vadd.f32 %v1787_v17, %v1685_v27  ;;  %10042 = vst [vmem:[#allocation33_spill] sm:$0xff] %v9098_v37  ;;  %7383 = vmatpush3.bf16.msra.mxu0 %v9046_v5  ;;  %7306 = vmatprep.mubr.bf16.mxu0 %v8760_v36  ;;  %v1794_v27 = vld [vmem:[#allocation2 + $0xc6] sm:$0xff]  ;;  %v9108_v17 = vld [vmem:[#allocation12 + $0xb8] sm:$0xff]  }
 0x1fe   : > { %v7072_v35 = vpop.f32.mrf.mxu1  ;;  %7359 = vmatmul.mubr.bf16.gmra.mxu1 %v8796_v52  ;;  %6260 = vst [vmem:[%s8897_s19 + $0x2f8] sm:$0xff] %v6228_v43  ;;  %7384 = vmatprep.subr.bf16.mxu0 %v8047_v33 }
 0x1ff   : > { %1827 = vst [vmem:[#allocation2 + $0x8e] sm:$0x3] %v1807_v32  ;;  %v1812_v40 = vadd.f32 %v7072_v35, %v1792_v39  ;;  %7362 = vmatprep.mubr.bf16.mxu1 %v8807_v59  ;;  %7439 = vmatpush3.bf16.msra.mxu1 %v8055_v11  ;;  %v1395_v11 = vpop.f32.mrf.mxu0  ;;  %v1797_v35 = vld [vmem:[#allocation2 + $0xde] sm:$0x3]  ;;  %v8050_v39 = vld [vmem:[#allocation11 + $0x1e0] sm:$0xff]  }
 0x200   : > { %v1698_v42 = vpop.f32.mrf.mxu1  ;;  %7440 = vmatprep.subr.bf16.mxu1 %v8057_v31  ;;  %v6229_v18 = vmax.f32 %v1395_v11, 0.0 }
 0x201   : > { %1832 = vst [vmem:[#allocation2 + $0xb6] sm:$0xff] %v1812_v40  ;;  %v1810_v48 = vadd.f32 %v1790_v44, %v1698_v42  ;;  %v9106_v24 = vpop.f32.mrf.mxu0  ;;  %7385 = vmatpush3.bf16.msra.mxu0 %v8047_v33 }
 0x202   : > { %v7073_v47 = vpop.f32.mrf.mxu1  ;;  %10043 = vst [vmem:[#allocation34_spill] sm:$0xff] %v9106_v24  ;;  %6261 = vst [vmem:[%s8897_s19 + $0x328] sm:$0xff] %v6229_v18  ;;  %7386 = vmatprep.subr.bf16.mxu0 %v8048_v15 }
 0x203   : > { %1830 = vst [vmem:[#allocation2 + $0xa6] sm:$0xff] %v1810_v48  ;;  %v1813_v53 = vadd.f32 %v7073_v47, %v1793_v51  ;;  %7441 = vmatpush3.bf16.msra.mxu1 %v8057_v31  ;;  %v1399_v32 = vpop.f32.mrf.mxu0  ;;  %v1800_v47 = vld [vmem:[#allocation2 + $0xf6] sm:$0xff] }
 0x204   : > { %v1701_v46 = vpop.f32.mrf.mxu1  ;;  %7442 = vmatprep.subr.bf16.mxu1 %v8058_v45  ;;  %v6230_v1 = vmax.f32 %v1399_v32, 0.0  ;;  %7307 = vmatmul.mubr.bf16.gmra.mxu0 %v8776_v25  ;;  %v8053_v51 = vld [vmem:[#allocation11 + $0x1d8] sm:$0xff]  }
 0x205   : > { %1833 = vst [vmem:[#allocation2 + $0xbe] sm:$0x3] %v1813_v53  ;;  %v1811_v8 = vadd.f32 %v1791_v7, %v1701_v46  ;;  %v9111_v42 = vpop.f32.mrf.mxu0  ;;  %7310 = vmatprep.mubr.bf16.mxu0 %v8786_v29  ;;  %7387 = vmatpush3.bf16.msra.mxu0 %v8048_v15  ;;  %v8056_v15 = vld [vmem:[#allocation11 + $0x1d0] sm:$0xff]  }
 0x206   : > { %v7076_v6 = vpop.f32.mrf.mxu1  ;;  %7363 = vmatmul.mubr.bf16.gmra.mxu1 %v8813_v9  ;;  %10044 = vst [vmem:[#allocation35_spill] sm:$0xff] %v9111_v42  ;;  %6262 = vst [vmem:[%s8897_s19 + $0x358] sm:$0xff] %v6230_v1  ;;  %7388 = vmatprep.subr.bf16.mxu0 %v8050_v39 }
 0x207   : > { %1831 = vst [vmem:[#allocation2 + $0xae] sm:$0x3] %v1811_v8  ;;  %v1816_v19 = vadd.f32 %v7076_v6, %v1796_v10  ;;  %7366 = vmatprep.mubr.bf16.mxu1 %v8820_v16  ;;  %7443 = vmatpush3.bf16.msra.mxu1 %v8058_v45  ;;  %v1795_v45 = vld [vmem:[#allocation2 + $0xce] sm:$0x3]  ;;  %v1405_v55 = vpop.f32.mrf.mxu0  ;;  %v1801_v10 = vld [vmem:[#allocation2 + $0xfe] sm:$0x3] }
 0x208   : > { %v1714_v5 = vpop.f32.mrf.mxu1  ;;  %7444 = vmatprep.subr.bf16.mxu1 %v8060_v61  ;;  %v6231_v43 = vmax.f32 %v1405_v55, 0.0  ;;  %v8061_v55 = vld [vmem:[#allocation11 + $0x1c0] sm:$0xff]  }
 0x209   : > { %1836 = vst [vmem:[#allocation2 + $0xd6] sm:$0xff] %v1816_v19  ;;  %v1814_v31 = vadd.f32 %v1794_v27, %v1714_v5  ;;  %v9119_v46 = vpop.f32.mrf.mxu0  ;;  %7389 = vmatpush3.bf16.msra.mxu0 %v8050_v39  ;;  %v8059_v39 = vld [vmem:[#allocation11 + $0x1c8] sm:$0xff]  }
 0x20a   : > { %v7077_v12 = vpop.f32.mrf.mxu1  ;;  %10045 = vst [vmem:[#allocation36_spill] sm:$0xff] %v9119_v46  ;;  %6263 = vst [vmem:[%s8897_s19 + $0x388] sm:$0xff] %v6231_v43  ;;  %7390 = vmatprep.subr.bf16.mxu0 %v8053_v51 }
 0x20b   : > { %1834 = vst [vmem:[#allocation2 + $0xc6] sm:$0xff] %v1814_v31  ;;  %v1817_v40 = vadd.f32 %v7077_v12, %v1797_v35  ;;  %7445 = vmatpush3.bf16.msra.mxu1 %v8060_v61  ;;  %v1798_v61 = vld [vmem:[#allocation2 + $0xe6] sm:$0xff]  ;;  %v1409_v11 = vpop.f32.mrf.mxu0  ;;  %v1799_v31 = vld [vmem:[#allocation2 + $0xee] sm:$0x3] }
 0x20c   : > { %v1717_v44 = vpop.f32.mrf.mxu1  ;;  %7526 = vmatprep.subr.bf16.mxu1 %v9108_v17  ;;  %v6232_v18 = vmax.f32 %v1409_v11, 0.0  ;;  %7311 = vmatmul.mubr.bf16.gmra.mxu0 %v8796_v52 }
 0x20d   : > { %1837 = vst [vmem:[#allocation2 + $0xde] sm:$0x3] %v1817_v40  ;;  %v1815_v48 = vadd.f32 %v1795_v45, %v1717_v44  ;;  %v9122_v5 = vpop.f32.mrf.mxu0  ;;  %7314 = vmatprep.mubr.bf16.mxu0 %v8807_v59  ;;  %7391 = vmatpush3.bf16.msra.mxu0 %v8053_v51 }
 0x20e   : > { %v7080_v33 = vpop.f32.mrf.mxu1  ;;  %7367 = vmatmul.mubr.bf16.gmra.mxu1 %v8826_v23  ;;  %6264 = vst [vmem:[%s8897_s19 + $0x3b8] sm:$0xff] %v6232_v18  ;;  %7392 = vmatprep.subr.bf16.mxu0 %v8056_v15 }
 0x20f   : > { %1835 = vst [vmem:[#allocation2 + $0xce] sm:$0x3] %v1815_v48  ;;  %v1820_v53 = vadd.f32 %v7080_v33, %v1800_v47  ;;  %7370 = vmatprep.mubr.bf16.mxu1 %v8832_v30  ;;  %v1415_v12 = vpop.f32.mrf.mxu0 }
 0x210   : > { %v1730_v7 = vpop.f32.mrf.mxu1  ;;  %v6233_v1 = vmax.f32 %v1415_v12, 0.0 }
 0x211   : > { %1840 = vst [vmem:[#allocation2 + $0xf6] sm:$0xff] %v1820_v53  ;;  %v1818_v8 = vadd.f32 %v1798_v61, %v1730_v7  ;;  %v9129_v40 = vpop.f32.mrf.mxu0  ;;  %7393 = vmatpush3.bf16.msra.mxu0 %v8056_v15  ;;  %v9138_v7 = vld [vmem:[#allocation12 + $0x78] sm:$0xff]  }
 0x212   : > { %v7081_v6 = vpop.f32.mrf.mxu1  ;;  %6265 = vst [vmem:[%s8897_s19 + $0x3e8] sm:$0xff] %v6233_v1  ;;  %7394 = vmatprep.subr.bf16.mxu0 %v8059_v39 }
 0x213   : > { %1838 = vst [vmem:[#allocation2 + $0xe6] sm:$0xff] %v1818_v8  ;;  %v1821_v19 = vadd.f32 %v7081_v6, %v1801_v10  ;;  %v1419_v45 = vpop.f32.mrf.mxu0 }
 0x214   : > { %v1733_v27 = vpop.f32.mrf.mxu1  ;;  %v6234_v33 = vmax.f32 %v1419_v45, 0.0  ;;  %7315 = vmatmul.mubr.bf16.gmra.mxu0 %v8813_v9 }
 0x215   : > { %1841 = vst [vmem:[#allocation2 + $0xfe] sm:$0x3] %v1821_v19  ;;  %v1819_v32 = vadd.f32 %v1799_v31, %v1733_v27  ;;  %v9132_v47 = vpop.f32.mrf.mxu0  ;;  %7318 = vmatprep.mubr.bf16.mxu0 %v8820_v16  ;;  %7395 = vmatpush3.bf16.msra.mxu0 %v8059_v39 }
 0x216   : > { %v7084_v35 = vpop.f32.mrf.mxu1  ;;  %7371 = vmatmul.mubr.bf16.gmra.mxu1 %v8679_v56  ;;  %6266 = vst [vmem:[%s8897_s19 + $0x418] sm:$0xff] %v6234_v33  ;;  %7396 = vmatprep.subr.bf16.mxu0 %v8061_v55 }
 0x217   : > { %1839 = vst [vmem:[#allocation2 + $0xee] sm:$0x3] %v1819_v32  ;;  %7374 = vmatprep.mubr.bf16.mxu1 %v8683_v57  ;;  %v1425_v43 = vpop.f32.mrf.mxu0 }
 0x218   : > { %v1746_v44 = vpop.f32.mrf.mxu1  ;;  %v6235_v61 = vmax.f32 %v1425_v43, 0.0 }
 0x219   : > { %v9141_v8 = vpop.f32.mrf.mxu0  ;;  %7397 = vmatpush3.bf16.msra.mxu0 %v8061_v55  ;;  %v8067_v55 = vld [vmem:[#allocation12 + $0xb0] sm:$0xff]  }
 0x21a   : > { %v7085_v48 = vpop.f32.mrf.mxu1  ;;  %6267 = vst [vmem:[%s8897_s19 + $0x448] sm:$0xff] %v6235_v61  ;;  %7478 = vmatprep.subr.bf16.mxu0 %v9138_v7 }
 0x21b   : > { %v1429_v6 = vpop.f32.mrf.mxu0 }
 0x21c   : > { %v1748_v51 = vpop.f32.mrf.mxu1  ;;  %v6236_v15 = vmax.f32 %v1429_v6, 0.0  ;;  %7319 = vmatmul.mubr.bf16.gmra.mxu0 %v8826_v23 }
 0x21d   : > { %v9145_v18 = vpop.f32.mrf.mxu0  ;;  %7322 = vmatprep.mubr.bf16.mxu0 %v8832_v30 }
 0x21e   : > { %v7088_v53 = vpop.f32.mrf.mxu1  ;;  %7375 = vmatmul.mubr.bf16.gmra.mxu1 %v8697_v62  ;;  %10046 = vst [vmem:[#allocation37_spill] sm:$0xff] %v9145_v18  ;;  %6268 = vst [vmem:[%s8897_s19 + $0x478] sm:$0xff] %v6236_v15  ;;  %v8063_v18 = vld [vmem:[#allocation12 + $0x70] sm:$0xff]  }
 0x21f   : > { %7378 = vmatprep.mubr.bf16.mxu1 %v8706_v3  ;;  %v1435_v27 = vpop.f32.mrf.mxu0 }
 0x220   : > { %v1758_v11 = vpop.f32.mrf.mxu1  ;;  %v6237_v32 = vmax.f32 %v1435_v27, 0.0 }
 0x221   : > { %v9152_v12 = vpop.f32.mrf.mxu0  ;;  %v8068_v11 = vld [vmem:[#allocation12 + $0xa8] sm:$0xff]  }
 0x222   : > { %v7089_v10 = vpop.f32.mrf.mxu1  ;;  %6269 = vst [vmem:[%s8897_s19 + $0x4a8] sm:$0xff] %v6237_v32 }
 0x223   : > { %v1439_v39 = vpop.f32.mrf.mxu0 }
 0x224   : > { %v1760_v19 = vpop.f32.mrf.mxu1  ;;  %v6238_v44 = vmax.f32 %v1439_v39, 0.0  ;;  %7323 = vmatmul.mubr.bf16.gmra.mxu0 %v8679_v56 }
 0x225   : > { %v9155_v45 = vpop.f32.mrf.mxu0  ;;  %7326 = vmatprep.mubr.bf16.mxu0 %v8683_v57 }
 0x226   : > { %v7092_v31 = vpop.f32.mrf.mxu1  ;;  %7379 = vmatmul.mubr.bf16.gmra.mxu1 %v8710_v4  ;;  %10047 = vst [vmem:[#allocation38_spill] sm:$0xff] %v9155_v45  ;;  %6270 = vst [vmem:[%s8897_s19 + $0x4d8] sm:$0xff] %v6238_v44  ;;  %v8071_v44 = vld [vmem:[#allocation12 + $0x98] sm:$0xff]  }
 0x227   : > { %7446 = vmatprep.mubr.bf16.mxu1 %v8701_v63  ;;  %v1445_v33 = vpop.f32.mrf.mxu0 }
 0x228   : > { %v1770_v35 = vpop.f32.mrf.mxu1  ;;  %v6239_v43 = vmax.f32 %v1445_v33, 0.0 }
 0x229   : > { %v9165_v53 = vpop.f32.mrf.mxu0 }
 0x22a   : > { %v7093_v1 = vpop.f32.mrf.mxu1  ;;  %6271 = vst [vmem:[%s8897_s19 + $0x508] sm:$0xff] %v6239_v43 }
 0x22b   : > { %v1449_v6 = vpop.f32.mrf.mxu0 }
 0x22c   : > { %v1772_v48 = vpop.f32.mrf.mxu1  ;;  %v6240_v15 = vmax.f32 %v1449_v6, 0.0  ;;  %7327 = vmatmul.mubr.bf16.gmra.mxu0 %v8697_v62 }
 0x22d   : > { %v9172_v19 = vpop.f32.mrf.mxu0  ;;  %7330 = vmatprep.mubr.bf16.mxu0 %v8706_v3 }
 0x22e   : > { %v9160_v51 = vpop.f32.mrf.mxu1  ;;  %7447 = vmatmul.mubr.bf16.vlgmr.msra.gmra.mxu1 %v8735_v20  ;;  %10048 = vst [vmem:[#allocation39_spill] sm:$0xff] %v9172_v19  ;;  %6272 = vst [vmem:[%s8897_s19 + $0x538] sm:$0xff] %v6240_v15 }
 0x22f   : > { %7450 = vmatprep.mubr.bf16.mxu1 %v8760_v36  ;;  %7527 = vmatpush3.bf16.msra.mxu1 %v9108_v17  ;;  %v8070_v17 = vld [vmem:[#allocation12 + $0xa0] sm:$0xff]   ;;  %v1455_v31 = vpop.f32.mrf.mxu0 }
 0x230   : > { %v9167_v61 = vpop.f32.mrf.mxu1  ;;  %7528 = vmatprep.subr.bf16.mxu1 %v8067_v55  ;;  %v6241_v35 = vmax.f32 %v1455_v31, 0.0 }
 0x231   : > { %v9183_v39 = vpop.f32.mrf.mxu0 }
 0x232   : > { %v9170_v10 = vpop.f32.mrf.mxu1  ;;  %6273 = vst [vmem:[%s8897_s19 + $0x568] sm:$0xff] %v6241_v35 }
 0x233   : > { %7529 = vmatpush3.bf16.msra.mxu1 %v8067_v55  ;;  %v1459_v48 = vpop.f32.mrf.mxu0 }
 0x234   : > { %v9175_v27 = vpop.f32.mrf.mxu1  ;;  %7530 = vmatprep.subr.bf16.mxu1 %v8068_v11  ;;  %v6242_v33 = vmax.f32 %v1459_v48, 0.0  ;;  %7331 = vmatmul.mubr.bf16.gmra.mxu0 %v8710_v4  ;;  %v10008_v48 = vrot.slane %v9170_v10, 6 }
 0x235   : > { %v9190_v43 = vpop.f32.mrf.mxu0  ;;  %7398 = vmatprep.mubr.bf16.mxu0 %v8701_v63 }
 0x236   : > { %v9179_v32 = vpop.f32.mrf.mxu1  ;;  %7451 = vmatmul.mubr.bf16.gmra.mxu1 %v8776_v25  ;;  %10049 = vst [vmem:[#allocation40_spill] sm:$0xff] %v9190_v43  ;;  %6274 = vst [vmem:[%s8897_s19 + $0x598] sm:$0xff] %v6242_v33  ;;  %v8074_v33 = vld [vmem:[#allocation12 + $0x88] sm:$0xff]   ;;  %v2371_v43 = vrot.slane %v9167_v61, 6  ;;  %v8076_v61 = vld [vmem:[#allocation12 + $0x80] sm:$0xff]  }
 0x237   : > { %7454 = vmatprep.mubr.bf16.mxu1 %v8786_v29  ;;  %7531 = vmatpush3.bf16.msra.mxu1 %v8068_v11  ;;  %v8073_v11 = vld [vmem:[#allocation12 + $0x90] sm:$0xff]   ;;  %v1465_v15 = vpop.f32.mrf.mxu0 }
 0x238   : > { %v9185_v1 = vpop.f32.mrf.mxu1  ;;  %7532 = vmatprep.subr.bf16.mxu1 %v8070_v17  ;;  %v6243_v35 = vmax.f32 %v1465_v15, 0.0 }
 0x239   : > { %v9203_v19 = vpop.f32.mrf.mxu0 }
 0x23a   : > { %v9188_v55 = vpop.f32.mrf.mxu1  ;;  %6275 = vst [vmem:[%s8897_s19 + $0x5c8] sm:$0xff] %v6243_v35 }
 0x23b   : > { %7533 = vmatpush3.bf16.msra.mxu1 %v8070_v17  ;;  %v2374_v17 = vrot.slane %v9160_v51, 6  ;;  %v1469_v46 = vpop.f32.mrf.mxu0  ;;  %v10051_v37 = vrot.slane %v9188_v55, 6 }
 0x23c   : > { %v9193_v6 = vpop.f32.mrf.mxu1  ;;  %7534 = vmatprep.subr.bf16.mxu1 %v8071_v44  ;;  %v6244_v51 = vmax.f32 %v1469_v46, 0.0  ;;  %7399 = vmatmul.mubr.bf16.vlgmr.msra.gmra.mxu0 %v8735_v20  ;;  %v10050_v46 = vrot.slane %v9175_v27, 6 }
 0x23d   : > { %v2376_v60 = vsel %vm2370_vm1, %v2374_v17, %v10008_v48  ;;  %v7112_v45 = vpop.f32.mrf.mxu0  ;;  %7479 = vmatpush3.bf16.msra.mxu0 %v9138_v7  ;;  %7402 = vmatprep.mubr.bf16.mxu0 %v8760_v36  ;;  %v2056_v17 = vld [vmem:[#allocation2 + $0x60] sm:$0xff] }
 0x23e   : > { %v9197_v31 = vpop.f32.mrf.mxu1  ;;  %7455 = vmatmul.mubr.bf16.gmra.mxu1 %v8796_v52  ;;  %6276 = vst [vmem:[%s8897_s19 + $0x5f8] sm:$0xff] %v6244_v51  ;;  %v2078_v15 = vadd.f32 %v7112_v45, %v2058_v41  ;;  %7480 = vmatprep.subr.bf16.mxu0 %v8063_v18  ;;  %v2380_v41 = vrot.slane %v9179_v32, 6  ;;  %v2059_v51 = vld [vmem:[#allocation2 + $0x78] sm:$0xff] }
 0x23f   : > { %7458 = vmatprep.mubr.bf16.mxu1 %v8807_v59  ;;  %7535 = vmatpush3.bf16.msra.mxu1 %v8071_v44  ;;  %v1941_v13 = vpop.f32.mrf.mxu0 }
 0x240   : > { %v9205_v24 = vpop.f32.mrf.mxu1  ;;  %7536 = vmatprep.subr.bf16.mxu1 %v8073_v11  ;;  %v2423_v38 = vadd.f32 %v2376_v60, %v2078_v15  ;;  %v2076_v50 = vadd.f32 %v2056_v17, %v1941_v13  ;;  %v2377_v13 = vrot.slane %v9185_v1, 6  ;;  %v10009_v60 = vrot.slane %v9193_v6, 6  ;;  %v2057_v15 = vld [vmem:[#allocation2 + $0x68] sm:$0xff] }
 0x241   : > { %v7113_v45 = vpop.f32.mrf.mxu0  ;;  %7481 = vmatpush3.bf16.msra.mxu0 %v8063_v18  ;;  %v8066_v17 = vld [vmem:[#allocation12 + $0x60] sm:$0xff]   ;;  %v2062_v18 = vld [vmem:[#allocation2 + $0x90] sm:$0xff]  ;;  %v2383_v42 = vrot.slane %v9205_v24, 6 }
 0x242   : > { %v9210_v44 = vpop.f32.mrf.mxu1  ;;  %2443 = vst [vmem:[#allocation2 + $0x70] sm:$0xff] %v2423_v38  ;;  %v2079_v14 = vadd.f32 %v7113_v45, %v2059_v51  ;;  %7482 = vmatprep.subr.bf16.mxu0 %v8064_v34  ;;  %v2382_v38 = vsel %vm2370_vm1, %v2380_v41, %v10051_v37  ;;  %v8069_v41 = vld [vmem:[#allocation12 + $0x58] sm:$0xff]  }
 0x243   : > { %7537 = vmatpush3.bf16.msra.mxu1 %v8073_v11  ;;  %v2373_v11 = vsel %vm2370_vm1, %v2371_v43, %v10050_v46  ;;  %v9232_v46 = vld [vmem:[#allocation12 + $0x138] sm:$0xff]  }
 0x244   : > { %v9216_v35 = vpop.f32.mrf.mxu1  ;;  %7538 = vmatprep.subr.bf16.mxu1 %v8074_v33  ;;  %v2421_v54 = vadd.f32 %v2373_v11, %v2076_v50  ;;  %2099 = vst [vmem:[#allocation2 + $0x78] sm:$0xff] %v2079_v14  ;;  %7403 = vmatmul.mubr.bf16.gmra.mxu0 %v8776_v25 }
 0x245   : > { %7406 = vmatprep.mubr.bf16.mxu0 %v8786_v29  ;;  %7483 = vmatpush3.bf16.msra.mxu0 %v8064_v34  ;;  %v10052_v34 = vrot.slane %v9170_v10, 6 }
 0x246   : > { %v9224_v48 = vpop.f32.mrf.mxu1  ;;  %7459 = vmatmul.mubr.bf16.gmra.mxu1 %v8813_v9  ;;  %2441 = vst [vmem:[#allocation2 + $0x60] sm:$0xff] %v2421_v54  ;;  %v2379_v54 = vsel %vm2370_vm1, %v2377_v13, %v10009_v60  ;;  %7484 = vmatprep.subr.bf16.mxu0 %v8066_v17 }
 0x247   : > { %7462 = vmatprep.mubr.bf16.mxu1 %v8820_v16  ;;  %7539 = vmatpush3.bf16.msra.mxu1 %v8074_v33  ;;  %v1944_v33 = vpop.f32.mrf.mxu0 }
 0x248   : > { %v9230_v43 = vpop.f32.mrf.mxu1  ;;  %7540 = vmatprep.subr.bf16.mxu1 %v8076_v61  ;;  %v2077_v7 = vadd.f32 %v2057_v15, %v1944_v33  ;;  %v2063_v15 = vld [vmem:[#allocation2 + $0x98] sm:$0xff] }
 0x249   : > { %v7116_v50 = vpop.f32.mrf.mxu0  ;;  %7485 = vmatpush3.bf16.msra.mxu0 %v8066_v17  ;;  %v10053_v17 = vrot.slane %v9210_v44, 6 }
 0x24a   : > { %v9236_v32 = vpop.f32.mrf.mxu1  ;;  %2097 = vst [vmem:[#allocation2 + $0x68] sm:$0xff] %v2077_v7  ;;  %v2082_v11 = vadd.f32 %v7116_v50, %v2062_v18  ;;  %v2386_v7 = vrot.slane %v9197_v31, 6  ;;  %7486 = vmatprep.subr.bf16.mxu0 %v8069_v41  ;;  %v8072_v31 = vld [vmem:[#allocation12 + $0x50] sm:$0xff]  }
 0x24b   : > { %7541 = vmatpush3.bf16.msra.mxu1 %v8076_v61  ;;  %v1957_v14 = vpop.f32.mrf.mxu0  ;;  %v2060_v61 = vld [vmem:[#allocation2 + $0x80] sm:$0xff]  ;;  %v2333_v60 = vld [vmem:[#allocation2 + $0x78] sm:$0x3] }
 0x24c   : > { %v9242_v1 = vpop.f32.mrf.mxu1  ;;  %7622 = vmatprep.subr.bf16.mxu1 %v9232_v46  ;;  %v2427_v45 = vadd.f32 %v2382_v38, %v2082_v11  ;;  %v2080_v51 = vadd.f32 %v2060_v61, %v1957_v14  ;;  %v2061_v14 = vld [vmem:[#allocation2 + $0x88] sm:$0xff]  ;;  %v2424_v58 = vadd.f32 %v10052_v34, %v2333_v60  ;;  %7407 = vmatmul.mubr.bf16.gmra.mxu0 %v8796_v52  ;;  %v10054_v38 = vrot.slane %v9175_v27, 6 }
 0x24d   : > { %v7117_v33 = vpop.f32.mrf.mxu0  ;;  %7410 = vmatprep.mubr.bf16.mxu0 %v8807_v59  ;;  %7487 = vmatpush3.bf16.msra.mxu0 %v8069_v41  ;;  %v10055_v60 = vrot.slane %v9216_v35, 6  ;;  %v2393_v41 = vrot.slane %v9236_v32, 6 }
 0x24e   : > { %v9249_v37 = vpop.f32.mrf.mxu1  ;;  %7463 = vmatmul.mubr.bf16.gmra.mxu1 %v8826_v23  ;;  %2447 = vst [vmem:[#allocation2 + $0x90] sm:$0xff] %v2427_v45  ;;  %v2425_v13 = vadd.f32 %v2379_v54, %v2080_v51  ;;  %v2083_v18 = vadd.f32 %v7117_v33, %v2063_v15  ;;  %v2388_v51 = vsel %vm2370_vm1, %v2386_v7, %v10053_v17  ;;  %v2066_v33 = vld [vmem:[#allocation2 + $0xb0] sm:$0xff]  ;;  %2444 = vst [vmem:[#allocation2 + $0x78] sm:$0x3] %v2424_v58 }
 0x24f   : > { %7466 = vmatprep.mubr.bf16.mxu1 %v8832_v30  ;;  %v1960_v11 = vpop.f32.mrf.mxu0  ;;  %v2385_v34 = vsel %vm2370_vm1, %v2383_v42, %v10055_v60  ;;  %7488 = vmatprep.subr.bf16.mxu0 %v8072_v31 }
 0x250   : > { %v9255_v50 = vpop.f32.mrf.mxu1  ;;  %2445 = vst [vmem:[#allocation2 + $0x80] sm:$0xff] %v2425_v13  ;;  %2103 = vst [vmem:[#allocation2 + $0x98] sm:$0xff] %v2083_v18  ;;  %v2081_v45 = vadd.f32 %v2061_v14, %v1960_v11  ;;  %v2064_v13 = vld [vmem:[#allocation2 + $0xa0] sm:$0xff]  ;;  %v8075_v11 = vld [vmem:[#allocation12 + $0x48] sm:$0xff]  }
 0x251   : > { %v2331_v54 = vld [vmem:[#allocation2 + $0x68] sm:$0x3]  ;;  %v7120_v24 = vpop.f32.mrf.mxu0  ;;  %7489 = vmatpush3.bf16.msra.mxu0 %v8072_v31 }
 0x252   : > { %v9259_v61 = vpop.f32.mrf.mxu1  ;;  %v2422_v26 = vadd.f32 %v10054_v38, %v2331_v54  ;;  %2101 = vst [vmem:[#allocation2 + $0x88] sm:$0xff] %v2081_v45  ;;  %v2086_v10 = vadd.f32 %v7120_v24, %v2066_v33  ;;  %v2392_v38 = vrot.slane %v9224_v48, 6  ;;  %v2067_v45 = vld [vmem:[#allocation2 + $0xb8] sm:$0xff]  ;;  %v2389_v33 = vrot.slane %v9230_v43, 6  ;;  %7490 = vmatprep.subr.bf16.mxu0 %v8075_v11  ;;  %v2070_v43 = vld [vmem:[#allocation2 + $0xd0] sm:$0xff] }
 0x253   : > { %v1973_v7 = vpop.f32.mrf.mxu0  ;;  %v10056_v48 = vrot.slane %v9188_v55, 6 }
 0x254   : > { %v9267_v15 = vpop.f32.mrf.mxu1  ;;  %2442 = vst [vmem:[#allocation2 + $0x68] sm:$0x3] %v2422_v26  ;;  %v2431_v58 = vadd.f32 %v2388_v51, %v2086_v10  ;;  %v2084_v27 = vadd.f32 %v2064_v13, %v1973_v7  ;;  %v2390_v26 = vrot.slane %v9242_v1, 6  ;;  %v2065_v10 = vld [vmem:[#allocation2 + $0xa8] sm:$0xff]  ;;  %v2394_v31 = vsel %vm2370_vm1, %v2392_v38, %v2393_v41  ;;  %7411 = vmatmul.mubr.bf16.gmra.mxu0 %v8813_v9  ;;  %v2068_v38 = vld [vmem:[#allocation2 + $0xc0] sm:$0xff] }
 0x255   : > { %v7121_v14 = vpop.f32.mrf.mxu0  ;;  %v8077_v7 = vld [vmem:[#allocation12 + $0x40] sm:$0xff]   ;;  %7414 = vmatprep.mubr.bf16.mxu0 %v8820_v16  ;;  %7491 = vmatpush3.bf16.msra.mxu0 %v8075_v11  ;;  %v2399_v11 = vrot.slane %v9259_v61, 6 }
 0x256   : > { %v7180_v18 = vpop.f32.mrf.mxu1  ;;  %7467 = vmatmul.mubr.bf16.gmra.mxu1 %v8679_v56  ;;  %2451 = vst [vmem:[#allocation2 + $0xb0] sm:$0xff] %v2431_v58  ;;  %v2429_v42 = vadd.f32 %v2385_v34, %v2084_v27  ;;  %v2087_v17 = vadd.f32 %v7121_v14, %v2067_v45  ;;  %v10057_v14 = vrot.slane %v9193_v6, 6  ;;  %7492 = vmatprep.subr.bf16.mxu0 %v8077_v7 }
 0x257   : > { %7470 = vmatprep.mubr.bf16.mxu1 %v8683_v57  ;;  %v2337_v24 = vld [vmem:[#allocation2 + $0x98] sm:$0x3]  ;;  %v1976_v51 = vpop.f32.mrf.mxu0 }
 0x258   : > { %v2295_v54 = vpop.f32.mrf.mxu1  ;;  %v2428_v13 = vadd.f32 %v10056_v48, %v2337_v24  ;;  %2449 = vst [vmem:[#allocation2 + $0xa0] sm:$0xff] %v2429_v42  ;;  %2107 = vst [vmem:[#allocation2 + $0xb8] sm:$0xff] %v2087_v17  ;;  %v2085_v18 = vadd.f32 %v2065_v10, %v1976_v51  ;;  %v9294_v24 = vld [vmem:[#allocation12 + $0xf8] sm:$0xff]   ;;  %v2398_v10 = vrot.slane %v9249_v37, 6  ;;  %v10058_v37 = vrot.slane %v9210_v44, 6 }
 0x259   : > { %v2335_v58 = vld [vmem:[#allocation2 + $0x88] sm:$0x3]  ;;  %v7124_v34 = vpop.f32.mrf.mxu0  ;;  %v2391_v54 = vsel %vm2370_vm1, %v2389_v33, %v2390_v26  ;;  %v2071_v48 = vld [vmem:[#allocation2 + $0xd8] sm:$0xff]  ;;  %7493 = vmatpush3.bf16.msra.mxu0 %v8077_v7 }
 0x25a   : > { %v7181_v60 = vpop.f32.mrf.mxu1  ;;  %2448 = vst [vmem:[#allocation2 + $0x98] sm:$0x3] %v2428_v13  ;;  %v2426_v45 = vadd.f32 %v10057_v14, %v2335_v58  ;;  %2105 = vst [vmem:[#allocation2 + $0xa8] sm:$0xff] %v2085_v18  ;;  %v2090_v55 = vadd.f32 %v7124_v34, %v2070_v43  ;;  %v2395_v34 = vrot.slane %v9255_v50, 6  ;;  %v2396_v43 = vrot.slane %v9267_v15, 6  ;;  %7574 = vmatprep.subr.bf16.mxu0 %v9294_v24  ;;  %v2074_v50 = vld [vmem:[#allocation2 + $0xf0] sm:$0xff] }
 0x25b   : > { %v1989_v42 = vpop.f32.mrf.mxu0  ;;  %v2400_v7 = vsel %vm2370_vm1, %v2398_v10, %v2399_v11 }
 0x25c   : > { %v2297_v27 = vpop.f32.mrf.mxu1  ;;  %2446 = vst [vmem:[#allocation2 + $0x88] sm:$0x3] %v2426_v45  ;;  %v2435_v6 = vadd.f32 %v2394_v31, %v2090_v55  ;;  %v2088_v51 = vadd.f32 %v2068_v38, %v1989_v42  ;;  %7415 = vmatmul.mubr.bf16.gmra.mxu0 %v8826_v23 }
 0x25d   : > { %v7125_v60 = vpop.f32.mrf.mxu0  ;;  %v2069_v27 = vld [vmem:[#allocation2 + $0xc8] sm:$0xff]  ;;  %7418 = vmatprep.mubr.bf16.mxu0 %v8832_v30 }
 0x25e   : > { %v7184_v17 = vpop.f32.mrf.mxu1  ;;  %7471 = vmatmul.mubr.bf16.gmra.mxu1 %v8697_v62  ;;  %2455 = vst [vmem:[#allocation2 + $0xd0] sm:$0xff] %v2435_v6  ;;  %v2433_v13 = vadd.f32 %v2391_v54, %v2088_v51  ;;  %v2091_v18 = vadd.f32 %v7125_v60, %v2071_v48  ;;  %v2397_v51 = vsel %vm2370_vm1, %v2395_v34, %v2396_v43  ;;  %v2072_v48 = vld [vmem:[#allocation2 + $0xe0] sm:$0xff] }
 0x25f   : > { %7474 = vmatprep.mubr.bf16.mxu1 %v8706_v3  ;;  %v2341_v58 = vld [vmem:[#allocation2 + $0xb8] sm:$0x3]  ;;  %v1992_v31 = vpop.f32.mrf.mxu0  ;;  %v10059_v17 = vrot.slane %v9216_v35, 6 }
 0x260   : > { %v2307_v33 = vpop.f32.mrf.mxu1  ;;  %v2432_v45 = vadd.f32 %v10058_v37, %v2341_v58  ;;  %2453 = vst [vmem:[#allocation2 + $0xc0] sm:$0xff] %v2433_v13  ;;  %2111 = vst [vmem:[#allocation2 + $0xd8] sm:$0xff] %v2091_v18  ;;  %v2089_v55 = vadd.f32 %v2069_v27, %v1992_v31  ;;  %v2075_v18 = vld [vmem:[#allocation2 + $0xf8] sm:$0xff] }
 0x261   : > { %v2339_v42 = vld [vmem:[#allocation2 + $0xa8] sm:$0x3]  ;;  %v7128_v54 = vpop.f32.mrf.mxu0 }
 0x262   : > { %v7185_v14 = vpop.f32.mrf.mxu1  ;;  %2452 = vst [vmem:[#allocation2 + $0xb8] sm:$0x3] %v2432_v45  ;;  %v2430_v6 = vadd.f32 %v10059_v17, %v2339_v42  ;;  %2109 = vst [vmem:[#allocation2 + $0xc8] sm:$0xff] %v2089_v55  ;;  %v2094_v44 = vadd.f32 %v7128_v54, %v2074_v50  ;;  %v2073_v45 = vld [vmem:[#allocation2 + $0xe8] sm:$0xff]  ;;  %v8083_v50 = vld [vmem:[#allocation12 + $0x130] sm:$0xff]  }
 0x263   : > { %v2005_v60 = vpop.f32.mrf.mxu0 }
 0x264   : > { %v2309_v38 = vpop.f32.mrf.mxu1  ;;  %2450 = vst [vmem:[#allocation2 + $0xa8] sm:$0x3] %v2430_v6  ;;  %v2439_v33 = vadd.f32 %v2400_v7, %v2094_v44  ;;  %v2092_v13 = vadd.f32 %v2072_v48, %v2005_v60  ;;  %7419 = vmatmul.mubr.bf16.gmra.mxu0 %v8679_v56 }
 0x265   : > { %v7129_v35 = vpop.f32.mrf.mxu0  ;;  %7422 = vmatprep.mubr.bf16.mxu0 %v8683_v57 }
 0x266   : > { %v7188_v10 = vpop.f32.mrf.mxu1  ;;  %7475 = vmatmul.mubr.bf16.gmra.mxu1 %v8710_v4  ;;  %2459 = vst [vmem:[#allocation2 + $0xf0] sm:$0xff] %v2439_v33  ;;  %v2437_v31 = vadd.f32 %v2397_v51, %v2092_v13  ;;  %v2095_v27 = vadd.f32 %v7129_v35, %v2075_v18  ;;  %v8084_v51 = vld [vmem:[#allocation12 + $0x128] sm:$0xff]  }
 0x267   : > { %7542 = vmatprep.mubr.bf16.mxu1 %v8701_v63  ;;  %v2345_v14 = vld [vmem:[#allocation2 + $0xd8] sm:$0x3]  ;;  %v2008_v37 = vpop.f32.mrf.mxu0 }
 0x268   : > { %v2319_v58 = vpop.f32.mrf.mxu1  ;;  %v2436_v55 = vadd.f32 %v2393_v41, %v2345_v14  ;;  %2457 = vst [vmem:[#allocation2 + $0xe0] sm:$0xff] %v2437_v31  ;;  %2115 = vst [vmem:[#allocation2 + $0xf8] sm:$0xff] %v2095_v27  ;;  %v2093_v42 = vadd.f32 %v2073_v45, %v2008_v37  ;;  %v8087_v31 = vld [vmem:[#allocation12 + $0x118] sm:$0xff]   ;;  %v8089_v37 = vld [vmem:[#allocation12 + $0x110] sm:$0xff]  }
 0x269   : > { %v7132_v7 = vpop.f32.mrf.mxu0  ;;  %v2343_v38 = vld [vmem:[#allocation2 + $0xc8] sm:$0x3] }
 0x26a   : > { %v7189_v34 = vpop.f32.mrf.mxu1  ;;  %2456 = vst [vmem:[#allocation2 + $0xd8] sm:$0x3] %v2436_v55  ;;  %2113 = vst [vmem:[#allocation2 + $0xe8] sm:$0xff] %v2093_v42  ;;  %v2434_v17 = vadd.f32 %v2390_v26, %v2343_v38  ;;  %v8090_v7 = vld [vmem:[#allocation12 + $0x108] sm:$0xff]  }
 0x26b   : > { %v2021_v6 = vpop.f32.mrf.mxu0 }
 0x26c   : > { %v2321_v54 = vpop.f32.mrf.mxu1  ;;  %2454 = vst [vmem:[#allocation2 + $0xc8] sm:$0x3] %v2434_v17  ;;  %7423 = vmatmul.mubr.bf16.gmra.mxu0 %v8697_v62  ;;  %v2689_v6 = vld [vmem:[#allocation2 + $0x16] sm:$0xff] }
 0x26d   : > { %v7133_v32 = vpop.f32.mrf.mxu0  ;;  %7426 = vmatprep.mubr.bf16.mxu0 %v8706_v3 }
 0x26e   : > { %v9322_v44 = vpop.f32.mrf.mxu1  ;;  %7543 = vmatmul.mubr.bf16.vlgmr.msra.gmra.mxu1 %v8735_v20 }
 0x26f   : > { %7546 = vmatprep.mubr.bf16.mxu1 %v8760_v36  ;;  %7623 = vmatpush3.bf16.msra.mxu1 %v9232_v46  ;;  %v2349_v60 = vld [vmem:[#allocation2 + $0xf8] sm:$0x3]  ;;  %v2023_v48 = vpop.f32.mrf.mxu0  ;;  %v8086_v46 = vld [vmem:[#allocation12 + $0x120] sm:$0xff]  }
 0x270   : > { %v9327_v41 = vpop.f32.mrf.mxu1  ;;  %7624 = vmatprep.subr.bf16.mxu1 %v8083_v50  ;;  %v2440_v1 = vadd.f32 %v2399_v11, %v2349_v60 }
 0x271   : > { %v7136_v26 = vpop.f32.mrf.mxu0  ;;  %v2347_v13 = vld [vmem:[#allocation2 + $0xe8] sm:$0x3] }
 0x272   : > { %v9329_v10 = vpop.f32.mrf.mxu1  ;;  %2460 = vst [vmem:[#allocation2 + $0xf8] sm:$0x3] %v2440_v1  ;;  %v2438_v35 = vadd.f32 %v2396_v43, %v2347_v13  ;;  %v2687_v1 = vld [vmem:[#allocation2 + $0x6] sm:$0xff] }
 0x273   : > { %7625 = vmatpush3.bf16.msra.mxu1 %v8083_v50  ;;  %v2033_v18 = vpop.f32.mrf.mxu0  ;;  %v8079_v50 = vld [vmem:[#allocation12 + $0xf0] sm:$0xff]  }
 0x274   : > { %v9334_v33 = vpop.f32.mrf.mxu1  ;;  %7626 = vmatprep.subr.bf16.mxu1 %v8084_v51  ;;  %2458 = vst [vmem:[#allocation2 + $0xe8] sm:$0x3] %v2438_v35  ;;  %7427 = vmatmul.mubr.bf16.gmra.mxu0 %v8710_v4  ;;  %v3076_v35 = vrot.slane %v9322_v44, 6  ;;  %v3077_v18 = vrot.slane %v9329_v10, 6  ;;  %v8082_v10 = vld [vmem:[#allocation12 + $0xe0] sm:$0xff]  }
 0x275   : > { %v7137_v61 = vpop.f32.mrf.mxu0  ;;  %7494 = vmatprep.mubr.bf16.mxu0 %v8701_v63 }
 0x276   : > { %v9339_v58 = vpop.f32.mrf.mxu1  ;;  %7547 = vmatmul.mubr.bf16.gmra.mxu1 %v8776_v25  ;;  %v2690_v61 = vld [vmem:[#allocation2 + $0x1e] sm:$0x3] }
 0x277   : > { %7550 = vmatprep.mubr.bf16.mxu1 %v8786_v29  ;;  %7627 = vmatpush3.bf16.msra.mxu1 %v8084_v51  ;;  %v2035_v27 = vpop.f32.mrf.mxu0  ;;  %v8092_v51 = vld [vmem:[#allocation12 + $0x100] sm:$0xff]  }
 0x278   : > { %v9343_v11 = vpop.f32.mrf.mxu1  ;;  %7628 = vmatprep.subr.bf16.mxu1 %v8086_v46  ;;  %v9372_v27 = vld [vmem:[#allocation12 + $0x1b8] sm:$0xff]  }
 0x279   : > { %v7140_v15 = vpop.f32.mrf.mxu0 }
 0x27a   : > { %v9345_v14 = vpop.f32.mrf.mxu1 }
 0x27b   : > { %7629 = vmatpush3.bf16.msra.mxu1 %v8086_v46  ;;  %v2045_v45 = vpop.f32.mrf.mxu0  ;;  %v8080_v46 = vld [vmem:[#allocation12 + $0xe8] sm:$0xff]  }
 0x27c   : > { %v9348_v43 = vpop.f32.mrf.mxu1  ;;  %7630 = vmatprep.subr.bf16.mxu1 %v8087_v31  ;;  %7495 = vmatmul.mubr.bf16.vlgmr.msra.gmra.mxu0 %v8735_v20  ;;  %v3074_v45 = vrot.slane %v9334_v33, 6  ;;  %v2691_v33 = vld [vmem:[#allocation2 + $0x26] sm:$0xff] }
 0x27d   : > { %v7141_v55 = vpop.f32.mrf.mxu0  ;;  %7575 = vmatpush3.bf16.msra.mxu0 %v9294_v24  ;;  %7498 = vmatprep.mubr.bf16.mxu0 %v8760_v36 }
 0x27e   : > { %v9351_v34 = vpop.f32.mrf.mxu1  ;;  %7551 = vmatmul.mubr.bf16.gmra.mxu1 %v8796_v52  ;;  %7576 = vmatprep.subr.bf16.mxu0 %v8079_v50 }
 0x27f   : > { %7554 = vmatprep.mubr.bf16.mxu1 %v8807_v59  ;;  %7631 = vmatpush3.bf16.msra.mxu1 %v8087_v31  ;;  %v2047_v54 = vpop.f32.mrf.mxu0 }
 0x280   : > { %v9355_v42 = vpop.f32.mrf.mxu1  ;;  %7632 = vmatprep.subr.bf16.mxu1 %v8089_v37 }
 0x281   : > { %v7208_v17 = vpop.f32.mrf.mxu0  ;;  %7577 = vmatpush3.bf16.msra.mxu0 %v8079_v50 }
 0x282   : > { %v9357_v38 = vpop.f32.mrf.mxu1  ;;  %v2721_v60 = vadd.f32 %v7208_v17, %v2689_v6  ;;  %7578 = vmatprep.subr.bf16.mxu0 %v8080_v46  ;;  %v3078_v17 = vsel %vm2370_vm1, %v3076_v35, %v3077_v18 }
 0x283   : > { %7633 = vmatpush3.bf16.msra.mxu1 %v8089_v37  ;;  %v2560_v48 = vpop.f32.mrf.mxu0  ;;  %v3073_v37 = vrot.slane %v9327_v41, 6 }
 0x284   : > { %v9360_v32 = vpop.f32.mrf.mxu1  ;;  %7634 = vmatprep.subr.bf16.mxu1 %v8090_v7  ;;  %2753 = vst [vmem:[#allocation2 + $0x16] sm:$0xff] %v2721_v60  ;;  %v2719_v13 = vadd.f32 %v2687_v1, %v2560_v48  ;;  %v2693_v60 = vld [vmem:[#allocation2 + $0x36] sm:$0xff]  ;;  %7499 = vmatmul.mubr.bf16.gmra.mxu0 %v8776_v25 }
 0x285   : > { %v7209_v24 = vpop.f32.mrf.mxu0  ;;  %7502 = vmatprep.mubr.bf16.mxu0 %v8786_v29  ;;  %7579 = vmatpush3.bf16.msra.mxu0 %v8080_v46  ;;  %v3075_v48 = vsel %vm2370_vm1, %v3073_v37, %v3074_v45  ;;  %v3082_v46 = vrot.slane %v9339_v58, 6  ;;  %v2692_v58 = vld [vmem:[#allocation2 + $0x2e] sm:$0x3] }
 0x286   : > { %v9364_v26 = vpop.f32.mrf.mxu1  ;;  %7555 = vmatmul.mubr.bf16.gmra.mxu1 %v8813_v9  ;;  %2751 = vst [vmem:[#allocation2 + $0x6] sm:$0xff] %v2719_v13  ;;  %v2722_v15 = vadd.f32 %v7209_v24, %v2690_v61  ;;  %7580 = vmatprep.subr.bf16.mxu0 %v8082_v10  ;;  %v8085_v24 = vld [vmem:[#allocation12 + $0xd8] sm:$0xff]  }
 0x287   : > { %7558 = vmatprep.mubr.bf16.mxu1 %v8820_v16  ;;  %7635 = vmatpush3.bf16.msra.mxu1 %v8090_v7  ;;  %v2563_v55 = vpop.f32.mrf.mxu0  ;;  %v2688_v7 = vld [vmem:[#allocation2 + $0xe] sm:$0x3] }
 0x288   : > { %v9370_v31 = vpop.f32.mrf.mxu1  ;;  %7636 = vmatprep.subr.bf16.mxu1 %v8092_v51  ;;  %2754 = vst [vmem:[#allocation2 + $0x1e] sm:$0x3] %v2722_v15  ;;  %v2720_v54 = vadd.f32 %v2688_v7, %v2563_v55  ;;  %v2694_v7 = vld [vmem:[#allocation2 + $0x3e] sm:$0x3] }
 0x289   : > { %v7212_v6 = vpop.f32.mrf.mxu0  ;;  %7581 = vmatpush3.bf16.msra.mxu0 %v8082_v10 }
 0x28a   : > { %v9376_v44 = vpop.f32.mrf.mxu1  ;;  %2752 = vst [vmem:[#allocation2 + $0xe] sm:$0x3] %v2720_v54  ;;  %v2725_v41 = vadd.f32 %v7212_v6, %v2693_v60  ;;  %v3083_v6 = vrot.slane %v9345_v14, 6  ;;  %7582 = vmatprep.subr.bf16.mxu0 %v8085_v24  ;;  %v8088_v14 = vld [vmem:[#allocation12 + $0xd0] sm:$0xff]  }
 0x28b   : > { %7637 = vmatpush3.bf16.msra.mxu1 %v8092_v51  ;;  %v3011_v1 = vld [vmem:[#allocation2 + $0x10] sm:$0xff]  ;;  %v3012_v51 = vld [vmem:[#allocation2 + $0x18] sm:$0x3]  ;;  %v2576_v13 = vpop.f32.mrf.mxu0 }
 0x28c   : > { %v9380_v50 = vpop.f32.mrf.mxu1  ;;  %7718 = vmatprep.subr.bf16.mxu1 %v9372_v27  ;;  %v3155_v61 = vadd.f32 %v3078_v17, %v3011_v1  ;;  %v3156_v15 = vadd.f32 %v3077_v18, %v3012_v51  ;;  %2757 = vst [vmem:[#allocation2 + $0x36] sm:$0xff] %v2725_v41  ;;  %v2723_v55 = vadd.f32 %v2691_v33, %v2576_v13  ;;  %v3079_v17 = vrot.slane %v9343_v11, 6  ;;  %v2697_v13 = vld [vmem:[#allocation2 + $0x56] sm:$0xff] }
 0x28d   : > { %v3009_v54 = vld [vmem:[#allocation2] sm:$0xff]  ;;  %v3010_v37 = vld [vmem:[#allocation2 + $0x8] sm:$0x3]  ;;  %v7213_v60 = vpop.f32.mrf.mxu0  ;;  %v3080_v41 = vrot.slane %v9348_v43, 6  ;;  %7503 = vmatmul.mubr.bf16.gmra.mxu0 %v8796_v52 }
 0x28e   : > { %v9385_v35 = vpop.f32.mrf.mxu1  ;;  %7559 = vmatmul.mubr.bf16.gmra.mxu1 %v8826_v23  ;;  %3187 = vst [vmem:[#allocation2 + $0x10] sm:$0xff] %v3155_v61  ;;  %3188 = vst [vmem:[#allocation2 + $0x18] sm:$0x3] %v3156_v15  ;;  %v3153_v21 = vadd.f32 %v3075_v48, %v3009_v54  ;;  %v3154_v28 = vadd.f32 %v3074_v45, %v3010_v37  ;;  %v2726_v18 = vadd.f32 %v7213_v60, %v2694_v7  ;;  %v2695_v43 = vld [vmem:[#allocation2 + $0x46] sm:$0xff]  ;;  %v2698_v60 = vld [vmem:[#allocation2 + $0x5e] sm:$0x3] }
 0x28f   : > { %7562 = vmatprep.mubr.bf16.mxu1 %v8832_v30  ;;  %2755 = vst [vmem:[#allocation2 + $0x26] sm:$0xff] %v2723_v55  ;;  %v2579_v33 = vpop.f32.mrf.mxu0  ;;  %v3084_v48 = vsel %vm2370_vm1, %v3082_v46, %v3083_v6  ;;  %7506 = vmatprep.mubr.bf16.mxu0 %v8807_v59  ;;  %v3081_v61 = vsel %vm2370_vm1, %v3079_v17, %v3080_v41  ;;  %v8091_v7 = vld [vmem:[#allocation12 + $0xc8] sm:$0xff]  }
 0x290   : > { %v9391_v49 = vpop.f32.mrf.mxu1  ;;  %3185 = vst [vmem:[#allocation2] sm:$0xff] %v3153_v21  ;;  %3186 = vst [vmem:[#allocation2 + $0x8] sm:$0x3] %v3154_v28  ;;  %v2724_v51 = vadd.f32 %v2692_v58, %v2579_v33  ;;  %7583 = vmatpush3.bf16.msra.mxu0 %v8085_v24  ;;  %v3088_v24 = vrot.slane %v9351_v34, 6  ;;  %v3089_v33 = vrot.slane %v9357_v38, 6  ;;  %v8093_v38 = vld [vmem:[#allocation12 + $0xc0] sm:$0xff]  }
 0x291   : > { %2758 = vst [vmem:[#allocation2 + $0x3e] sm:$0x3] %v2726_v18  ;;  %v7216_v45 = vpop.f32.mrf.mxu0  ;;  %7584 = vmatprep.subr.bf16.mxu0 %v8088_v14  ;;  %v2696_v34 = vld [vmem:[#allocation2 + $0x4e] sm:$0x3] }
 0x292   : > { %v9395_v1 = vpop.f32.mrf.mxu1  ;;  %2756 = vst [vmem:[#allocation2 + $0x2e] sm:$0x3] %v2724_v51  ;;  %v2729_v11 = vadd.f32 %v7216_v45, %v2697_v13 }
 0x293   : > { %v3015_v21 = vld [vmem:[#allocation2 + $0x30] sm:$0xff]  ;;  %v3016_v28 = vld [vmem:[#allocation2 + $0x38] sm:$0x3]  ;;  %v2592_v15 = vpop.f32.mrf.mxu0 }
 0x294   : > { %v9399_v10 = vpop.f32.mrf.mxu1  ;;  %v3159_v46 = vadd.f32 %v3084_v48, %v3015_v21  ;;  %v3160_v54 = vadd.f32 %v3083_v6, %v3016_v28  ;;  %2761 = vst [vmem:[#allocation2 + $0x56] sm:$0xff] %v2729_v11  ;;  %v2727_v37 = vadd.f32 %v2695_v43, %v2592_v15  ;;  %7585 = vmatpush3.bf16.msra.mxu0 %v8088_v14  ;;  %v3085_v48 = vrot.slane %v9355_v42, 6  ;;  %v2701_v15 = vld [vmem:[#allocation2 + $0x76] sm:$0xff] }
 0x295   : > { %v7217_v58 = vpop.f32.mrf.mxu0  ;;  %v3086_v11 = vrot.slane %v9360_v32, 6  ;;  %7586 = vmatprep.subr.bf16.mxu0 %v8091_v7  ;;  %7507 = vmatmul.mubr.bf16.gmra.mxu0 %v8813_v9  ;;  %v9420_v32 = vld [vmem:[#allocation12 + $0x178] sm:$0xff]  }
 0x296   : > { %v9403_v55 = vpop.f32.mrf.mxu1  ;;  %7563 = vmatmul.mubr.bf16.gmra.mxu1 %v8679_v56  ;;  %v3013_v18 = vld [vmem:[#allocation2 + $0x20] sm:$0xff]  ;;  %v3014_v17 = vld [vmem:[#allocation2 + $0x28] sm:$0x3]  ;;  %3191 = vst [vmem:[#allocation2 + $0x30] sm:$0xff] %v3159_v46  ;;  %3192 = vst [vmem:[#allocation2 + $0x38] sm:$0x3] %v3160_v54  ;;  %v2730_v6 = vadd.f32 %v7217_v58, %v2698_v60  ;;  %7510 = vmatprep.mubr.bf16.mxu0 %v8820_v16 }
 0x297   : > { %7566 = vmatprep.mubr.bf16.mxu1 %v8683_v57  ;;  %v3157_v45 = vadd.f32 %v3081_v61, %v3013_v18  ;;  %v3158_v13 = vadd.f32 %v3080_v41, %v3014_v17  ;;  %2759 = vst [vmem:[#allocation2 + $0x46] sm:$0xff] %v2727_v37  ;;  %v2595_v43 = vpop.f32.mrf.mxu0  ;;  %v3090_v61 = vsel %vm2370_vm1, %v3088_v24, %v3089_v33  ;;  %v2699_v18 = vld [vmem:[#allocation2 + $0x66] sm:$0xff] }
 0x298   : > { %v9409_v51 = vpop.f32.mrf.mxu1  ;;  %2762 = vst [vmem:[#allocation2 + $0x5e] sm:$0x3] %v2730_v6  ;;  %v2728_v28 = vadd.f32 %v2696_v34, %v2595_v43  ;;  %7587 = vmatpush3.bf16.msra.mxu0 %v8091_v7  ;;  %v3087_v46 = vsel %vm2370_vm1, %v3085_v48, %v3086_v11  ;;  %v3094_v7 = vrot.slane %v9364_v26, 6  ;;  %v3095_v43 = vrot.slane %v9376_v44, 6  ;;  %v2700_v26 = vld [vmem:[#allocation2 + $0x6e] sm:$0x3] }
 0x299   : > { %3189 = vst [vmem:[#allocation2 + $0x20] sm:$0xff] %v3157_v45  ;;  %3190 = vst [vmem:[#allocation2 + $0x28] sm:$0x3] %v3158_v13  ;;  %v7220_v41 = vpop.f32.mrf.mxu0  ;;  %7588 = vmatprep.subr.bf16.mxu0 %v8093_v38  ;;  %v2702_v13 = vld [vmem:[#allocation2 + $0x7e] sm:$0x3] }
 0x29a   : > { %v9413_v21 = vpop.f32.mrf.mxu1  ;;  %2760 = vst [vmem:[#allocation2 + $0x4e] sm:$0x3] %v2728_v28  ;;  %v2733_v42 = vadd.f32 %v7220_v41, %v2701_v15 }
 0x29b   : > { %v3019_v54 = vld [vmem:[#allocation2 + $0x50] sm:$0xff]  ;;  %v3020_v37 = vld [vmem:[#allocation2 + $0x58] sm:$0x3]  ;;  %v2608_v60 = vpop.f32.mrf.mxu0 }
 0x29c   : > { %v9417_v14 = vpop.f32.mrf.mxu1  ;;  %v3163_v17 = vadd.f32 %v3090_v61, %v3019_v54  ;;  %v3164_v58 = vadd.f32 %v3089_v33, %v3020_v37  ;;  %2765 = vst [vmem:[#allocation2 + $0x76] sm:$0xff] %v2733_v42  ;;  %v2731_v45 = vadd.f32 %v2699_v18, %v2608_v60  ;;  %7589 = vmatpush3.bf16.msra.mxu0 %v8093_v38  ;;  %v3091_v61 = vrot.slane %v9370_v31, 6  ;;  %v2705_v60 = vld [vmem:[#allocation2 + $0x96] sm:$0xff] }
 0x29d   : > { %v7221_v34 = vpop.f32.mrf.mxu0  ;;  %v3092_v42 = vrot.slane %v9380_v50, 6  ;;  %7670 = vmatprep.subr.bf16.mxu0 %v9420_v32  ;;  %7511 = vmatmul.mubr.bf16.gmra.mxu0 %v8826_v23 }
 0x29e   : > { %v9423_v24 = vpop.f32.mrf.mxu1  ;;  %7567 = vmatmul.mubr.bf16.gmra.mxu1 %v8697_v62  ;;  %v3017_v6 = vld [vmem:[#allocation2 + $0x40] sm:$0xff]  ;;  %v3018_v48 = vld [vmem:[#allocation2 + $0x48] sm:$0x3]  ;;  %3195 = vst [vmem:[#allocation2 + $0x50] sm:$0xff] %v3163_v17  ;;  %3196 = vst [vmem:[#allocation2 + $0x58] sm:$0x3] %v3164_v58  ;;  %v2734_v33 = vadd.f32 %v7221_v34, %v2702_v13  ;;  %7514 = vmatprep.mubr.bf16.mxu0 %v8832_v30 }
 0x29f   : > { %7570 = vmatprep.mubr.bf16.mxu1 %v8706_v3  ;;  %v3161_v41 = vadd.f32 %v3087_v46, %v3017_v6  ;;  %v3162_v15 = vadd.f32 %v3086_v11, %v3018_v48  ;;  %2763 = vst [vmem:[#allocation2 + $0x66] sm:$0xff] %v2731_v45  ;;  %v2611_v54 = vpop.f32.mrf.mxu0  ;;  %v3096_v46 = vsel %vm2370_vm1, %v3094_v7, %v3095_v43  ;;  %v2703_v45 = vld [vmem:[#allocation2 + $0x86] sm:$0xff]  ;;  %v2706_v34 = vld [vmem:[#allocation2 + $0x9e] sm:$0x3] }
 0x2a0   : > { %v9429_v28 = vpop.f32.mrf.mxu1  ;;  %2766 = vst [vmem:[#allocation2 + $0x7e] sm:$0x3] %v2734_v33  ;;  %v2732_v44 = vadd.f32 %v2700_v26, %v2611_v54  ;;  %v3093_v50 = vsel %vm2370_vm1, %v3091_v61, %v3092_v42  ;;  %v3101_v61 = vrot.slane %v9395_v1, 6 }
 0x2a1   : > { %3193 = vst [vmem:[#allocation2 + $0x40] sm:$0xff] %v3161_v41  ;;  %3194 = vst [vmem:[#allocation2 + $0x48] sm:$0x3] %v3162_v15  ;;  %v7224_v11 = vpop.f32.mrf.mxu0  ;;  %v3100_v41 = vrot.slane %v9385_v35, 6 }
 0x2a2   : > { %v9433_v37 = vpop.f32.mrf.mxu1  ;;  %2764 = vst [vmem:[#allocation2 + $0x6e] sm:$0x3] %v2732_v44  ;;  %v2737_v31 = vadd.f32 %v7224_v11, %v2705_v60  ;;  %v3098_v60 = vrot.slane %v9399_v10, 6  ;;  %v8099_v10 = vld [vmem:[#allocation12 + $0x1b0] sm:$0xff]  }
 0x2a3   : > { %v3023_v18 = vld [vmem:[#allocation2 + $0x70] sm:$0xff]  ;;  %v3024_v17 = vld [vmem:[#allocation2 + $0x78] sm:$0x3]  ;;  %v2624_v58 = vpop.f32.mrf.mxu0 }
 0x2a4   : > { %v9438_v38 = vpop.f32.mrf.mxu1  ;;  %v3167_v7 = vadd.f32 %v3096_v46, %v3023_v18  ;;  %v3168_v6 = vadd.f32 %v3095_v43, %v3024_v17  ;;  %2769 = vst [vmem:[#allocation2 + $0x96] sm:$0xff] %v2737_v31  ;;  %v2735_v48 = vadd.f32 %v2703_v45, %v2624_v58  ;;  %v3097_v46 = vrot.slane %v9391_v49, 6  ;;  %v2704_v18 = vld [vmem:[#allocation2 + $0x8e] sm:$0x3]  ;;  %v2709_v45 = vld [vmem:[#allocation2 + $0xb6] sm:$0xff] }
 0x2a5   : > { %v7225_v54 = vpop.f32.mrf.mxu0  ;;  %v3102_v17 = vsel %vm2370_vm1, %v3100_v41, %v3101_v61  ;;  %7515 = vmatmul.mubr.bf16.gmra.mxu0 %v8679_v56 }
 0x2a6   : > { %v9442_v13 = vpop.f32.mrf.mxu1  ;;  %7571 = vmatmul.mubr.bf16.gmra.mxu1 %v8710_v4  ;;  %v3021_v15 = vld [vmem:[#allocation2 + $0x60] sm:$0xff]  ;;  %v3022_v33 = vld [vmem:[#allocation2 + $0x68] sm:$0x3]  ;;  %3199 = vst [vmem:[#allocation2 + $0x70] sm:$0xff] %v3167_v7  ;;  %3200 = vst [vmem:[#allocation2 + $0x78] sm:$0x3] %v3168_v6  ;;  %v2738_v43 = vadd.f32 %v7225_v54, %v2706_v34  ;;  %7518 = vmatprep.mubr.bf16.mxu0 %v8683_v57 }
 0x2a7   : > { %7638 = vmatprep.mubr.bf16.mxu1 %v8701_v63  ;;  %v3165_v44 = vadd.f32 %v3093_v50, %v3021_v15  ;;  %v3166_v11 = vadd.f32 %v3092_v42, %v3022_v33  ;;  %2767 = vst [vmem:[#allocation2 + $0x86] sm:$0xff] %v2735_v48  ;;  %v2627_v31 = vpop.f32.mrf.mxu0  ;;  %v3099_v50 = vsel %vm2370_vm1, %v3097_v46, %v3098_v60  ;;  %v2707_v34 = vld [vmem:[#allocation2 + $0xa6] sm:$0xff]  ;;  %v3107_v46 = vrot.slane %v9413_v21, 6 }
 0x2a8   : > { %v9448_v26 = vpop.f32.mrf.mxu1  ;;  %2770 = vst [vmem:[#allocation2 + $0x9e] sm:$0x3] %v2738_v43  ;;  %v2736_v1 = vadd.f32 %v2704_v18, %v2627_v31  ;;  %v3104_v21 = vrot.slane %v9417_v14, 6  ;;  %v2711_v14 = vld [vmem:[#allocation2 + $0xc6] sm:$0xff] }
 0x2a9   : > { %3197 = vst [vmem:[#allocation2 + $0x60] sm:$0xff] %v3165_v44  ;;  %3198 = vst [vmem:[#allocation2 + $0x68] sm:$0x3] %v3166_v11  ;;  %v7228_v58 = vpop.f32.mrf.mxu0  ;;  %v2710_v44 = vld [vmem:[#allocation2 + $0xbe] sm:$0x3]  ;;  %v3106_v11 = vrot.slane %v9403_v55, 6 }
 0x2aa   : > { %v9452_v35 = vpop.f32.mrf.mxu1  ;;  %2768 = vst [vmem:[#allocation2 + $0x8e] sm:$0x3] %v2736_v1  ;;  %v2741_v49 = vadd.f32 %v7228_v58, %v2709_v45  ;;  %v8100_v45 = vld [vmem:[#allocation12 + $0x1a8] sm:$0xff]  }
 0x2ab   : > { %v3027_v7 = vld [vmem:[#allocation2 + $0x90] sm:$0xff]  ;;  %v3028_v6 = vld [vmem:[#allocation2 + $0x98] sm:$0x3]  ;;  %v2640_v48 = vpop.f32.mrf.mxu0  ;;  %v2708_v55 = vld [vmem:[#allocation2 + $0xae] sm:$0x3] }
 0x2ac   : > { %v9456_v42 = vpop.f32.mrf.mxu1  ;;  %v3171_v41 = vadd.f32 %v3102_v17, %v3027_v7  ;;  %v3172_v33 = vadd.f32 %v3101_v61, %v3028_v6  ;;  %2773 = vst [vmem:[#allocation2 + $0xb6] sm:$0xff] %v2741_v49  ;;  %v2739_v54 = vadd.f32 %v2707_v34, %v2640_v48  ;;  %v3103_v6 = vrot.slane %v9409_v51, 6  ;;  %v2713_v48 = vld [vmem:[#allocation2 + $0xd6] sm:$0xff]  ;;  %v8102_v51 = vld [vmem:[#allocation12 + $0x1a0] sm:$0xff]  }
 0x2ad   : > { %v7229_v18 = vpop.f32.mrf.mxu0  ;;  %7519 = vmatmul.mubr.bf16.gmra.mxu0 %v8697_v62 }
 0x2ae   : > { %v7352_v15 = vpop.f32.mrf.mxu1  ;;  %7639 = vmatmul.mubr.bf16.vlgmr.msra.gmra.mxu1 %v8735_v20  ;;  %v3025_v43 = vld [vmem:[#allocation2 + $0x80] sm:$0xff]  ;;  %v3026_v31 = vld [vmem:[#allocation2 + $0x88] sm:$0x3]  ;;  %3203 = vst [vmem:[#allocation2 + $0x90] sm:$0xff] %v3171_v41  ;;  %3204 = vst [vmem:[#allocation2 + $0x98] sm:$0x3] %v3172_v33  ;;  %v2742_v58 = vadd.f32 %v7229_v18, %v2710_v44  ;;  %7522 = vmatprep.mubr.bf16.mxu0 %v8706_v3 }
 0x2af   : > { %7642 = vmatprep.mubr.bf16.mxu1 %v8760_v36  ;;  %7719 = vmatpush3.bf16.msra.mxu1 %v9372_v27  ;;  %v3169_v17 = vadd.f32 %v3099_v50, %v3025_v43  ;;  %v3170_v61 = vadd.f32 %v3098_v60, %v3026_v31  ;;  %2771 = vst [vmem:[#allocation2 + $0xa6] sm:$0xff] %v2739_v54  ;;  %v2643_v49 = vpop.f32.mrf.mxu0  ;;  %v2714_v31 = vld [vmem:[#allocation2 + $0xde] sm:$0x3] }
 0x2b0   : > { %v3590_v1 = vpop.f32.mrf.mxu1  ;;  %7720 = vmatprep.subr.bf16.mxu1 %v8099_v10  ;;  %2774 = vst [vmem:[#allocation2 + $0xbe] sm:$0x3] %v2742_v58  ;;  %v2740_v27 = vadd.f32 %v2708_v55, %v2643_v49  ;;  %v3108_v50 = vsel %vm2370_vm1, %v3106_v11, %v3107_v46  ;;  %v3105_v11 = vsel %vm2370_vm1, %v3103_v6, %v3104_v21  ;;  %v601_v49 = vld [vmem:[%s9478_s12 + $0x10] sm:$0xff]  ;;  %v8103_v6 = vld [vmem:[#allocation12 + $0x198] sm:$0xff]  }
 0x2b1   : > { %3201 = vst [vmem:[#allocation2 + $0x80] sm:$0xff] %v3169_v17  ;;  %3202 = vst [vmem:[#allocation2 + $0x88] sm:$0x3] %v3170_v61  ;;  %v7232_v60 = vpop.f32.mrf.mxu0  ;;  %v3112_v1 = vrot.slane %v9423_v24, 6  ;;  %644 = vperm.xlu1 %7941, %v601_v49   ;;  %v3109_v24 = vrot.slane %v9429_v28, 6 }
 0x2b2   : > { %v7353_v7 = vpop.f32.mrf.mxu1  ;;  %2772 = vst [vmem:[#allocation2 + $0xae] sm:$0x3] %v2740_v27  ;;  %v2745_v15 = vadd.f32 %v7232_v60, %v2713_v48  ;;  %v599_v27 = vld [vmem:[%s9478_s12] sm:$0xff]  ;;  %v3110_v60 = vrot.slane %v9438_v38, 6  ;;  %v2712_v48 = vld [vmem:[#allocation2 + $0xce] sm:$0x3] }
 0x2b3   : > { %7721 = vmatpush3.bf16.msra.mxu1 %v8099_v10  ;;  %v3032_v41 = vld [vmem:[#allocation2 + $0xb8] sm:$0x3]  ;;  %v2656_v33 = vpop.f32.mrf.mxu0  ;;  %v3031_v44 = vld [vmem:[#allocation2 + $0xb0] sm:$0xff]  ;;  %634 = vperm.xlu0 %7940, %v599_v27   ;;  %v3119_v27 = vrot.slane %v9452_v35, 6  ;;  %v3116_v35 = vrot.slane %v9456_v42, 6 }
 0x2b4   : > { %v3592_v34 = vpop.f32.mrf.mxu1  ;;  %7722 = vmatprep.subr.bf16.mxu1 %v8100_v45  ;;  %v3176_v43 = vadd.f32 %v3107_v46, %v3032_v41  ;;  %2777 = vst [vmem:[#allocation2 + $0xd6] sm:$0xff] %v2745_v15  ;;  %v2743_v10 = vadd.f32 %v2711_v14, %v2656_v33  ;;  %v3175_v18 = vadd.f32 %v3108_v50, %v3031_v44  ;;  %4227 = vst [vmem:[#allocation2 + $0xb0] sm:$0xff] %v9132_v47  ;;  %v2717_v33 = vld [vmem:[#allocation2 + $0xf6] sm:$0xff]  ;;  %v600_v14 = vld [vmem:[%s9478_s12 + $0x8] sm:$0xff] }
 0x2b5   : > { %v3113_v46 = vrot.slane %v9433_v37, 6  ;;  %v7233_v61 = vpop.f32.mrf.mxu0  ;;  %7523 = vmatmul.mubr.bf16.gmra.mxu0 %v8710_v4  ;;  %v602_v38 = vld [vmem:[%s9478_s12 + $0x18] sm:$0xff] }
 0x2b6   : > { %v7356_v54 = vpop.f32.mrf.mxu1  ;;  %7643 = vmatmul.mubr.bf16.gmra.mxu1 %v8776_v25  ;;  %v3030_v17 = vld [vmem:[#allocation2 + $0xa8] sm:$0x3]  ;;  %3208 = vst [vmem:[#allocation2 + $0xb8] sm:$0x3] %v3176_v43  ;;  %2775 = vst [vmem:[#allocation2 + $0xc6] sm:$0xff] %v2743_v10  ;;  %v2746_v7 = vadd.f32 %v7233_v61, %v2714_v31  ;;  %v4163_v50 = vmax.f32 %v3175_v18, 0.0  ;;  %7590 = vmatprep.mubr.bf16.mxu0 %v8701_v63 }
 0x2b7   : > { %7646 = vmatprep.mubr.bf16.mxu1 %v8786_v29  ;;  %7723 = vmatpush3.bf16.msra.mxu1 %v8100_v45  ;;  %v3174_v55 = vadd.f32 %v3104_v21, %v3030_v17  ;;  %v3029_v47 = vld [vmem:[#allocation2 + $0xa0] sm:$0xff]  ;;  %v2659_v37 = vpop.f32.mrf.mxu0  ;;  %v3114_v15 = vsel %vm2370_vm1, %v3112_v1, %v3113_v46  ;;  %v2718_v61 = vld [vmem:[#allocation2 + $0xfe] sm:$0x3] }
 0x2b8   : > { %v3602_v58 = vpop.f32.mrf.mxu1  ;;  %7724 = vmatprep.subr.bf16.mxu1 %v8102_v51  ;;  %v3173_v21 = vadd.f32 %v3105_v11, %v3029_v47  ;;  %4225 = vst [vmem:[#allocation2 + $0xa0] sm:$0xff] %v9122_v5  ;;  %2778 = vst [vmem:[#allocation2 + $0xde] sm:$0x3] %v2746_v7  ;;  %v2744_v34 = vadd.f32 %v2712_v48, %v2659_v37  ;;  %v8105_v5 = vld [vmem:[#allocation12 + $0x190] sm:$0xff]   ;;  %v3111_v11 = vsel %vm2370_vm1, %v3109_v24, %v3110_v60  ;;  %v2715_v31 = vld [vmem:[#allocation2 + $0xe6] sm:$0xff] }
 0x2b9   : > { %3206 = vst [vmem:[#allocation2 + $0xa8] sm:$0x3] %v3174_v55  ;;  %4195 = vst [vmem:[%s8897_s19 + $0x438] sm:$0xff] %v4163_v50  ;;  %v7236_v41 = vpop.f32.mrf.mxu0  ;;  %649 = vperm.xlu1 %7941, %v602_v38   ;;  %639 = vperm.xlu0 %7940, %v600_v14   ;;  %v3118_v55 = vrot.slane %v9442_v13, 6  ;;  %v604_v24 = vld [vmem:[%s9478_s12 + $0x28] sm:$0xff] }
 0x2ba   : > { %v7357_v45 = vpop.f32.mrf.mxu1  ;;  %v4161_v54 = vmax.f32 %v3173_v21, 0.0  ;;  %2776 = vst [vmem:[#allocation2 + $0xce] sm:$0x3] %v2744_v34  ;;  %v2749_v44 = vadd.f32 %v7236_v41, %v2717_v33  ;;  %v2716_v41 = vld [vmem:[#allocation2 + $0xee] sm:$0x3]  ;;  %v8095_v33 = vld [vmem:[#allocation12 + $0x170] sm:$0xff]  }
 0x2bb   : > { %7725 = vmatpush3.bf16.msra.mxu1 %v8102_v51  ;;  %v3036_v43 = vld [vmem:[#allocation2 + $0xd8] sm:$0x3]  ;;  %v2672_v10 = vpop.f32.mrf.mxu0  ;;  %v3035_v51 = vld [vmem:[#allocation2 + $0xd0] sm:$0xff]  ;;  %v603_v45 = vld [vmem:[%s9478_s12 + $0x20] sm:$0xff] }
 0x2bc   : > { %v3604_v28 = vpop.f32.mrf.mxu1  ;;  %7726 = vmatprep.subr.bf16.mxu1 %v8103_v6  ;;  %4193 = vst [vmem:[%s8897_s19 + $0x3d8] sm:$0xff] %v4161_v54  ;;  %v3180_v1 = vadd.f32 %v3113_v46, %v3036_v43  ;;  %2781 = vst [vmem:[#allocation2 + $0xf6] sm:$0xff] %v2749_v44  ;;  %v2747_v17 = vadd.f32 %v2715_v31, %v2672_v10  ;;  %v3179_v58 = vadd.f32 %v3114_v15, %v3035_v51  ;;  %v8106_v14 = vld [vmem:[#allocation12 + $0x188] sm:$0xff]  }
 0x2bd   : > { %v4132_v49 = vld [vmem:[#allocation2 + $0xb8] sm:$0xff]  ;;  %v3034_v7 = vld [vmem:[#allocation2 + $0xc8] sm:$0x3]  ;;  %v7237_v50 = vpop.f32.mrf.mxu0  ;;  %v3033_v34 = vld [vmem:[#allocation2 + $0xc0] sm:$0xff]  ;;  %v3115_v15 = vrot.slane %v9448_v26, 6  ;;  %659 = vperm.xlu1 %7941, %v604_v24   ;;  %654 = vperm.xlu0 %7940, %v603_v45   ;;  %v3120_v26 = vsel %vm2370_vm1, %v3118_v55, %v3119_v27 }
 0x2be   : > { %v7360_v18 = vpop.f32.mrf.mxu1  ;;  %7647 = vmatmul.mubr.bf16.gmra.mxu1 %v8796_v52  ;;  %v4164_v37 = vmax.f32 %v4132_v49, 0.0  ;;  %4228 = vst [vmem:[#allocation2 + $0xb8] sm:$0xff] %v9141_v8  ;;  %3212 = vst [vmem:[#allocation2 + $0xd8] sm:$0x3] %v3180_v1  ;;  %v3178_v46 = vadd.f32 %v3110_v60, %v3034_v7  ;;  %v2750_v48 = vadd.f32 %v7237_v50, %v2718_v61  ;;  %v4167_v21 = vmax.f32 %v3179_v58, 0.0  ;;  %v8098_v45 = vld [vmem:[#allocation12 + $0x160] sm:$0xff]  }
 0x2bf   : > { %7650 = vmatprep.mubr.bf16.mxu1 %v8807_v59  ;;  %7727 = vmatpush3.bf16.msra.mxu1 %v8103_v6  ;;  %2779 = vst [vmem:[#allocation2 + $0xe6] sm:$0xff] %v2747_v17  ;;  %v2675_v6 = vpop.f32.mrf.mxu0  ;;  %v3177_v8 = vadd.f32 %v3111_v11, %v3033_v34  ;;  %v606_v11 = vld [vmem:[%s9478_s12 + $0x38] sm:$0xff]  ;;  %v3117_v43 = vsel %vm2370_vm1, %v3115_v15, %v3116_v35 }
 0x2c0   : > { %v3614_v47 = vpop.f32.mrf.mxu1  ;;  %7728 = vmatprep.subr.bf16.mxu1 %v8105_v5  ;;  %v4130_v13 = vld [vmem:[#allocation2 + $0xa8] sm:$0xff]  ;;  %4196 = vst [vmem:[%s8897_s19 + $0x468] sm:$0xff] %v4164_v37  ;;  %3210 = vst [vmem:[#allocation2 + $0xc8] sm:$0x3] %v3178_v46  ;;  %v2748_v38 = vadd.f32 %v2716_v41, %v2675_v6  ;;  %7591 = vmatmul.mubr.bf16.vlgmr.msra.gmra.mxu0 %v8735_v20  ;;  %v607_v6 = vld [vmem:[%s9478_s12 + $0x40] sm:$0xff] }
 0x2c1   : > { %v4162_v60 = vmax.f32 %v4130_v13, 0.0  ;;  %4226 = vst [vmem:[#allocation2 + $0xa8] sm:$0xff] %v9129_v40  ;;  %2782 = vst [vmem:[#allocation2 + $0xfe] sm:$0x3] %v2750_v48  ;;  %v7304_v42 = vpop.f32.mrf.mxu0  ;;  %v4165_v44 = vmax.f32 %v3177_v8, 0.0  ;;  %7671 = vmatpush3.bf16.msra.mxu0 %v9420_v32  ;;  %7594 = vmatprep.mubr.bf16.mxu0 %v8760_v36  ;;  %v8108_v40 = vld [vmem:[#allocation12 + $0x180] sm:$0xff]  }
 0x2c2   : > { %v7361_v28 = vpop.f32.mrf.mxu1  ;;  %4199 = vst [vmem:[%s8897_s19 + $0x4f8] sm:$0xff] %v4167_v21  ;;  %2780 = vst [vmem:[#allocation2 + $0xee] sm:$0x3] %v2748_v38  ;;  %7672 = vmatprep.subr.bf16.mxu0 %v8095_v33  ;;  %v605_v32 = vld [vmem:[%s9478_s12 + $0x30] sm:$0xff]  ;;  %669 = vperm.xlu1 %7941, %v606_v11   ;;  %v9528_v21 = vld [vmem:[#allocation12 + $0x1f8] sm:$0xff]  }
 0x2c3   : > { %7729 = vmatpush3.bf16.msra.mxu1 %v8105_v5  ;;  %4194 = vst [vmem:[%s8897_s19 + $0x408] sm:$0xff] %v4162_v60  ;;  %v3040_v10 = vld [vmem:[#allocation2 + $0xf8] sm:$0x3]  ;;  %v3316_v31 = vpop.f32.mrf.mxu0  ;;  %v8096_v5 = vld [vmem:[#allocation12 + $0x168] sm:$0xff]   ;;  %4197 = vst [vmem:[%s8897_s19 + $0x498] sm:$0xff] %v4165_v44  ;;  %664 = vperm.xlu0 %7940, %v605_v32  }
 0x2c4   : > { %v3616_v54 = vpop.f32.mrf.mxu1  ;;  %v3039_v51 = vld [vmem:[#allocation2 + $0xf0] sm:$0xff]  ;;  %v3184_v1 = vadd.f32 %v3119_v27, %v3040_v10  ;;  %7730 = vmatprep.subr.bf16.mxu1 %v8106_v14  ;;  %v612_v10 = vld [vmem:[%s9478_s12 + $0x68] sm:$0xff]  ;;  %v611_v32 = vld [vmem:[%s9478_s12 + $0x60] sm:$0xff] }
 0x2c5   : > { %v3183_v17 = vadd.f32 %v3120_v26, %v3039_v51  ;;  %v4136_v61 = vld [vmem:[#allocation2 + $0xd8] sm:$0xff]  ;;  %v7305_v49 = vpop.f32.mrf.mxu0  ;;  %7673 = vmatpush3.bf16.msra.mxu0 %v8095_v33 }
 0x2c6   : > { %v9515_v18 = vpop.f32.mrf.mxu1  ;;  %7651 = vmatmul.mubr.bf16.gmra.mxu1 %v8813_v9  ;;  %v3038_v58 = vld [vmem:[#allocation2 + $0xe8] sm:$0x3]  ;;  %v3037_v7 = vld [vmem:[#allocation2 + $0xe0] sm:$0xff]  ;;  %v4168_v50 = vmax.f32 %v4136_v61, 0.0  ;;  %4232 = vst [vmem:[#allocation2 + $0xd8] sm:$0xff] %v9165_v53  ;;  %7674 = vmatprep.subr.bf16.mxu0 %v8096_v5  ;;  %v8104_v44 = vld [vmem:[#allocation12 + $0x150] sm:$0xff]  }
 0x2c7   : > { %7654 = vmatprep.mubr.bf16.mxu1 %v8820_v16  ;;  %7731 = vmatpush3.bf16.msra.mxu1 %v8106_v14  ;;  %3216 = vst [vmem:[#allocation2 + $0xf8] sm:$0x3] %v3184_v1  ;;  %v3182_v47 = vadd.f32 %v3116_v35, %v3038_v58  ;;  %v4171_v27 = vmax.f32 %v3183_v17, 0.0  ;;  %v3181_v24 = vadd.f32 %v3117_v43, %v3037_v7  ;;  %v4134_v37 = vld [vmem:[#allocation2 + $0xc8] sm:$0xff]  ;;  %v3318_v46 = vpop.f32.mrf.mxu0  ;;  %v8101_v33 = vld [vmem:[#allocation12 + $0x158] sm:$0xff]  }
 0x2c8   : > { %v9521_v55 = vpop.f32.mrf.mxu1  ;;  %7732 = vmatprep.subr.bf16.mxu1 %v8108_v40  ;;  %4200 = vst [vmem:[%s8897_s19 + $0x528] sm:$0xff] %v4168_v50  ;;  %v4166_v53 = vmax.f32 %v4134_v37, 0.0  ;;  %4230 = vst [vmem:[#allocation2 + $0xc8] sm:$0xff] %v9152_v12  ;;  %7595 = vmatmul.mubr.bf16.gmra.mxu0 %v8776_v25  ;;  %v608_v35 = vld [vmem:[%s9478_s12 + $0x48] sm:$0xff]  ;;  %v610_v14 = vld [vmem:[%s9478_s12 + $0x58] sm:$0xff] }
 0x2c9   : > { %3214 = vst [vmem:[#allocation2 + $0xe8] sm:$0x3] %v3182_v47  ;;  %4203 = vst [vmem:[%s8897_s19 + $0x5b8] sm:$0xff] %v4171_v27  ;;  %v4169_v34 = vmax.f32 %v3181_v24, 0.0  ;;  %v7308_v13 = vpop.f32.mrf.mxu0  ;;  %7598 = vmatprep.mubr.bf16.mxu0 %v8786_v29  ;;  %7675 = vmatpush3.bf16.msra.mxu0 %v8096_v5  ;;  %v614_v17 = vld [vmem:[%s9478_s12 + $0x78] sm:$0xff]  ;;  %v8109_v49 = vld [vmem:[#allocation12 + $0x140] sm:$0xff]  }
 0x2ca   : > { %v9524_v48 = vpop.f32.mrf.mxu1  ;;  %4198 = vst [vmem:[%s8897_s19 + $0x4c8] sm:$0xff] %v4166_v53  ;;  %7676 = vmatprep.subr.bf16.mxu0 %v8098_v45  ;;  %679 = vperm.xlu1 %7941, %v608_v35   ;;  %v3433_v50 = vld [vmem:[#allocation2 + $0x16] sm:$0xff]  ;;  %v616_v37 = vld [vmem:[%s9478_s12 + $0x88] sm:$0xff]  ;;  %v3434_v35 = vld [vmem:[#allocation2 + $0x1e] sm:$0x3] }
 0x2cb   : > { %7733 = vmatpush3.bf16.msra.mxu1 %v8108_v40  ;;  %4201 = vst [vmem:[%s8897_s19 + $0x558] sm:$0xff] %v4169_v34  ;;  %v3328_v12 = vpop.f32.mrf.mxu0  ;;  %674 = vperm.xlu0 %7940, %v607_v6   ;;  %v613_v27 = vld [vmem:[%s9478_s12 + $0x70] sm:$0xff] }
 0x2cc   : > { %v9532_v15 = vpop.f32.mrf.mxu1  ;;  %7814 = vmatprep.subr.bf16.mxu1 %v9528_v21  ;;  %v615_v12 = vld [vmem:[%s9478_s12 + $0x80] sm:$0xff] }
 0x2cd   : > { %v7309_v8 = vpop.f32.mrf.mxu0  ;;  %7677 = vmatpush3.bf16.msra.mxu0 %v8098_v45  ;;  %v3431_v45 = vld [vmem:[#allocation2 + $0x6] sm:$0xff] }
 0x2ce   : > { %v9539_v41 = vpop.f32.mrf.mxu1  ;;  %7655 = vmatmul.mubr.bf16.gmra.mxu1 %v8826_v23  ;;  %v4140_v28 = vld [vmem:[#allocation2 + $0xf8] sm:$0xff]  ;;  %7678 = vmatprep.subr.bf16.mxu0 %v8101_v33 }
 0x2cf   : > { %7658 = vmatprep.mubr.bf16.mxu1 %v8832_v30  ;;  %v4172_v38 = vmax.f32 %v4140_v28, 0.0  ;;  %4236 = vst [vmem:[#allocation2 + $0xf8] sm:$0xff] %v9203_v19  ;;  %v3330_v42 = vpop.f32.mrf.mxu0  ;;  %689 = vperm.xlu1 %7941, %v610_v14   ;;  %v609_v19 = vld [vmem:[%s9478_s12 + $0x50] sm:$0xff]  ;;  %v618_v28 = vld [vmem:[%s9478_s12 + $0x98] sm:$0xff] }
 0x2d0   : > { %v9544_v60 = vpop.f32.mrf.mxu1  ;;  %v4138_v26 = vld [vmem:[#allocation2 + $0xe8] sm:$0xff]  ;;  %7599 = vmatmul.mubr.bf16.gmra.mxu0 %v8796_v52  ;;  %684 = vperm.xlu0 %7940, %v609_v19  }
 0x2d1   : > { %4204 = vst [vmem:[%s8897_s19 + $0x5e8] sm:$0xff] %v4172_v38  ;;  %v4170_v40 = vmax.f32 %v4138_v26, 0.0  ;;  %4234 = vst [vmem:[#allocation2 + $0xe8] sm:$0xff] %v9183_v39  ;;  %v7312_v11 = vpop.f32.mrf.mxu0  ;;  %7602 = vmatprep.mubr.bf16.mxu0 %v8807_v59  ;;  %7679 = vmatpush3.bf16.msra.mxu0 %v8101_v33  ;;  %v8107_v39 = vld [vmem:[#allocation12 + $0x148] sm:$0xff]  }
 0x2d2   : > { %v9548_v54 = vpop.f32.mrf.mxu1  ;;  %7680 = vmatprep.subr.bf16.mxu0 %v8104_v44  ;;  %v3432_v38 = vld [vmem:[#allocation2 + $0xe] sm:$0x3]  ;;  %v617_v11 = vld [vmem:[%s9478_s12 + $0x90] sm:$0xff] }
 0x2d3   : > { %4202 = vst [vmem:[%s8897_s19 + $0x588] sm:$0xff] %v4170_v40  ;;  %v3340_v31 = vpop.f32.mrf.mxu0  ;;  %699 = vperm.xlu1 %7941, %v612_v10   ;;  %v620_v10 = vld [vmem:[%s9478_s12 + $0xa8] sm:$0xff] }
 0x2d4   : > { %v9553_v43 = vpop.f32.mrf.mxu1  ;;  %694 = vperm.xlu0 %7940, %v611_v32  }
 0x2d5   : > { %v7313_v51 = vpop.f32.mrf.mxu0  ;;  %7681 = vmatpush3.bf16.msra.mxu0 %v8104_v44  ;;  %v3437_v44 = vld [vmem:[#allocation2 + $0x36] sm:$0xff] }
 0x2d6   : > { %v9559_v5 = vpop.f32.mrf.mxu1  ;;  %7659 = vmatmul.mubr.bf16.gmra.mxu1 %v8679_v56  ;;  %7682 = vmatprep.subr.bf16.mxu0 %v8107_v39 }
 0x2d7   : > { %7662 = vmatprep.mubr.bf16.mxu1 %v8683_v57  ;;  %v3342_v61 = vpop.f32.mrf.mxu0  ;;  %709 = vperm.xlu1 %7941, %v614_v17  }
 0x2d8   : > { %v9563_v1 = vpop.f32.mrf.mxu1  ;;  %7603 = vmatmul.mubr.bf16.gmra.mxu0 %v8813_v9  ;;  %704 = vperm.xlu0 %7940, %v613_v27   ;;  %v619_v27 = vld [vmem:[%s9478_s12 + $0xa0] sm:$0xff] }
 0x2d9   : > { %v7316_v7 = vpop.f32.mrf.mxu0  ;;  %7606 = vmatprep.mubr.bf16.mxu0 %v8820_v16  ;;  %7683 = vmatpush3.bf16.msra.mxu0 %v8107_v39  ;;  %v3435_v39 = vld [vmem:[#allocation2 + $0x26] sm:$0xff] }
 0x2da   : > { %v9567_v58 = vpop.f32.mrf.mxu1  ;;  %v3453_v24 = vadd.f32 %v7316_v7, %v3433_v50  ;;  %7684 = vmatprep.subr.bf16.mxu0 %v8109_v49 }
 0x2db   : > { %v3352_v46 = vpop.f32.mrf.mxu0  ;;  %719 = vperm.xlu1 %7941, %v616_v37   ;;  %v622_v37 = vld [vmem:[%s9478_s12 + $0xb8] sm:$0xff] }
 0x2dc   : > { %v9570_v47 = vpop.f32.mrf.mxu1  ;;  %3473 = vst [vmem:[#allocation2 + $0x16] sm:$0xff] %v3453_v24  ;;  %v3451_v34 = vadd.f32 %v3431_v45, %v3352_v46  ;;  %714 = vperm.xlu0 %7940, %v615_v12   ;;  %v3436_v45 = vld [vmem:[#allocation2 + $0x2e] sm:$0x3] }
 0x2dd   : > { %v7317_v13 = vpop.f32.mrf.mxu0  ;;  %7685 = vmatpush3.bf16.msra.mxu0 %v8109_v49  ;;  %v3438_v49 = vld [vmem:[#allocation2 + $0x3e] sm:$0x3] }
 0x2de   : > { %v9575_v53 = vpop.f32.mrf.mxu1  ;;  %7663 = vmatmul.mubr.bf16.gmra.mxu1 %v8697_v62  ;;  %3471 = vst [vmem:[#allocation2 + $0x6] sm:$0xff] %v3451_v34  ;;  %v3454_v33 = vadd.f32 %v7317_v13, %v3434_v35  ;;  %7766 = vmatprep.subr.bf16.mxu0 %v9528_v21 }
 0x2df   : > { %7666 = vmatprep.mubr.bf16.mxu1 %v8706_v3  ;;  %v3355_v8 = vpop.f32.mrf.mxu0  ;;  %729 = vperm.xlu1 %7941, %v618_v28  }
 0x2e0   : > { %v9579_v6 = vpop.f32.mrf.mxu1  ;;  %3474 = vst [vmem:[#allocation2 + $0x1e] sm:$0x3] %v3454_v33  ;;  %v3452_v26 = vadd.f32 %v3432_v38, %v3355_v8  ;;  %7607 = vmatmul.mubr.bf16.gmra.mxu0 %v8826_v23  ;;  %724 = vperm.xlu0 %7940, %v617_v11   ;;  %v3441_v33 = vld [vmem:[#allocation2 + $0x56] sm:$0xff] }
 0x2e1   : > { %v7320_v42 = vpop.f32.mrf.mxu0  ;;  %7610 = vmatprep.mubr.bf16.mxu0 %v8832_v30  ;;  %v9612_v8 = vld [vmem:[#allocation12 + $0x1f0] sm:$0xff]  }
 0x2e2   : > { %v9583_v14 = vpop.f32.mrf.mxu1  ;;  %3472 = vst [vmem:[#allocation2 + $0xe] sm:$0x3] %v3452_v26  ;;  %v3457_v19 = vadd.f32 %v7320_v42, %v3437_v44  ;;  %v3439_v26 = vld [vmem:[#allocation2 + $0x46] sm:$0xff]  ;;  %v621_v42 = vld [vmem:[%s9478_s12 + $0xb0] sm:$0xff] }
 0x2e3   : > { %v3368_v31 = vpop.f32.mrf.mxu0  ;;  %v9595_v32 = vld [vmem:[#allocation2 + $0x10] sm:$0xff]  ;;  %739 = vperm.xlu1 %7941, %v620_v10  }
 0x2e4   : > { %v9587_v40 = vpop.f32.mrf.mxu1  ;;  %3477 = vst [vmem:[#allocation2 + $0x36] sm:$0xff] %v3457_v19  ;;  %v3455_v17 = vadd.f32 %v3435_v39, %v3368_v31  ;;  %4207 = vst [vmem:[#allocation2 + $0x10] sm:$0xff] %v9014_v0  ;;  %734 = vperm.xlu0 %7940, %v619_v27   ;;  %v4436_v19 = vld [vmem:[#allocation2 + $0xdc] sm:$0xf]  ;;  %v624_v31 = vld [vmem:[%s9478_s12 + $0xc8] sm:$0xff] }
 0x2e5   : > { %v7321_v61 = vpop.f32.mrf.mxu0  ;;  %v9601_v50 = vld [vmem:[#allocation2] sm:$0xff] }
 0x2e6   : > { %v9592_v51 = vpop.f32.mrf.mxu1  ;;  %7667 = vmatmul.mubr.bf16.gmra.mxu1 %v8710_v4  ;;  %3475 = vst [vmem:[#allocation2 + $0x26] sm:$0xff] %v3455_v17  ;;  %v3458_v24 = vadd.f32 %v7321_v61, %v3438_v49  ;;  %4205 = vst [vmem:[#allocation2] sm:$0xff] %v9000_v2  ;;  %v9622_v61 = vld [vmem:[#allocation12 + $0x1e8] sm:$0xff]   ;;  %v3442_v49 = vld [vmem:[#allocation2 + $0x5e] sm:$0x3] }
 0x2e7   : > { %7734 = vmatprep.mubr.bf16.mxu1 %v8701_v63  ;;  %v3371_v46 = vpop.f32.mrf.mxu0  ;;  %v3708_v13 = vld [vmem:[#allocation2 + $0x18] sm:$0xff]  ;;  %749 = vperm.xlu1 %7941, %v622_v37  }
 0x2e8   : > { %v9599_v7 = vpop.f32.mrf.mxu1  ;;  %3478 = vst [vmem:[#allocation2 + $0x3e] sm:$0x3] %v3458_v24  ;;  %v3456_v0 = vadd.f32 %v3436_v45, %v3371_v46  ;;  %v3728_v35 = vadd.f32 %v9524_v48, %v3708_v13  ;;  %7611 = vmatmul.mubr.bf16.gmra.mxu0 %v8679_v56  ;;  %v4435_v24 = vld [vmem:[#allocation2 + $0xcc] sm:$0xf]  ;;  %744 = vperm.xlu0 %7940, %v621_v42   ;;  %v10060_v13 = vld [vmem:[#allocation22_spill] sm:$0xff] }
 0x2e9   : > { %v7324_v12 = vpop.f32.mrf.mxu0  ;;  %v3706_v2 = vld [vmem:[#allocation2 + $0x8] sm:$0xff]  ;;  %7614 = vmatprep.mubr.bf16.mxu0 %v8683_v57  ;;  %v3445_v42 = vld [vmem:[#allocation2 + $0x76] sm:$0xff] }
 0x2ea   : > { %v9606_v34 = vpop.f32.mrf.mxu1  ;;  %3476 = vst [vmem:[#allocation2 + $0x2e] sm:$0x3] %v3456_v0  ;;  %v3461_v38 = vadd.f32 %v7324_v12, %v3441_v33  ;;  %3748 = vst [vmem:[#allocation2 + $0x18] sm:$0xff] %v3728_v35  ;;  %v3726_v48 = vadd.f32 %v3706_v2, %v9532_v15  ;;  %v623_v33 = vld [vmem:[%s9478_s12 + $0xc0] sm:$0xff] }
 0x2eb   : > { %v3384_v44 = vpop.f32.mrf.mxu0  ;;  %v9618_v10 = vld [vmem:[#allocation2 + $0x30] sm:$0xff]  ;;  %759 = vperm.xlu1 %7941, %v624_v31  }
 0x2ec   : > { %v9610_v28 = vpop.f32.mrf.mxu1  ;;  %3481 = vst [vmem:[#allocation2 + $0x56] sm:$0xff] %v3461_v38  ;;  %v3459_v39 = vadd.f32 %v3439_v26, %v3384_v44  ;;  %3746 = vst [vmem:[#allocation2 + $0x8] sm:$0xff] %v3726_v48  ;;  %v626_v26 = vld [vmem:[%s9478_s12 + $0xd8] sm:$0xff]  ;;  %754 = vperm.xlu0 %7940, %v623_v33   ;;  %v4437_v33 = vld [vmem:[#allocation2 + $0xec] sm:$0xf] }
 0x2ed   : > { %4211 = vst [vmem:[#allocation2 + $0x30] sm:$0xff] %v9039_v22  ;;  %v7325_v15 = vpop.f32.mrf.mxu0  ;;  %v9627_v37 = vld [vmem:[#allocation2 + $0x20] sm:$0xff]  ;;  %v3440_v22 = vld [vmem:[#allocation2 + $0x4e] sm:$0x3] }
 0x2ee   : > { %v7448_v11 = vpop.f32.mrf.mxu1  ;;  %7735 = vmatmul.mubr.bf16.vlgmr.msra.gmra.mxu1 %v8735_v20  ;;  %3479 = vst [vmem:[#allocation2 + $0x46] sm:$0xff] %v3459_v39  ;;  %v3462_v46 = vadd.f32 %v7325_v15, %v3442_v49  ;;  %4209 = vst [vmem:[#allocation2 + $0x20] sm:$0xff] %v10060_v13  ;;  %v3443_v39 = vld [vmem:[#allocation2 + $0x66] sm:$0xff]  ;;  %v4438_v49 = vld [vmem:[#allocation2 + $0xfc] sm:$0xf] }
 0x2ef   : > { %v4440_v17 = vadd.f32 %v7448_v11, %v4436_v19  ;;  %7738 = vmatprep.mubr.bf16.mxu1 %v8760_v36  ;;  %7822 = vmatpush3.bf16.msra.mxu1 %v9528_v21  ;;  %v3387_v0 = vpop.f32.mrf.mxu0  ;;  %v3712_v12 = vld [vmem:[#allocation2 + $0x38] sm:$0xff]  ;;  %v9635_v11 = vld [vmem:[#allocation12 + $0x1e0] sm:$0xff]  }
 0x2f0   : > { %v4335_v27 = vpop.f32.mrf.mxu1  ;;  %7815 = vmatprep.subr.bf16.mxu1 %v9612_v8  ;;  %3482 = vst [vmem:[#allocation2 + $0x5e] sm:$0x3] %v3462_v46  ;;  %v3460_v2 = vadd.f32 %v3440_v22, %v3387_v0  ;;  %v3732_v38 = vadd.f32 %v9548_v54, %v3712_v12  ;;  %7615 = vmatmul.mubr.bf16.gmra.mxu0 %v8697_v62  ;;  %v9646_v13 = vld [vmem:[#allocation12 + $0x1d8] sm:$0xff]  }
 0x2f1   : > { %4444 = vst [vmem:[#allocation2 + $0xdc] sm:$0xf] %v4440_v17  ;;  %v4439_v45 = vadd.f32 %v4435_v24, %v4335_v27  ;;  %v7328_v48 = vpop.f32.mrf.mxu0  ;;  %v3710_v19 = vld [vmem:[#allocation2 + $0x28] sm:$0xff]  ;;  %7618 = vmatprep.mubr.bf16.mxu0 %v8706_v3  ;;  %769 = vperm.xlu1 %7941, %v626_v26   ;;  %v625_v24 = vld [vmem:[%s9478_s12 + $0xd0] sm:$0xff]  ;;  %v10061_v0 = vld [vmem:[#allocation27_spill] sm:$0xff] }
 0x2f2   : > { %v7449_v35 = vpop.f32.mrf.mxu1  ;;  %3480 = vst [vmem:[#allocation2 + $0x4e] sm:$0x3] %v3460_v2  ;;  %v3465_v31 = vadd.f32 %v7328_v48, %v3445_v42  ;;  %3752 = vst [vmem:[#allocation2 + $0x38] sm:$0xff] %v3732_v38  ;;  %v3730_v54 = vadd.f32 %v3710_v19, %v9553_v43  ;;  %v628_v43 = vld [vmem:[%s9478_s12 + $0xe8] sm:$0xff]  ;;  %764 = vperm.xlu0 %7940, %v625_v24  }
 0x2f3   : > { %4443 = vst [vmem:[#allocation2 + $0xcc] sm:$0xf] %v4439_v45  ;;  %7823 = vmatpush3.bf16.msra.mxu1 %v9612_v8  ;;  %v3400_v17 = vpop.f32.mrf.mxu0  ;;  %v9641_v27 = vld [vmem:[#allocation2 + $0x50] sm:$0xff]  ;;  %v3446_v35 = vld [vmem:[#allocation2 + $0x7e] sm:$0x3] }
 0x2f4   : > { %v4338_v44 = vpop.f32.mrf.mxu1  ;;  %7816 = vmatprep.subr.bf16.mxu1 %v9622_v61  ;;  %3485 = vst [vmem:[#allocation2 + $0x76] sm:$0xff] %v3465_v31  ;;  %v3463_v46 = vadd.f32 %v3443_v39, %v3400_v17  ;;  %3750 = vst [vmem:[#allocation2 + $0x28] sm:$0xff] %v3730_v54  ;;  %v10062_v48 = vld [vmem:[#allocation25_spill] sm:$0xff]  ;;  %v627_v39 = vld [vmem:[%s9478_s12 + $0xe0] sm:$0xff] }
 0x2f5   : > { %4215 = vst [vmem:[#allocation2 + $0x50] sm:$0xff] %v10061_v0  ;;  %v7329_v22 = vpop.f32.mrf.mxu0  ;;  %v9651_v2 = vld [vmem:[#allocation2 + $0x40] sm:$0xff]  ;;  %v3444_v44 = vld [vmem:[#allocation2 + $0x6e] sm:$0x3]  ;;  %779 = vperm.xlu1 %7941, %v628_v43  }
 0x2f6   : > { %v7452_v15 = vpop.f32.mrf.mxu1  ;;  %7739 = vmatmul.mubr.bf16.gmra.mxu1 %v8776_v25  ;;  %3483 = vst [vmem:[#allocation2 + $0x66] sm:$0xff] %v3463_v46  ;;  %v3466_v38 = vadd.f32 %v7329_v22, %v3446_v35  ;;  %4213 = vst [vmem:[#allocation2 + $0x40] sm:$0xff] %v10062_v48  ;;  %v3449_v46 = vld [vmem:[#allocation2 + $0x96] sm:$0xff]  ;;  %774 = vperm.xlu0 %7940, %v627_v39   ;;  %v3447_v35 = vld [vmem:[#allocation2 + $0x86] sm:$0xff] }
 0x2f7   : > { %v4442_v45 = vadd.f32 %v7452_v15, %v4438_v49  ;;  %7742 = vmatprep.mubr.bf16.mxu1 %v8786_v29  ;;  %7824 = vmatpush3.bf16.msra.mxu1 %v9622_v61  ;;  %v3403_v42 = vpop.f32.mrf.mxu0  ;;  %v3716_v31 = vld [vmem:[#allocation2 + $0x58] sm:$0xff] }
 0x2f8   : > { %v4349_v12 = vpop.f32.mrf.mxu1  ;;  %7817 = vmatprep.subr.bf16.mxu1 %v9635_v11  ;;  %3486 = vst [vmem:[#allocation2 + $0x7e] sm:$0x3] %v3466_v38  ;;  %v3464_v54 = vadd.f32 %v3444_v44, %v3403_v42  ;;  %v3736_v17 = vadd.f32 %v9567_v58, %v3716_v31  ;;  %v630_v15 = vld [vmem:[%s9478_s12 + $0xf8] sm:$0xff]  ;;  %7619 = vmatmul.mubr.bf16.gmra.mxu0 %v8710_v4  ;;  %v629_v38 = vld [vmem:[%s9478_s12 + $0xf0] sm:$0xff] }
 0x2f9   : > { %4446 = vst [vmem:[#allocation2 + $0xfc] sm:$0xf] %v4442_v45  ;;  %v4441_v26 = vadd.f32 %v4437_v33, %v4349_v12  ;;  %v7332_v49 = vpop.f32.mrf.mxu0  ;;  %v9660_v45 = vld [vmem:[#allocation12 + $0x1d0] sm:$0xff]   ;;  %v3714_v43 = vld [vmem:[#allocation2 + $0x48] sm:$0xff]  ;;  %7686 = vmatprep.mubr.bf16.mxu0 %v8701_v63  ;;  %789 = vperm.xlu1 %7941, %v630_v15   ;;  %v10063_v48 = vld [vmem:[#allocation31_spill] sm:$0xff] }
 0x2fa   : > { %v7453_v19 = vpop.f32.mrf.mxu1  ;;  %3484 = vst [vmem:[#allocation2 + $0x6e] sm:$0x3] %v3464_v54  ;;  %v3469_v0 = vadd.f32 %v7332_v49, %v3449_v46  ;;  %3756 = vst [vmem:[#allocation2 + $0x58] sm:$0xff] %v3736_v17  ;;  %v3734_v22 = vadd.f32 %v3714_v43, %v9570_v47  ;;  %v3450_v42 = vld [vmem:[#allocation2 + $0x9e] sm:$0x3]  ;;  %784 = vperm.xlu0 %7940, %v629_v38   ;;  %v10064_v54 = vld [vmem:[#allocation29_spill] sm:$0xff] }
 0x2fb   : > { %4445 = vst [vmem:[#allocation2 + $0xec] sm:$0xf] %v4441_v26  ;;  %7825 = vmatpush3.bf16.msra.mxu1 %v9635_v11  ;;  %v3416_v58 = vpop.f32.mrf.mxu0  ;;  %v9665_v33 = vld [vmem:[#allocation2 + $0x70] sm:$0xff]  ;;  %v3448_v15 = vld [vmem:[#allocation2 + $0x8e] sm:$0x3] }
 0x2fc   : > { %v4352_v24 = vpop.f32.mrf.mxu1  ;;  %7818 = vmatprep.subr.bf16.mxu1 %v9646_v13  ;;  %3489 = vst [vmem:[#allocation2 + $0x96] sm:$0xff] %v3469_v0  ;;  %v3467_v26 = vadd.f32 %v3447_v35, %v3416_v58  ;;  %3754 = vst [vmem:[#allocation2 + $0x48] sm:$0xff] %v3734_v22  ;;  %v9672_v19 = vld [vmem:[#allocation12 + $0x1c8] sm:$0xff]   ;;  %v9681_v58 = vld [vmem:[#allocation12 + $0x1c0] sm:$0xff]  }
 0x2fd   : > { %4219 = vst [vmem:[#allocation2 + $0x70] sm:$0xff] %v10063_v48  ;;  %v7333_v47 = vpop.f32.mrf.mxu0  ;;  %v9674_v31 = vld [vmem:[#allocation2 + $0x60] sm:$0xff] }
 0x2fe   : > { %v7456_v12 = vpop.f32.mrf.mxu1  ;;  %7743 = vmatmul.mubr.bf16.gmra.mxu1 %v8796_v52  ;;  %3487 = vst [vmem:[#allocation2 + $0x86] sm:$0xff] %v3467_v26  ;;  %v3470_v39 = vadd.f32 %v7333_v47, %v3450_v42  ;;  %4217 = vst [vmem:[#allocation2 + $0x60] sm:$0xff] %v10064_v54  ;;  %v10065_v48 = vld [vmem:[#allocation35_spill] sm:$0xff]  ;;  %v10066_v42 = vld [vmem:[#allocation33_spill] sm:$0xff] }
 0x2ff   : > { %7746 = vmatprep.mubr.bf16.mxu1 %v8807_v59  ;;  %7826 = vmatpush3.bf16.msra.mxu1 %v9646_v13  ;;  %v3419_v17 = vpop.f32.mrf.mxu0  ;;  %v3720_v46 = vld [vmem:[#allocation2 + $0x78] sm:$0xff] }
 0x300   : > { %v4363_v44 = vpop.f32.mrf.mxu1  ;;  %7819 = vmatprep.subr.bf16.mxu1 %v9660_v45  ;;  %3490 = vst [vmem:[#allocation2 + $0x9e] sm:$0x3] %v3470_v39  ;;  %v3468_v24 = vadd.f32 %v3448_v15, %v3419_v17  ;;  %v3740_v43 = vadd.f32 %v9583_v14, %v3720_v46  ;;  %7687 = vmatmul.mubr.bf16.vlgmr.msra.gmra.mxu0 %v8735_v20 }
 0x301   : > { %v7400_v0 = vpop.f32.mrf.mxu0  ;;  %v3718_v35 = vld [vmem:[#allocation2 + $0x68] sm:$0xff]  ;;  %7767 = vmatpush3.bf16.msra.mxu0 %v9528_v21  ;;  %7690 = vmatprep.mubr.bf16.mxu0 %v8760_v36 }
 0x302   : > { %v7457_v49 = vpop.f32.mrf.mxu1  ;;  %3488 = vst [vmem:[#allocation2 + $0x8e] sm:$0x3] %v3468_v24  ;;  %3760 = vst [vmem:[#allocation2 + $0x78] sm:$0xff] %v3740_v43  ;;  %v3738_v12 = vadd.f32 %v3718_v35, %v9587_v40  ;;  %7768 = vmatprep.subr.bf16.mxu0 %v9612_v8 }
 0x303   : > { %7827 = vmatpush3.bf16.msra.mxu1 %v9660_v45  ;;  %v3864_v38 = vpop.f32.mrf.mxu0  ;;  %v9688_v26 = vld [vmem:[#allocation2 + $0x90] sm:$0xff] }
 0x304   : > { %v4365_v22 = vpop.f32.mrf.mxu1  ;;  %7820 = vmatprep.subr.bf16.mxu1 %v9672_v19  ;;  %3758 = vst [vmem:[#allocation2 + $0x68] sm:$0xff] %v3738_v12  ;;  %4223 = vst [vmem:[#allocation2 + $0x90] sm:$0xff] %v10065_v48 }
 0x305   : > { %v7401_v21 = vpop.f32.mrf.mxu0  ;;  %v9694_v40 = vld [vmem:[#allocation2 + $0x80] sm:$0xff]  ;;  %7769 = vmatpush3.bf16.msra.mxu0 %v9612_v8 }
 0x306   : > { %v7460_v14 = vpop.f32.mrf.mxu1  ;;  %7747 = vmatmul.mubr.bf16.gmra.mxu1 %v8813_v9  ;;  %4221 = vst [vmem:[#allocation2 + $0x80] sm:$0xff] %v10066_v42  ;;  %7770 = vmatprep.subr.bf16.mxu0 %v9622_v61 }
 0x307   : > { %7750 = vmatprep.mubr.bf16.mxu1 %v8820_v16  ;;  %7828 = vmatpush3.bf16.msra.mxu1 %v9672_v19  ;;  %v3866_v44 = vpop.f32.mrf.mxu0  ;;  %v3724_v54 = vld [vmem:[#allocation2 + $0x98] sm:$0xff] }
 0x308   : > { %v4375_v47 = vpop.f32.mrf.mxu1  ;;  %7821 = vmatprep.subr.bf16.mxu1 %v9681_v58  ;;  %v3744_v17 = vadd.f32 %v9606_v34, %v3724_v54  ;;  %7691 = vmatmul.mubr.bf16.gmra.mxu0 %v8776_v25 }
 0x309   : > { %v7404_v15 = vpop.f32.mrf.mxu0  ;;  %v3722_v46 = vld [vmem:[#allocation2 + $0x88] sm:$0xff]  ;;  %7694 = vmatprep.mubr.bf16.mxu0 %v8786_v29  ;;  %7771 = vmatpush3.bf16.msra.mxu0 %v9622_v61 }
 0x30a   : > { %v7461_v39 = vpop.f32.mrf.mxu1  ;;  %3764 = vst [vmem:[#allocation2 + $0x98] sm:$0xff] %v3744_v17  ;;  %v3742_v8 = vadd.f32 %v3722_v46, %v9610_v28  ;;  %7772 = vmatprep.subr.bf16.mxu0 %v9635_v11  ;;  %v3727_v15 = vadd.f32 %v9515_v18, %v9595_v32 }
 0x30b   : > { %7829 = vmatpush3.bf16.msra.mxu1 %v9681_v58  ;;  %v3876_v24 = vpop.f32.mrf.mxu0 }
 0x30c   : > { %v4377_v49 = vpop.f32.mrf.mxu1  ;;  %3762 = vst [vmem:[#allocation2 + $0x88] sm:$0xff] %v3742_v8 }
 0x30d   : > { %v7405_v34 = vpop.f32.mrf.mxu0  ;;  %7773 = vmatpush3.bf16.msra.mxu0 %v9635_v11  ;;  %v3982_v49 = vld [vmem:[#allocation2 + $0x18] sm:$0x3] }
 0x30e   : > { %v7464_v43 = vpop.f32.mrf.mxu1  ;;  %7751 = vmatmul.mubr.bf16.gmra.mxu1 %v8826_v23  ;;  %7774 = vmatprep.subr.bf16.mxu0 %v9646_v13 }
 0x30f   : > { %7754 = vmatprep.mubr.bf16.mxu1 %v8832_v30  ;;  %v3878_v22 = vpop.f32.mrf.mxu0 }
 0x310   : > { %v4387_v0 = vpop.f32.mrf.mxu1  ;;  %7695 = vmatmul.mubr.bf16.gmra.mxu0 %v8796_v52  ;;  %v3725_v22 = vadd.f32 %v9601_v50, %v9521_v55 }
 0x311   : > { %v7408_v61 = vpop.f32.mrf.mxu0  ;;  %7698 = vmatprep.mubr.bf16.mxu0 %v8807_v59  ;;  %7775 = vmatpush3.bf16.msra.mxu0 %v9646_v13 }
 0x312   : > { %v7465_v35 = vpop.f32.mrf.mxu1  ;;  %7776 = vmatprep.subr.bf16.mxu0 %v9660_v45 }
 0x313   : > { %v3888_v12 = vpop.f32.mrf.mxu0  ;;  %v3980_v35 = vld [vmem:[#allocation2 + $0x8] sm:$0x3] }
 0x314   : > { %v4389_v28 = vpop.f32.mrf.mxu1 }
 0x315   : > { %v7409_v11 = vpop.f32.mrf.mxu0  ;;  %7777 = vmatpush3.bf16.msra.mxu0 %v9660_v45 }
 0x316   : > { %v7468_v38 = vpop.f32.mrf.mxu1  ;;  %7755 = vmatmul.mubr.bf16.gmra.mxu1 %v8679_v56  ;;  %7778 = vmatprep.subr.bf16.mxu0 %v9672_v19 }
 0x317   : > { %7758 = vmatprep.mubr.bf16.mxu1 %v8683_v57  ;;  %v3890_v48 = vpop.f32.mrf.mxu0 }
 0x318   : > { %v4399_v14 = vpop.f32.mrf.mxu1  ;;  %7699 = vmatmul.mubr.bf16.gmra.mxu0 %v8813_v9 }
 0x319   : > { %v7412_v47 = vpop.f32.mrf.mxu0  ;;  %7702 = vmatprep.mubr.bf16.mxu0 %v8820_v16  ;;  %7779 = vmatpush3.bf16.msra.mxu0 %v9672_v19 }
 0x31a   : > { %v7469_v21 = vpop.f32.mrf.mxu1  ;;  %7780 = vmatprep.subr.bf16.mxu0 %v9681_v58  ;;  %v4022_v54 = vrot.slane %v7412_v47, 6  ;;  %v3731_v47 = vadd.f32 %v9539_v41, %v9618_v10 }
 0x31b   : > { %v3900_v42 = vpop.f32.mrf.mxu0 }
 0x31c   : > { %v4401_v13 = vpop.f32.mrf.mxu1  ;;  %v4019_v8 = vrot.slane %v3900_v42, 6 }
 0x31d   : > { %v7413_v45 = vpop.f32.mrf.mxu0  ;;  %7781 = vmatpush3.bf16.msra.mxu0 %v9681_v58  ;;  %v3986_v13 = vld [vmem:[#allocation2 + $0x38] sm:$0x3] }
 0x31e   : > { %v7472_v44 = vpop.f32.mrf.mxu1  ;;  %7759 = vmatmul.mubr.bf16.gmra.mxu1 %v8697_v62  ;;  %v4023_v17 = vrot.slane %v7413_v45, 6 }
 0x31f   : > { %7762 = vmatprep.mubr.bf16.mxu1 %v8706_v3  ;;  %v3903_v46 = vpop.f32.mrf.mxu0 }
 0x320   : > { %v4411_v39 = vpop.f32.mrf.mxu1  ;;  %v4024_v24 = vsel %vm2370_vm1, %v4022_v54, %v4023_v17  ;;  %v4072_v43 = vadd.f32 %v4023_v17, %v3982_v49  ;;  %v4020_v34 = vrot.slane %v3903_v46, 6  ;;  %7703 = vmatmul.mubr.bf16.gmra.mxu0 %v8826_v23  ;;  %v3729_v46 = vadd.f32 %v9627_v37, %v9544_v60 }
 0x321   : > { %v4071_v0 = vadd.f32 %v4024_v24, %v3727_v15  ;;  %v7416_v61 = vpop.f32.mrf.mxu0  ;;  %7706 = vmatprep.mubr.bf16.mxu0 %v8832_v30  ;;  %v10067_v24 = vld [vmem:[#allocation21_spill] sm:$0xff] }
 0x322   : > { %v7473_v19 = vpop.f32.mrf.mxu1  ;;  %4092 = vst [vmem:[#allocation2 + $0x18] sm:$0x3] %v4072_v43  ;;  %v4021_v18 = vsel %vm2370_vm1, %v4019_v8, %v4020_v34  ;;  %v4070_v32 = vadd.f32 %v4020_v34, %v3980_v35  ;;  %v4028_v48 = vrot.slane %v7416_v61, 6 }
 0x323   : > { %v4069_v28 = vadd.f32 %v4021_v18, %v3725_v22  ;;  %v3916_v12 = vpop.f32.mrf.mxu0  ;;  %v4143_v11 = vmax.f32 %v4071_v0, 0.0  ;;  %v3984_v19 = vld [vmem:[#allocation2 + $0x28] sm:$0x3] }
 0x324   : > { %v4413_v58 = vpop.f32.mrf.mxu1  ;;  %4090 = vst [vmem:[#allocation2 + $0x8] sm:$0x3] %v4070_v32  ;;  %v4025_v45 = vrot.slane %v3916_v12, 6 }
 0x325   : > { %v7417_v55 = vpop.f32.mrf.mxu0  ;;  %4175 = vst [vmem:[%s8897_s19 + $0x78] sm:$0xff] %v4143_v11  ;;  %v4141_v14 = vmax.f32 %v4069_v28, 0.0  ;;  %v10068_v58 = vld [vmem:[#allocation20_spill] sm:$0xff]  ;;  %v3990_v11 = vld [vmem:[#allocation2 + $0x58] sm:$0x3] }
 0x326   : > { %v7476_v38 = vpop.f32.mrf.mxu1  ;;  %7763 = vmatmul.mubr.bf16.gmra.mxu1 %v8710_v4  ;;  %v4029_v21 = vrot.slane %v7417_v55, 6 }
 0x327   : > { %7806 = vmatprep.mubr.bf16.mxu1 %v8683_v57  ;;  %v3919_v42 = vpop.f32.mrf.mxu0  ;;  %4173 = vst [vmem:[%s8897_s19 + $0x18] sm:$0xff] %v4141_v14  ;;  %v3735_v38 = vadd.f32 %v9559_v5, %v9641_v27 }
 0x328   : > { %v4423_v50 = vpop.f32.mrf.mxu1  ;;  %v4030_v39 = vsel %vm2370_vm1, %v4028_v48, %v4029_v21  ;;  %v4076_v54 = vadd.f32 %v4029_v21, %v3986_v13  ;;  %v4026_v17 = vrot.slane %v3919_v42, 6  ;;  %7707 = vmatmul.mubr.bf16.gmra.mxu0 %v8679_v56 }
 0x329   : > { %v4112_v15 = vld [vmem:[#allocation2 + $0x18] sm:$0xff]  ;;  %v4075_v49 = vadd.f32 %v4030_v39, %v3731_v47  ;;  %v7420_v8 = vpop.f32.mrf.mxu0  ;;  %7710 = vmatprep.mubr.bf16.mxu0 %v8683_v57 }
 0x32a   : > { %v7477_v44 = vpop.f32.mrf.mxu1  ;;  %v4144_v10 = vmax.f32 %v4112_v15, 0.0  ;;  %4208 = vst [vmem:[#allocation2 + $0x18] sm:$0xff] %v10067_v24  ;;  %4096 = vst [vmem:[#allocation2 + $0x38] sm:$0x3] %v4076_v54  ;;  %v4027_v43 = vsel %vm2370_vm1, %v4025_v45, %v4026_v17  ;;  %v4074_v34 = vadd.f32 %v4026_v17, %v3984_v19  ;;  %v4034_v28 = vrot.slane %v7420_v8, 6  ;;  %v10069_v54 = vld [vmem:[#allocation24_spill] sm:$0xff] }
 0x32b   : > { %v4110_v0 = vld [vmem:[#allocation2 + $0x8] sm:$0xff]  ;;  %v4073_v22 = vadd.f32 %v4027_v43, %v3729_v46  ;;  %v3932_v60 = vpop.f32.mrf.mxu0  ;;  %v4147_v35 = vmax.f32 %v4075_v49, 0.0  ;;  %v3733_v44 = vadd.f32 %v9651_v2, %v9563_v1 }
 0x32c   : > { %v4425_v41 = vpop.f32.mrf.mxu1  ;;  %4176 = vst [vmem:[%s8897_s19 + $0xa8] sm:$0xff] %v4144_v10  ;;  %v4142_v61 = vmax.f32 %v4110_v0, 0.0  ;;  %4206 = vst [vmem:[#allocation2 + $0x8] sm:$0xff] %v10068_v58  ;;  %v4031_v14 = vrot.slane %v3932_v60, 6  ;;  %v3988_v45 = vld [vmem:[#allocation2 + $0x48] sm:$0x3]  ;;  %v9766_v49 = vpop.permute.xlu1 %644  ;;  %v3739_v60 = vadd.f32 %v9575_v53, %v9665_v33 }
 0x32d   : > { %4094 = vst [vmem:[#allocation2 + $0x28] sm:$0x3] %v4074_v34  ;;  %v7421_v18 = vpop.f32.mrf.mxu0  ;;  %4179 = vst [vmem:[%s8897_s19 + $0x138] sm:$0xff] %v4147_v35  ;;  %v4145_v57 = vmax.f32 %v4073_v22, 0.0  ;;  %v10070_v10 = vld [vmem:[#allocation23_spill] sm:$0xff] }
 0x32e   : > { %v7544_v37 = vpop.f32.mrf.mxu1  ;;  %7807 = vmatmul.mubr.bf16.vlgmr.msra.gmra.mxu1 %v8697_v62  ;;  %4174 = vst [vmem:[%s8897_s19 + $0x48] sm:$0xff] %v4142_v61  ;;  %v4035_v12 = vrot.slane %v7421_v18, 6  ;;  %v9768_v1 = vpop.permute.xlu0 %634 }
 0x32f   : > { %7810 = vmatprep.mubr.bf16.mxu1 %v8706_v3  ;;  %v3935_v55 = vpop.f32.mrf.mxu0  ;;  %4177 = vst [vmem:[%s8897_s19 + $0xd8] sm:$0xff] %v4145_v57  ;;  %v3994_v37 = vld [vmem:[#allocation2 + $0x78] sm:$0x3] }
 0x330   : > { %v4772_v32 = vpop.f32.mrf.mxu1  ;;  %v4036_v48 = vsel %vm2370_vm1, %v4034_v28, %v4035_v12  ;;  %v4080_v21 = vadd.f32 %v4035_v12, %v3990_v11  ;;  %v4032_v47 = vrot.slane %v3935_v55, 6  ;;  %7711 = vmatmul.mubr.bf16.gmra.mxu0 %v8697_v62  ;;  %v3992_v11 = vld [vmem:[#allocation2 + $0x68] sm:$0x3] }
 0x331   : > { %v4116_v13 = vld [vmem:[#allocation2 + $0x38] sm:$0xff]  ;;  %v4079_v42 = vadd.f32 %v4036_v48, %v3735_v38  ;;  %v7424_v39 = vpop.f32.mrf.mxu0  ;;  %7714 = vmatprep.mubr.bf16.mxu0 %v8706_v3  ;;  %v3737_v38 = vadd.f32 %v9674_v31, %v9579_v6 }
 0x332   : > { %v9754_v50 = vpop.f32.mrf.mxu1  ;;  %v4148_v27 = vmax.f32 %v4116_v13, 0.0  ;;  %4212 = vst [vmem:[#allocation2 + $0x38] sm:$0xff] %v10069_v54  ;;  %4100 = vst [vmem:[#allocation2 + $0x58] sm:$0x3] %v4080_v21  ;;  %v4033_v17 = vsel %vm2370_vm1, %v4031_v14, %v4032_v47  ;;  %v4078_v15 = vadd.f32 %v4032_v47, %v3988_v45  ;;  %v4040_v34 = vrot.slane %v7424_v39, 6  ;;  %v10071_v21 = vld [vmem:[#allocation28_spill] sm:$0xff] }
 0x333   : > { %v4077_v62 = vadd.f32 %v4033_v17, %v3733_v44  ;;  %v3948_v46 = vpop.f32.mrf.mxu0  ;;  %v4151_v8 = vmax.f32 %v4079_v42, 0.0  ;;  %v10072_v45 = vld [vmem:[#allocation26_spill] sm:$0xff] }
 0x334   : > { %v9761_v5 = vpop.f32.mrf.mxu1  ;;  %v4114_v2 = vld [vmem:[#allocation2 + $0x28] sm:$0xff]  ;;  %4180 = vst [vmem:[%s8897_s19 + $0x168] sm:$0xff] %v4148_v27  ;;  %4098 = vst [vmem:[#allocation2 + $0x48] sm:$0x3] %v4078_v15  ;;  %v650_v22 = vpop.permute.xlu1 %649  ;;  %v4037_v58 = vrot.slane %v3948_v46, 6 }
 0x335   : > { %v4146_v41 = vmax.f32 %v4114_v2, 0.0  ;;  %4210 = vst [vmem:[#allocation2 + $0x28] sm:$0xff] %v10070_v10  ;;  %v7425_v24 = vpop.f32.mrf.mxu0  ;;  %4183 = vst [vmem:[%s8897_s19 + $0x1f8] sm:$0xff] %v4151_v8  ;;  %v4149_v43 = vmax.f32 %v4077_v62, 0.0  ;;  %v640_v28 = vpop.permute.xlu0 %639  ;;  %v3743_v2 = vadd.f32 %v9592_v51, %v9688_v26  ;;  %v9799_v46 = vld [vmem:[#allocation8] ss:$0 sm:$0xff] }
 0x336   : > { %v7548_v19 = vpop.f32.mrf.mxu1  ;;  %7811 = vmatmul.mubr.bf16.gmra.mxu1 %v8710_v4  ;;  %v4041_v0 = vrot.slane %v7425_v24, 6  ;;  %v3998_v8 = vld [vmem:[#allocation2 + $0x98] sm:$0x3] }
 0x337   : > { %4178 = vst [vmem:[%s8897_s19 + $0x108] sm:$0xff] %v4146_v41  ;;  %v3951_v35 = vpop.f32.mrf.mxu0  ;;  %4181 = vst [vmem:[%s8897_s19 + $0x198] sm:$0xff] %v4149_v43  ;;  %v3741_v41 = vadd.f32 %v9694_v40, %v9599_v7  ;;  %v798_v43 = vmul.f32 %v9799_v46, %v9768_v1 }
 0x338   : > { %v4786_v3 = vpop.f32.mrf.mxu1  ;;  %v4042_v18 = vsel %vm2370_vm1, %v4040_v34, %v4041_v0  ;;  %v4084_v32 = vadd.f32 %v4041_v0, %v3994_v37  ;;  %v4038_v57 = vrot.slane %v3951_v35, 6  ;;  %7715 = vmatmul.mubr.bf16.gmra.mxu0 %v8710_v4  ;;  %v9790_v39 = vpop.permute.xlu1 %659  ;;  %v801_v0 = vmul.f32 %v9799_v46, %v650_v22  ;;  %v3996_v35 = vld [vmem:[#allocation2 + $0x88] sm:$0x3] }
 0x339   : > { %v4083_v12 = vadd.f32 %v4042_v18, %v3739_v60  ;;  %v7428_v55 = vpop.f32.mrf.mxu0  ;;  %v4120_v33 = vld [vmem:[#allocation2 + $0x58] sm:$0xff]  ;;  %7782 = vmatprep.mubr.bf16.mxu0 %v8701_v63  ;;  %v9792_v27 = vpop.permute.xlu0 %654  ;;  %v800_v3 = vmul.f32 %v9799_v46, %v9766_v49  ;;  %v830_v18 = vmax.f32 %v798_v43, 0.0  ;;  %v799_v49 = vmul.f32 %v9799_v46, %v640_v28 }
 0x33a   : > { %v9777_v61 = vpop.f32.mrf.mxu1  ;;  %4104 = vst [vmem:[#allocation2 + $0x78] sm:$0x3] %v4084_v32  ;;  %v4039_v14 = vsel %vm2370_vm1, %v4037_v58, %v4038_v57  ;;  %v4082_v48 = vadd.f32 %v4038_v57, %v3992_v11  ;;  %4216 = vst [vmem:[#allocation2 + $0x58] sm:$0xff] %v10071_v21  ;;  %v4152_v31 = vmax.f32 %v4120_v33, 0.0  ;;  %v4046_v15 = vrot.slane %v7428_v55, 6  ;;  %v10073_v32 = vld [vmem:[#allocation32_spill] sm:$0xff] }
 0x33b   : > { %v4081_v47 = vadd.f32 %v4039_v14, %v3737_v38  ;;  %v3964_v13 = vpop.f32.mrf.mxu0  ;;  %v4118_v42 = vld [vmem:[#allocation2 + $0x48] sm:$0xff]  ;;  %v4155_v4 = vmax.f32 %v4083_v12, 0.0  ;;  %v832_v40 = vmax.f32 %v800_v3, 0.0  ;;  %v10074_v12 = vld [vmem:[#allocation38_spill] sm:$0xff]  ;;  %862 = vst [vmem:[%s8897_s19 + $0x8] sm:$0xff] %v830_v18  ;;  %v833_v21 = vmax.f32 %v801_v0, 0.0 }
 0x33c   : > { %v9784_v53 = vpop.f32.mrf.mxu1  ;;  %4102 = vst [vmem:[#allocation2 + $0x68] sm:$0x3] %v4082_v48  ;;  %v4150_v44 = vmax.f32 %v4118_v42, 0.0  ;;  %4214 = vst [vmem:[#allocation2 + $0x48] sm:$0xff] %v10072_v45  ;;  %v4043_v19 = vrot.slane %v3964_v13, 6 }
 0x33d   : > { %v7429_v63 = vpop.f32.mrf.mxu0  ;;  %4184 = vst [vmem:[%s8897_s19 + $0x228] sm:$0xff] %v4152_v31  ;;  %4187 = vst [vmem:[%s8897_s19 + $0x2b8] sm:$0xff] %v4155_v4  ;;  %v4153_v17 = vmax.f32 %v4081_v47, 0.0  ;;  %v831_v47 = vmax.f32 %v799_v49, 0.0  ;;  %v4652_v4 = vld [vmem:[#allocation2 + $0xd8] sm:$0xff] }
 0x33e   : > { %v7552_v6 = vpop.f32.mrf.mxu1  ;;  %v4047_v62 = vrot.slane %v7429_v63, 6  ;;  %4182 = vst [vmem:[%s8897_s19 + $0x1c8] sm:$0xff] %v4150_v44  ;;  %v665_v11 = vpop.permute.xlu0 %664  ;;  %864 = vst [vmem:[%s8897_s19 + $0x68] sm:$0xff] %v832_v40 }
 0x33f   : > { %v3967_v10 = vpop.f32.mrf.mxu0  ;;  %4185 = vst [vmem:[%s8897_s19 + $0x258] sm:$0xff] %v4153_v17  ;;  %v10075_v6 = vld [vmem:[#allocation30_spill] sm:$0xff]  ;;  %865 = vst [vmem:[%s8897_s19 + $0x98] sm:$0xff] %v833_v21  ;;  %v802_v17 = vmul.f32 %v9799_v46, %v9792_v27 }
 0x340   : > { %v4800_v54 = vpop.f32.mrf.mxu1  ;;  %v4048_v51 = vsel %vm2370_vm1, %v4046_v15, %v4047_v62  ;;  %v4088_v26 = vadd.f32 %v4047_v62, %v3998_v8  ;;  %v4044_v34 = vrot.slane %v3967_v10, 6  ;;  %7783 = vmatmul.mubr.bf16.vlgmr.msra.gmra.mxu0 %v8735_v20  ;;  %v670_v20 = vpop.permute.xlu1 %669  ;;  %863 = vst [vmem:[%s8897_s19 + $0x38] sm:$0xff] %v831_v47  ;;  %v4880_v15 = vrot.slane %v9754_v50, 4  ;;  %v4650_v62 = vld [vmem:[#allocation2 + $0xc8] sm:$0xff] }
 0x341   : > { %v4124_v60 = vld [vmem:[#allocation2 + $0x78] sm:$0xff]  ;;  %v4087_v37 = vadd.f32 %v4048_v51, %v3743_v2  ;;  %v7496_v58 = vpop.f32.mrf.mxu0  ;;  %7786 = vmatprep.mubr.bf16.mxu0 %v8760_v36  ;;  %v10076_v36 = vld [vmem:[#allocation37_spill] sm:$0xff]  ;;  %v803_v54 = vmul.f32 %v9799_v46, %v9790_v39  ;;  %v834_v10 = vmax.f32 %v802_v17, 0.0  ;;  %v804_v50 = vmul.f32 %v9799_v46, %v665_v11 }
 0x342   : > { %v7553_v24 = vpop.f32.mrf.mxu1  ;;  %v4156_v1 = vmax.f32 %v4124_v60, 0.0  ;;  %4220 = vst [vmem:[#allocation2 + $0x78] sm:$0xff] %v10073_v32  ;;  %4108 = vst [vmem:[#allocation2 + $0x98] sm:$0x3] %v4088_v26  ;;  %v4045_v22 = vsel %vm2370_vm1, %v4043_v19, %v4044_v34  ;;  %v4086_v57 = vadd.f32 %v4044_v34, %v3996_v35  ;;  %v4659_v38 = vadd.f32 %v7496_v58, %v10074_v12  ;;  %v10077_v60 = vld [vmem:[#allocation36_spill] sm:$0xff] }
 0x343   : > { %v4122_v55 = vld [vmem:[#allocation2 + $0x68] sm:$0xff]  ;;  %v4085_v33 = vadd.f32 %v4045_v22, %v3741_v41  ;;  %v4546_v14 = vpop.f32.mrf.mxu0  ;;  %v4159_v48 = vmax.f32 %v4087_v37, 0.0  ;;  %v835_v41 = vmax.f32 %v803_v54, 0.0  ;;  %v805_v24 = vmul.f32 %v9799_v46, %v670_v20  ;;  %866 = vst [vmem:[%s8897_s19 + $0xc8] sm:$0xff] %v834_v10  ;;  %v10079_v22 = vld [vmem:[#allocation34_spill] sm:$0xff] }
 0x344   : > { %v4802_v7 = vpop.f32.mrf.mxu1  ;;  %4188 = vst [vmem:[%s8897_s19 + $0x2e8] sm:$0xff] %v4156_v1  ;;  %v4154_v13 = vmax.f32 %v4122_v55, 0.0  ;;  %4218 = vst [vmem:[#allocation2 + $0x68] sm:$0xff] %v10075_v6  ;;  %v4657_v31 = vadd.f32 %v4546_v14, %v10076_v36  ;;  %v4879_v37 = vrot.slane %v9761_v5, 4  ;;  %v10078_v35 = vld [vmem:[#allocation40_spill] sm:$0xff]  ;;  %v836_v1 = vmax.f32 %v804_v50, 0.0 }
 0x345   : > { %4106 = vst [vmem:[#allocation2 + $0x88] sm:$0x3] %v4086_v57  ;;  %4667 = vst [vmem:[#allocation2 + $0xd0] sm:$0xff] %v4659_v38  ;;  %v7497_v42 = vpop.f32.mrf.mxu0  ;;  %v4157_v45 = vmax.f32 %v4085_v33, 0.0  ;;  %v680_v3 = vpop.permute.xlu1 %679  ;;  %v10080_v57 = vld [vmem:[#allocation39_spill] sm:$0xff] }
 0x346   : > { %v7556_v28 = vpop.f32.mrf.mxu1  ;;  %4191 = vst [vmem:[%s8897_s19 + $0x378] sm:$0xff] %v4159_v48  ;;  %4186 = vst [vmem:[%s8897_s19 + $0x288] sm:$0xff] %v4154_v13  ;;  %v4660_v63 = vadd.f32 %v7497_v42, %v4652_v4  ;;  %v675_v43 = vpop.permute.xlu0 %674  ;;  %v807_v26 = vmul.f32 %v9799_v46, %v680_v3  ;;  %v4656_v55 = vld [vmem:[#allocation2 + $0xf8] sm:$0xff]  ;;  %v4654_v13 = vld [vmem:[#allocation2 + $0xe8] sm:$0xff] }
 0x347   : > { %4665 = vst [vmem:[#allocation2 + $0xc0] sm:$0xff] %v4657_v31  ;;  %v4549_v2 = vpop.f32.mrf.mxu0  ;;  %4189 = vst [vmem:[%s8897_s19 + $0x318] sm:$0xff] %v4157_v45  ;;  %v806_v34 = vmul.f32 %v9799_v46, %v675_v43  ;;  %v4882_v31 = vrot.slane %v9777_v61, 4 }
 0x348   : > { %v4812_v44 = vpop.f32.mrf.mxu1  ;;  %4668 = vst [vmem:[#allocation2 + $0xd8] sm:$0xff] %v4660_v63  ;;  %v4658_v8 = vadd.f32 %v4650_v62, %v4549_v2  ;;  %7787 = vmatmul.mubr.bf16.gmra.mxu0 %v8776_v25  ;;  %867 = vst [vmem:[%s8897_s19 + $0xf8] sm:$0xff] %v835_v41  ;;  %v837_v25 = vmax.f32 %v805_v24, 0.0 }
 0x349   : > { %v4128_v39 = vld [vmem:[#allocation2 + $0x98] sm:$0xff]  ;;  %v7500_v51 = vpop.f32.mrf.mxu0  ;;  %7790 = vmatprep.mubr.bf16.mxu0 %v8786_v29  ;;  %v839_v29 = vmax.f32 %v807_v26, 0.0  ;;  %868 = vst [vmem:[%s8897_s19 + $0x128] sm:$0xff] %v836_v1  ;;  %v838_v14 = vmax.f32 %v806_v34, 0.0 }
 0x34a   : > { %v7557_v19 = vpop.f32.mrf.mxu1  ;;  %v4160_v0 = vmax.f32 %v4128_v39, 0.0  ;;  %4224 = vst [vmem:[#allocation2 + $0x98] sm:$0xff] %v10077_v60  ;;  %4666 = vst [vmem:[#allocation2 + $0xc8] sm:$0xff] %v4658_v8  ;;  %v4663_v58 = vadd.f32 %v7500_v51, %v10078_v35  ;;  %v690_v38 = vpop.permute.xlu1 %689 }
 0x34b   : > { %v4562_v18 = vpop.f32.mrf.mxu0  ;;  %869 = vst [vmem:[%s8897_s19 + $0x158] sm:$0xff] %v837_v25  ;;  %v809_v28 = vmul.f32 %v9799_v46, %v690_v38  ;;  %871 = vst [vmem:[%s8897_s19 + $0x1b8] sm:$0xff] %v839_v29  ;;  %v685_v4 = vpop.permute.xlu0 %684 }
 0x34c   : > { %v4814_v27 = vpop.f32.mrf.mxu1  ;;  %v4126_v7 = vld [vmem:[#allocation2 + $0x88] sm:$0xff]  ;;  %v4872_v40 = vld [vmem:[#allocation2 + $0xd0] sm:$0xf]  ;;  %4192 = vst [vmem:[%s8897_s19 + $0x3a8] sm:$0xff] %v4160_v0  ;;  %4671 = vst [vmem:[#allocation2 + $0xf0] sm:$0xff] %v4663_v58  ;;  %v4661_v12 = vadd.f32 %v4562_v18, %v10080_v57  ;;  %v808_v54 = vmul.f32 %v9799_v46, %v685_v4 }
 0x34d   : > { %v4158_v32 = vmax.f32 %v4126_v7, 0.0  ;;  %4222 = vst [vmem:[#allocation2 + $0x88] sm:$0xff] %v10079_v22  ;;  %v4888_v5 = vadd.f32 %v4880_v15, %v4872_v40  ;;  %v7501_v11 = vpop.f32.mrf.mxu0  ;;  %870 = vst [vmem:[%s8897_s19 + $0x188] sm:$0xff] %v838_v14  ;;  %v841_v36 = vmax.f32 %v809_v28, 0.0  ;;  %v4881_v15 = vrot.slane %v9784_v53, 4 }
 0x34e   : > { %v7560_v49 = vpop.f32.mrf.mxu1  ;;  %v4871_v20 = vld [vmem:[#allocation2 + $0xc0] sm:$0xf]  ;;  %4669 = vst [vmem:[#allocation2 + $0xe0] sm:$0xff] %v4661_v12  ;;  %v4664_v21 = vadd.f32 %v7501_v11, %v4656_v55  ;;  %v700_v44 = vpop.permute.xlu1 %699  ;;  %v840_v19 = vmax.f32 %v808_v54, 0.0 }
 0x34f   : > { %4190 = vst [vmem:[%s8897_s19 + $0x348] sm:$0xff] %v4158_v32  ;;  %4892 = vst [vmem:[#allocation2 + $0xd0] sm:$0xf] %v4888_v5  ;;  %v4887_v48 = vadd.f32 %v4879_v37, %v4871_v20  ;;  %v4565_v47 = vpop.f32.mrf.mxu0  ;;  %v811_v17 = vmul.f32 %v9799_v46, %v700_v44 }
 0x350   : > { %v4824_v33 = vpop.f32.mrf.mxu1  ;;  %4672 = vst [vmem:[#allocation2 + $0xf8] sm:$0xff] %v4664_v21  ;;  %v4662_v42 = vadd.f32 %v4654_v13, %v4565_v47  ;;  %7791 = vmatmul.mubr.bf16.gmra.mxu0 %v8796_v52  ;;  %873 = vst [vmem:[%s8897_s19 + $0x218] sm:$0xff] %v841_v36  ;;  %v695_v52 = vpop.permute.xlu0 %694 }
 0x351   : > { %4891 = vst [vmem:[#allocation2 + $0xc0] sm:$0xf] %v4887_v48  ;;  %v7504_v45 = vpop.f32.mrf.mxu0  ;;  %7794 = vmatprep.mubr.bf16.mxu0 %v8807_v59  ;;  %v843_v8 = vmax.f32 %v811_v17, 0.0  ;;  %872 = vst [vmem:[%s8897_s19 + $0x1e8] sm:$0xff] %v840_v19  ;;  %v810_v53 = vmul.f32 %v9799_v46, %v695_v52 }
 0x352   : > { %v7561_v6 = vpop.f32.mrf.mxu1  ;;  %4670 = vst [vmem:[#allocation2 + $0xe8] sm:$0xff] %v4662_v42  ;;  %v710_v10 = vpop.permute.xlu1 %709 }
 0x353   : > { %v4874_v61 = vld [vmem:[#allocation2 + $0xf0] sm:$0xf]  ;;  %v4578_v2 = vpop.f32.mrf.mxu0  ;;  %875 = vst [vmem:[%s8897_s19 + $0x278] sm:$0xff] %v843_v8  ;;  %v813_v39 = vmul.f32 %v9799_v46, %v710_v10  ;;  %v842_v50 = vmax.f32 %v810_v53, 0.0 }
 0x354   : > { %v4826_v63 = vpop.f32.mrf.mxu1  ;;  %v4890_v41 = vadd.f32 %v4882_v31, %v4874_v61  ;;  %v705_v34 = vpop.permute.xlu0 %704 }
 0x355   : > { %v4873_v24 = vld [vmem:[#allocation2 + $0xe0] sm:$0xf]  ;;  %v7505_v3 = vpop.f32.mrf.mxu0  ;;  %v845_v26 = vmax.f32 %v813_v39, 0.0  ;;  %874 = vst [vmem:[%s8897_s19 + $0x248] sm:$0xff] %v842_v50  ;;  %v812_v35 = vmul.f32 %v9799_v46, %v705_v34 }
 0x356   : > { %v7564_v62 = vpop.f32.mrf.mxu1  ;;  %4894 = vst [vmem:[#allocation2 + $0xf0] sm:$0xf] %v4890_v41  ;;  %v4889_v59 = vadd.f32 %v4881_v15, %v4873_v24  ;;  %v720_v0 = vpop.permute.xlu1 %719 }
 0x357   : > { %v4580_v51 = vpop.f32.mrf.mxu0  ;;  %877 = vst [vmem:[%s8897_s19 + $0x2d8] sm:$0xff] %v845_v26  ;;  %v815_v58 = vmul.f32 %v9799_v46, %v720_v0  ;;  %v844_v40 = vmax.f32 %v812_v35, 0.0 }
 0x358   : > { %v4836_v43 = vpop.f32.mrf.mxu1  ;;  %4893 = vst [vmem:[#allocation2 + $0xe0] sm:$0xf] %v4889_v59  ;;  %7795 = vmatmul.mubr.bf16.gmra.mxu0 %v8813_v9  ;;  %v715_v49 = vpop.permute.xlu0 %714 }
 0x359   : > { %v7508_v60 = vpop.f32.mrf.mxu0  ;;  %7798 = vmatprep.mubr.bf16.mxu0 %v8820_v16  ;;  %v847_v18 = vmax.f32 %v815_v58, 0.0  ;;  %876 = vst [vmem:[%s8897_s19 + $0x2a8] sm:$0xff] %v844_v40  ;;  %v814_v22 = vmul.f32 %v9799_v46, %v715_v49 }
 0x35a   : > { %v7565_v27 = vpop.f32.mrf.mxu1  ;;  %v730_v1 = vpop.permute.xlu1 %729 }
 0x35b   : > { %v4590_v25 = vpop.f32.mrf.mxu0  ;;  %879 = vst [vmem:[%s8897_s19 + $0x338] sm:$0xff] %v847_v18  ;;  %v817_v5 = vmul.f32 %v9799_v46, %v730_v1  ;;  %v846_v29 = vmax.f32 %v814_v22, 0.0  ;;  %v5364_v27 = vld [vmem:[#allocation2 + $0x10] sm:$0xf] }
 0x35c   : > { %v4838_v37 = vpop.f32.mrf.mxu1  ;;  %v725_v38 = vpop.permute.xlu0 %724  ;;  %v5363_v25 = vld [vmem:[#allocation2] sm:$0xf] }
 0x35d   : > { %v7509_v32 = vpop.f32.mrf.mxu0  ;;  %v849_v16 = vmax.f32 %v817_v5, 0.0  ;;  %878 = vst [vmem:[%s8897_s19 + $0x308] sm:$0xff] %v846_v29  ;;  %v816_v33 = vmul.f32 %v9799_v46, %v725_v38 }
 0x35e   : > { %v7568_v7 = vpop.f32.mrf.mxu1  ;;  %v740_v20 = vpop.permute.xlu1 %739 }
 0x35f   : > { %v4592_v57 = vpop.f32.mrf.mxu0  ;;  %881 = vst [vmem:[%s8897_s19 + $0x398] sm:$0xff] %v849_v16  ;;  %v819_v14 = vmul.f32 %v9799_v46, %v740_v20  ;;  %v848_v21 = vmax.f32 %v816_v33, 0.0 }
 0x360   : > { %v4848_v9 = vpop.f32.mrf.mxu1  ;;  %7799 = vmatmul.mubr.bf16.gmra.mxu0 %v8826_v23  ;;  %v735_v13 = vpop.permute.xlu0 %734 }
 0x361   : > { %v7512_v11 = vpop.f32.mrf.mxu0  ;;  %7802 = vmatprep.mubr.bf16.mxu0 %v8832_v30  ;;  %v851_v47 = vmax.f32 %v819_v14, 0.0  ;;  %880 = vst [vmem:[%s8897_s19 + $0x368] sm:$0xff] %v848_v21  ;;  %v818_v31 = vmul.f32 %v9799_v46, %v735_v13 }
 0x362   : > { %v7569_v12 = vpop.f32.mrf.mxu1  ;;  %v750_v6 = vpop.permute.xlu1 %749 }
 0x363   : > { %v4602_v28 = vpop.f32.mrf.mxu0  ;;  %883 = vst [vmem:[%s8897_s19 + $0x3f8] sm:$0xff] %v851_v47  ;;  %v821_v42 = vmul.f32 %v9799_v46, %v750_v6  ;;  %v850_v45 = vmax.f32 %v818_v31, 0.0  ;;  %v5365_v6 = vld [vmem:[#allocation2 + $0x20] sm:$0xf] }
 0x364   : > { %v4850_v55 = vpop.f32.mrf.mxu1  ;;  %v745_v63 = vpop.permute.xlu0 %744 }
 0x365   : > { %v7513_v36 = vpop.f32.mrf.mxu0  ;;  %v853_v30 = vmax.f32 %v821_v42, 0.0  ;;  %882 = vst [vmem:[%s8897_s19 + $0x3c8] sm:$0xff] %v850_v45  ;;  %v820_v15 = vmul.f32 %v9799_v46, %v745_v63  ;;  %v5366_v55 = vld [vmem:[#allocation2 + $0x30] sm:$0xf] }
 0x366   : > { %v7572_v48 = vpop.f32.mrf.mxu1  ;;  %v760_v61 = vpop.permute.xlu1 %759 }
 0x367   : > { %v4604_v4 = vpop.f32.mrf.mxu0  ;;  %885 = vst [vmem:[%s8897_s19 + $0x458] sm:$0xff] %v853_v30  ;;  %v852_v19 = vmax.f32 %v820_v15, 0.0  ;;  %v823_v8 = vmul.f32 %v9799_v46, %v760_v61  ;;  %v5368_v15 = vld [vmem:[#allocation2 + $0x50] sm:$0xf] }
 0x368   : > { %v4860_v23 = vpop.f32.mrf.mxu1  ;;  %7803 = vmatmul.mubr.bf16.gmra.mxu0 %v8679_v56  ;;  %v755_v24 = vpop.permute.xlu0 %754 }
 0x369   : > { %v7516_v54 = vpop.f32.mrf.mxu0  ;;  %884 = vst [vmem:[%s8897_s19 + $0x428] sm:$0xff] %v852_v19  ;;  %v855_v10 = vmax.f32 %v823_v8, 0.0  ;;  %v822_v53 = vmul.f32 %v9799_v46, %v755_v24 }
 0x36a   : > { %v7573_v44 = vpop.f32.mrf.mxu1 }
 0x36b   : > { %v4614_v2 = vpop.f32.mrf.mxu0  ;;  %887 = vst [vmem:[%s8897_s19 + $0x4b8] sm:$0xff] %v855_v10  ;;  %v854_v26 = vmax.f32 %v822_v53, 0.0 }
 0x36c   : > { %v4862_v17 = vpop.f32.mrf.mxu1  ;;  %v770_v3 = vpop.permute.xlu1 %769 }
 0x36d   : > { %v7517_v41 = vpop.f32.mrf.mxu0  ;;  %v825_v39 = vmul.f32 %v9799_v46, %v770_v3  ;;  %v765_v37 = vpop.permute.xlu0 %764  ;;  %886 = vst [vmem:[%s8897_s19 + $0x488] sm:$0xff] %v854_v26  ;;  %v5106_v17 = vld [vmem:[#allocation2 + $0x1c] sm:$0xf] }
 0x36e   : > { %v7640_v62 = vpop.f32.mrf.mxu1  ;;  %v824_v40 = vmul.f32 %v9799_v46, %v765_v37  ;;  %v5105_v41 = vld [vmem:[#allocation2 + $0xc] sm:$0xf] }
 0x36f   : > { %v4616_v43 = vpop.f32.mrf.mxu0  ;;  %v857_v34 = vmax.f32 %v825_v39, 0.0  ;;  %v5107_v37 = vld [vmem:[#allocation2 + $0x2c] sm:$0xf] }
 0x370   : > { %v5252_v52 = vpop.f32.mrf.mxu1  ;;  %v780_v35 = vpop.permute.xlu1 %779  ;;  %v856_v9 = vmax.f32 %v824_v40, 0.0 }
 0x371   : > { %v7520_v51 = vpop.f32.mrf.mxu0  ;;  %889 = vst [vmem:[%s8897_s19 + $0x518] sm:$0xff] %v857_v34  ;;  %v827_v18 = vmul.f32 %v9799_v46, %v780_v35  ;;  %v775_v5 = vpop.permute.xlu0 %774 }
 0x372   : > { %v7641_v56 = vpop.f32.mrf.mxu1  ;;  %888 = vst [vmem:[%s8897_s19 + $0x4e8] sm:$0xff] %v856_v9  ;;  %v826_v16 = vmul.f32 %v9799_v46, %v775_v5  ;;  %v5108_v51 = vld [vmem:[#allocation2 + $0x3c] sm:$0xf] }
 0x373   : > { %v5396_v59 = vrot.slane %v7641_v56, 4  ;;  %v4626_v58 = vpop.f32.mrf.mxu0  ;;  %v859_v22 = vmax.f32 %v827_v18, 0.0 }
 0x374   : > { %v5254_v50 = vpop.f32.mrf.mxu1  ;;  %v790_v57 = vpop.permute.xlu1 %789  ;;  %v858_v14 = vmax.f32 %v826_v16, 0.0  ;;  %v5369_v58 = vld [vmem:[#allocation2 + $0x60] sm:$0xf]  ;;  %v5372_v16 = vld [vmem:[#allocation2 + $0x90] sm:$0xf] }
 0x375   : > { %v5428_v0 = vadd.f32 %v5396_v59, %v5364_v27  ;;  %v5395_v60 = vrot.slane %v5254_v50, 4  ;;  %v7521_v1 = vpop.f32.mrf.mxu0  ;;  %891 = vst [vmem:[%s8897_s19 + $0x578] sm:$0xff] %v859_v22  ;;  %v829_v38 = vmul.f32 %v9799_v46, %v790_v57  ;;  %v785_v47 = vpop.permute.xlu0 %784  ;;  %v5370_v27 = vld [vmem:[#allocation2 + $0x70] sm:$0xf] }
 0x376   : > { %v7644_v7 = vpop.f32.mrf.mxu1  ;;  %890 = vst [vmem:[%s8897_s19 + $0x548] sm:$0xff] %v858_v14  ;;  %v828_v23 = vmul.f32 %v9799_v46, %v785_v47  ;;  %v5367_v46 = vld [vmem:[#allocation2 + $0x40] sm:$0xf]  ;;  %v5109_v14 = vld [vmem:[#allocation2 + $0x4c] sm:$0xf] }
 0x377   : > { %5444 = vst [vmem:[#allocation2 + $0x10] sm:$0xf] %v5428_v0  ;;  %v5427_v49 = vadd.f32 %v5395_v60, %v5363_v25  ;;  %v4628_v12 = vpop.f32.mrf.mxu0  ;;  %v861_v28 = vmax.f32 %v829_v38, 0.0 }
 0x378   : > { %v5266_v32 = vpop.f32.mrf.mxu1  ;;  %v860_v44 = vmax.f32 %v828_v23, 0.0 }
 0x379   : > { %5443 = vst [vmem:[#allocation2] sm:$0xf] %v5427_v49  ;;  %v7524_v11 = vpop.f32.mrf.mxu0  ;;  %893 = vst [vmem:[%s8897_s19 + $0x5d8] sm:$0xff] %v861_v28 }
 0x37a   : > { %v7645_v29 = vpop.f32.mrf.mxu1  ;;  %892 = vst [vmem:[%s8897_s19 + $0x5a8] sm:$0xff] %v860_v44 }
 0x37b   : > { %v5398_v20 = vrot.slane %v7645_v29, 4  ;;  %v4638_v13 = vpop.f32.mrf.mxu0  ;;  %v5110_v29 = vld [vmem:[#allocation2 + $0x5c] sm:$0xf] }
 0x37c   : > { %v5268_v33 = vpop.f32.mrf.mxu1 }
 0x37d   : > { %v5430_v48 = vadd.f32 %v5398_v20, %v5366_v55  ;;  %v5397_v21 = vrot.slane %v5268_v33, 4  ;;  %v7525_v42 = vpop.f32.mrf.mxu0 }
 0x37e   : > { %v7648_v36 = vpop.f32.mrf.mxu1 }
 0x37f   : > { %5446 = vst [vmem:[#allocation2 + $0x30] sm:$0xf] %v5430_v48  ;;  %v5429_v31 = vadd.f32 %v5397_v21, %v5365_v6  ;;  %v4640_v45 = vpop.f32.mrf.mxu0  ;;  %v5371_v48 = vld [vmem:[#allocation2 + $0x80] sm:$0xf] }
 0x380   : > { %v5280_v4 = vpop.f32.mrf.mxu1 }
 0x381   : > { %5445 = vst [vmem:[#allocation2 + $0x20] sm:$0xf] %v5429_v31  ;;  %v7592_v54 = vpop.f32.mrf.mxu0 }
 0x382   : > { %v7649_v30 = vpop.f32.mrf.mxu1  ;;  %v5122_v2 = vadd.f32 %v7592_v54, %v5106_v17  ;;  %v5374_v54 = vld [vmem:[#allocation2 + $0xb0] sm:$0xf] }
 0x383   : > { %v5400_v63 = vrot.slane %v7649_v30, 4  ;;  %v4994_v8 = vpop.f32.mrf.mxu0 }
 0x384   : > { %v5282_v61 = vpop.f32.mrf.mxu1  ;;  %5138 = vst [vmem:[#allocation2 + $0x1c] sm:$0xf] %v5122_v2  ;;  %v5121_v10 = vadd.f32 %v5105_v41, %v4994_v8  ;;  %v5373_v2 = vld [vmem:[#allocation2 + $0xa0] sm:$0xf]  ;;  %v5111_v41 = vld [vmem:[#allocation2 + $0x6c] sm:$0xf] }
 0x385   : > { %v5432_v62 = vadd.f32 %v5400_v63, %v5368_v15  ;;  %v5399_v19 = vrot.slane %v5282_v61, 4  ;;  %v7593_v3 = vpop.f32.mrf.mxu0  ;;  %v5112_v63 = vld [vmem:[#allocation2 + $0x7c] sm:$0xf] }
 0x386   : > { %v7652_v52 = vpop.f32.mrf.mxu1  ;;  %5137 = vst [vmem:[#allocation2 + $0xc] sm:$0xf] %v5121_v10 }
 0x387   : > { %5448 = vst [vmem:[#allocation2 + $0x50] sm:$0xf] %v5432_v62  ;;  %v5431_v24 = vadd.f32 %v5399_v19, %v5367_v46  ;;  %v4997_v56 = vpop.f32.mrf.mxu0 }
 0x388   : > { %v5294_v43 = vpop.f32.mrf.mxu1 }
 0x389   : > { %5447 = vst [vmem:[#allocation2 + $0x40] sm:$0xf] %v5431_v24  ;;  %v7596_v59 = vpop.f32.mrf.mxu0 }
 0x38a   : > { %v7653_v53 = vpop.f32.mrf.mxu1  ;;  %v5124_v26 = vadd.f32 %v7596_v59, %v5108_v51 }
 0x38b   : > { %v5402_v39 = vrot.slane %v7653_v53, 4  ;;  %v5008_v60 = vpop.f32.mrf.mxu0 }
 0x38c   : > { %v5296_v50 = vpop.f32.mrf.mxu1  ;;  %5140 = vst [vmem:[#allocation2 + $0x3c] sm:$0xf] %v5124_v26  ;;  %v5123_v7 = vadd.f32 %v5107_v37, %v5008_v60  ;;  %v5114_v60 = vld [vmem:[#allocation2 + $0x9c] sm:$0xf]  ;;  %v5376_v37 = vld [vmem:[#allocation2 + $0xd0] sm:$0xf] }
 0x38d   : > { %v5434_v34 = vadd.f32 %v5402_v39, %v5370_v27  ;;  %v5401_v0 = vrot.slane %v5296_v50, 4  ;;  %v7597_v49 = vpop.f32.mrf.mxu0 }
 0x38e   : > { %v6127_v35 = vld [vmem:[#allocation2 + $0x50] sm:$0xff]  ;;  %v7656_v25 = vpop.f32.mrf.mxu1  ;;  %5139 = vst [vmem:[#allocation2 + $0x2c] sm:$0xf] %v5123_v7 }
 0x38f   : > { %v6159_v40 = vmax.f32 %v6127_v35, 0.0  ;;  %5450 = vst [vmem:[#allocation2 + $0x70] sm:$0xf] %v5434_v34  ;;  %v5433_v18 = vadd.f32 %v5401_v0, %v5369_v58  ;;  %v5011_v22 = vpop.f32.mrf.mxu0  ;;  %v5113_v25 = vld [vmem:[#allocation2 + $0x8c] sm:$0xf] }
 0x390   : > { %v6125_v1 = vld [vmem:[#allocation2 + $0x40] sm:$0xff]  ;;  %v5308_v32 = vpop.f32.mrf.mxu1 }
 0x391   : > { %6191 = vst [vmem:[%s8897_s19 + $0x200] sm:$0xff] %v6159_v40  ;;  %v6157_v9 = vmax.f32 %v6125_v1, 0.0  ;;  %5449 = vst [vmem:[#allocation2 + $0x60] sm:$0xf] %v5433_v18  ;;  %v7600_v12 = vpop.f32.mrf.mxu0  ;;  %v5375_v32 = vld [vmem:[#allocation2 + $0xc0] sm:$0xf] }
 0x392   : > { %v7657_v5 = vpop.f32.mrf.mxu1  ;;  %v5126_v20 = vadd.f32 %v7600_v12, %v5110_v29 }
 0x393   : > { %6189 = vst [vmem:[%s8897_s19 + $0x1a0] sm:$0xff] %v6157_v9  ;;  %v5404_v57 = vrot.slane %v7657_v5, 4  ;;  %v5022_v33 = vpop.f32.mrf.mxu0 }
 0x394   : > { %v5310_v38 = vpop.f32.mrf.mxu1  ;;  %5142 = vst [vmem:[#allocation2 + $0x5c] sm:$0xf] %v5126_v20  ;;  %v5125_v47 = vadd.f32 %v5109_v14, %v5022_v33 }
 0x395   : > { %v5436_v11 = vadd.f32 %v5404_v57, %v5372_v16  ;;  %v5403_v55 = vrot.slane %v5310_v38, 4  ;;  %v7601_v36 = vpop.f32.mrf.mxu0 }
 0x396   : > { %v6131_v28 = vld [vmem:[#allocation2 + $0x70] sm:$0xff]  ;;  %v7660_v21 = vpop.f32.mrf.mxu1  ;;  %5141 = vst [vmem:[#allocation2 + $0x4c] sm:$0xf] %v5125_v47  ;;  %v5115_v36 = vld [vmem:[#allocation2 + $0xac] sm:$0xf] }
 0x397   : > { %v6163_v13 = vmax.f32 %v6131_v28, 0.0  ;;  %5452 = vst [vmem:[#allocation2 + $0x90] sm:$0xf] %v5436_v11  ;;  %v5435_v6 = vadd.f32 %v5403_v55, %v5371_v48  ;;  %v5025_v4 = vpop.f32.mrf.mxu0  ;;  %v5116_v21 = vld [vmem:[#allocation2 + $0xbc] sm:$0xf] }
 0x398   : > { %v6129_v23 = vld [vmem:[#allocation2 + $0x60] sm:$0xff]  ;;  %v5322_v31 = vpop.f32.mrf.mxu1  ;;  %v5378_v47 = vld [vmem:[#allocation2 + $0xf0] sm:$0xf] }
 0x399   : > { %6195 = vst [vmem:[%s8897_s19 + $0x2c0] sm:$0xff] %v6163_v13  ;;  %v6161_v42 = vmax.f32 %v6129_v23, 0.0  ;;  %5451 = vst [vmem:[#allocation2 + $0x80] sm:$0xf] %v5435_v6  ;;  %v7604_v30 = vpop.f32.mrf.mxu0 }
 0x39a   : > { %v7661_v44 = vpop.f32.mrf.mxu1  ;;  %v5128_v15 = vadd.f32 %v7604_v30, %v5112_v63 }
 0x39b   : > { %6193 = vst [vmem:[%s8897_s19 + $0x260] sm:$0xff] %v6161_v42  ;;  %v5406_v45 = vrot.slane %v7661_v44, 4  ;;  %v6128_v19 = vld [vmem:[#allocation2 + $0x58] sm:$0xff]  ;;  %v5036_v8 = vpop.f32.mrf.mxu0 }
 0x39c   : > { %v5324_v17 = vpop.f32.mrf.mxu1  ;;  %v6160_v10 = vmax.f32 %v6128_v19, 0.0  ;;  %5144 = vst [vmem:[#allocation2 + $0x7c] sm:$0xf] %v5128_v15  ;;  %v5127_v24 = vadd.f32 %v5111_v41, %v5036_v8 }
 0x39d   : > { %v5438_v61 = vadd.f32 %v5406_v45, %v5374_v54  ;;  %v5405_v62 = vrot.slane %v5324_v17, 4  ;;  %v6126_v56 = vld [vmem:[#allocation2 + $0x48] sm:$0xff]  ;;  %v7605_v53 = vpop.f32.mrf.mxu0  ;;  %v5377_v45 = vld [vmem:[#allocation2 + $0xe0] sm:$0xf] }
 0x39e   : > { %v6135_v46 = vld [vmem:[#allocation2 + $0x90] sm:$0xff]  ;;  %v7664_v52 = vpop.f32.mrf.mxu1  ;;  %6192 = vst [vmem:[%s8897_s19 + $0x230] sm:$0xff] %v6160_v10  ;;  %v6158_v51 = vmax.f32 %v6126_v56, 0.0  ;;  %5143 = vst [vmem:[#allocation2 + $0x6c] sm:$0xf] %v5127_v24 }
 0x39f   : > { %v6167_v3 = vmax.f32 %v6135_v46, 0.0  ;;  %5454 = vst [vmem:[#allocation2 + $0xb0] sm:$0xf] %v5438_v61  ;;  %v5437_v43 = vadd.f32 %v5405_v62, %v5373_v2  ;;  %v5039_v50 = vpop.f32.mrf.mxu0  ;;  %v5118_v24 = vld [vmem:[#allocation2 + $0xdc] sm:$0xf] }
 0x3a0   : > { %v6133_v39 = vld [vmem:[#allocation2 + $0x80] sm:$0xff]  ;;  %v5336_v59 = vpop.f32.mrf.mxu1  ;;  %6190 = vst [vmem:[%s8897_s19 + $0x1d0] sm:$0xff] %v6158_v51 }
 0x3a1   : > { %6199 = vst [vmem:[%s8897_s19 + $0x380] sm:$0xff] %v6167_v3  ;;  %v6165_v27 = vmax.f32 %v6133_v39, 0.0  ;;  %5453 = vst [vmem:[#allocation2 + $0xa0] sm:$0xf] %v5437_v43  ;;  %v7608_v0 = vpop.f32.mrf.mxu0  ;;  %v5117_v39 = vld [vmem:[#allocation2 + $0xcc] sm:$0xf] }
 0x3a2   : > { %v7665_v26 = vpop.f32.mrf.mxu1  ;;  %v5130_v58 = vadd.f32 %v7608_v0, %v5114_v60 }
 0x3a3   : > { %6197 = vst [vmem:[%s8897_s19 + $0x320] sm:$0xff] %v6165_v27  ;;  %v5408_v34 = vrot.slane %v7665_v26, 4  ;;  %v6132_v18 = vld [vmem:[#allocation2 + $0x78] sm:$0xff]  ;;  %v5050_v49 = vpop.f32.mrf.mxu0 }
 0x3a4   : > { %v5338_v35 = vpop.f32.mrf.mxu1  ;;  %v6164_v22 = vmax.f32 %v6132_v18, 0.0  ;;  %5146 = vst [vmem:[#allocation2 + $0x9c] sm:$0xf] %v5130_v58  ;;  %v5129_v5 = vadd.f32 %v5113_v25, %v5050_v49  ;;  %v5120_v18 = vld [vmem:[#allocation2 + $0xfc] sm:$0xf] }
 0x3a5   : > { %v5440_v7 = vadd.f32 %v5408_v34, %v5376_v37  ;;  %v5407_v40 = vrot.slane %v5338_v35, 4  ;;  %v6130_v29 = vld [vmem:[#allocation2 + $0x68] sm:$0xff]  ;;  %v7609_v16 = vpop.f32.mrf.mxu0 }
 0x3a6   : > { %v6139_v1 = vld [vmem:[#allocation2 + $0xb0] sm:$0xff]  ;;  %v7668_v9 = vpop.f32.mrf.mxu1  ;;  %6196 = vst [vmem:[%s8897_s19 + $0x2f0] sm:$0xff] %v6164_v22  ;;  %v6162_v11 = vmax.f32 %v6130_v29, 0.0  ;;  %5145 = vst [vmem:[#allocation2 + $0x8c] sm:$0xf] %v5129_v5 }
 0x3a7   : > { %v6171_v57 = vmax.f32 %v6139_v1, 0.0  ;;  %5456 = vst [vmem:[#allocation2 + $0xd0] sm:$0xf] %v5440_v7  ;;  %v5439_v12 = vadd.f32 %v5407_v40, %v5375_v32  ;;  %v5053_v33 = vpop.f32.mrf.mxu0  ;;  %v5119_v22 = vld [vmem:[#allocation2 + $0xec] sm:$0xf] }
 0x3a8   : > { %v6137_v38 = vld [vmem:[#allocation2 + $0xa0] sm:$0xff]  ;;  %v5350_v20 = vpop.f32.mrf.mxu1  ;;  %6194 = vst [vmem:[%s8897_s19 + $0x290] sm:$0xff] %v6162_v11 }
 0x3a9   : > { %6203 = vst [vmem:[%s8897_s19 + $0x440] sm:$0xff] %v6171_v57  ;;  %v6169_v55 = vmax.f32 %v6137_v38, 0.0  ;;  %5455 = vst [vmem:[#allocation2 + $0xc0] sm:$0xf] %v5439_v12  ;;  %v7612_v48 = vpop.f32.mrf.mxu0 }
 0x3aa   : > { %v7669_v14 = vpop.f32.mrf.mxu1  ;;  %v5132_v6 = vadd.f32 %v7612_v48, %v5116_v21 }
 0x3ab   : > { %6201 = vst [vmem:[%s8897_s19 + $0x3e0] sm:$0xff] %v6169_v55  ;;  %v5410_v28 = vrot.slane %v7669_v14, 4  ;;  %v6136_v42 = vld [vmem:[#allocation2 + $0x98] sm:$0xff]  ;;  %v5064_v4 = vpop.f32.mrf.mxu0 }
 0x3ac   : > { %v5352_v13 = vpop.f32.mrf.mxu1  ;;  %v6168_v63 = vmax.f32 %v6136_v42, 0.0  ;;  %5148 = vst [vmem:[#allocation2 + $0xbc] sm:$0xf] %v5132_v6  ;;  %v5131_v54 = vadd.f32 %v5115_v36, %v5064_v4 }
 0x3ad   : > { %v5442_v23 = vadd.f32 %v5410_v28, %v5378_v47  ;;  %v5409_v31 = vrot.slane %v5352_v13, 4  ;;  %v6134_v61 = vld [vmem:[#allocation2 + $0x88] sm:$0xff]  ;;  %v7613_v2 = vpop.f32.mrf.mxu0 }
 0x3ae   : > { %v6143_v44 = vld [vmem:[#allocation2 + $0xd0] sm:$0xff]  ;;  %v7736_v30 = vpop.f32.mrf.mxu1  ;;  %6200 = vst [vmem:[%s8897_s19 + $0x3b0] sm:$0xff] %v6168_v63  ;;  %v6166_v8 = vmax.f32 %v6134_v61, 0.0  ;;  %5147 = vst [vmem:[#allocation2 + $0xac] sm:$0xf] %v5131_v54 }
 0x3af   : > { %v6175_v17 = vmax.f32 %v6143_v44, 0.0  ;;  %5458 = vst [vmem:[#allocation2 + $0xf0] sm:$0xf] %v5442_v23  ;;  %v5441_v15 = vadd.f32 %v5409_v31, %v5377_v45  ;;  %v5067_v46 = vpop.f32.mrf.mxu0 }
 0x3b0   : > { %v6141_v62 = vld [vmem:[#allocation2 + $0xc0] sm:$0xff]  ;;  %v5768_v19 = vpop.f32.mrf.mxu1  ;;  %6198 = vst [vmem:[%s8897_s19 + $0x350] sm:$0xff] %v6166_v8 }
 0x3b1   : > { %6207 = vst [vmem:[%s8897_s19 + $0x500] sm:$0xff] %v6175_v17  ;;  %v6173_v41 = vmax.f32 %v6141_v62, 0.0  ;;  %5457 = vst [vmem:[#allocation2 + $0xe0] sm:$0xf] %v5441_v15  ;;  %v7616_v10 = vpop.f32.mrf.mxu0 }
 0x3b2   : > { %v7737_v52 = vpop.f32.mrf.mxu1  ;;  %v5134_v43 = vadd.f32 %v7616_v10, %v5118_v24 }
 0x3b3   : > { %6205 = vst [vmem:[%s8897_s19 + $0x4a0] sm:$0xff] %v6173_v41  ;;  %v6140_v56 = vld [vmem:[#allocation2 + $0xb8] sm:$0xff]  ;;  %v5078_v53 = vpop.f32.mrf.mxu0 }
 0x3b4   : > { %v5770_v3 = vpop.f32.mrf.mxu1  ;;  %v6172_v27 = vmax.f32 %v6140_v56, 0.0  ;;  %5150 = vst [vmem:[#allocation2 + $0xdc] sm:$0xf] %v5134_v43  ;;  %v5133_v50 = vadd.f32 %v5117_v39, %v5078_v53  ;;  %v5873_v56 = vld [vmem:[#allocation2 + $0x10] sm:$0xff] }
 0x3b5   : > { %v6138_v34 = vld [vmem:[#allocation2 + $0xa8] sm:$0xff]  ;;  %v7617_v0 = vpop.f32.mrf.mxu0 }
 0x3b6   : > { %v6147_v59 = vld [vmem:[#allocation2 + $0xf0] sm:$0xff]  ;;  %v7740_v51 = vpop.f32.mrf.mxu1  ;;  %6204 = vst [vmem:[%s8897_s19 + $0x470] sm:$0xff] %v6172_v27  ;;  %v6170_v35 = vmax.f32 %v6138_v34, 0.0  ;;  %5149 = vst [vmem:[#allocation2 + $0xcc] sm:$0xf] %v5133_v50 }
 0x3b7   : > { %v6179_v26 = vmax.f32 %v6147_v59, 0.0  ;;  %v5081_v25 = vpop.f32.mrf.mxu0  ;;  %v5871_v51 = vld [vmem:[#allocation2] sm:$0xff] }
 0x3b8   : > { %v6145_v60 = vld [vmem:[#allocation2 + $0xe0] sm:$0xff]  ;;  %v5780_v37 = vpop.f32.mrf.mxu1  ;;  %6202 = vst [vmem:[%s8897_s19 + $0x410] sm:$0xff] %v6170_v35  ;;  %v5877_v35 = vld [vmem:[#allocation2 + $0x30] sm:$0xff] }
 0x3b9   : > { %6211 = vst [vmem:[%s8897_s19 + $0x5c0] sm:$0xff] %v6179_v26  ;;  %v6177_v58 = vmax.f32 %v6145_v60, 0.0  ;;  %v7620_v40 = vpop.f32.mrf.mxu0 }
 0x3ba   : > { %v7741_v7 = vpop.f32.mrf.mxu1  ;;  %v5136_v1 = vadd.f32 %v7620_v40, %v5120_v18  ;;  %v5875_v40 = vld [vmem:[#allocation2 + $0x20] sm:$0xff] }
 0x3bb   : > { %6209 = vst [vmem:[%s8897_s19 + $0x560] sm:$0xff] %v6177_v58  ;;  %v6144_v32 = vld [vmem:[#allocation2 + $0xd8] sm:$0xff]  ;;  %v5092_v9 = vpop.f32.mrf.mxu0 }
 0x3bc   : > { %v5782_v49 = vpop.f32.mrf.mxu1  ;;  %v6176_v57 = vmax.f32 %v6144_v32, 0.0  ;;  %5152 = vst [vmem:[#allocation2 + $0xfc] sm:$0xf] %v5136_v1  ;;  %v5135_v12 = vadd.f32 %v5119_v22, %v5092_v9 }
 0x3bd   : > { %v6142_v29 = vld [vmem:[#allocation2 + $0xc8] sm:$0xff]  ;;  %v7621_v16 = vpop.f32.mrf.mxu0 }
 0x3be   : > { %v7744_v5 = vpop.f32.mrf.mxu1  ;;  %6208 = vst [vmem:[%s8897_s19 + $0x530] sm:$0xff] %v6176_v57  ;;  %v6174_v20 = vmax.f32 %v6142_v29, 0.0  ;;  %5151 = vst [vmem:[#allocation2 + $0xec] sm:$0xf] %v5135_v12 }
 0x3bf   : > { %v5095_v11 = vpop.f32.mrf.mxu0 }
 0x3c0   : > { %v5792_v38 = vpop.f32.mrf.mxu1  ;;  %6206 = vst [vmem:[%s8897_s19 + $0x4d0] sm:$0xff] %v6174_v20  ;;  %v5658_v11 = vld [vmem:[#allocation2 + $0x1c] sm:$0xf] }
 0x3c1   : > { %v7688_v33 = vpop.f32.mrf.mxu0 }
 0x3c2   : > { %v7745_v55 = vpop.f32.mrf.mxu1 }
 0x3c3   : > { %v6148_v28 = vld [vmem:[#allocation2 + $0xf8] sm:$0xff]  ;;  %v5558_v48 = vpop.f32.mrf.mxu0 }
 0x3c4   : > { %v5794_v14 = vpop.f32.mrf.mxu1  ;;  %v6180_v47 = vmax.f32 %v6148_v28, 0.0 }
 0x3c5   : > { %v6146_v13 = vld [vmem:[#allocation2 + $0xe8] sm:$0xff]  ;;  %v7689_v6 = vpop.f32.mrf.mxu0 }
 0x3c6   : > { %v7748_v21 = vpop.f32.mrf.mxu1  ;;  %6212 = vst [vmem:[%s8897_s19 + $0x5f0] sm:$0xff] %v6180_v47  ;;  %v6178_v23 = vmax.f32 %v6146_v13, 0.0  ;;  %v5657_v47 = vld [vmem:[#allocation2 + $0xc] sm:$0xf] }
 0x3c7   : > { %v5560_v31 = vpop.f32.mrf.mxu0 }
 0x3c8   : > { %v5804_v36 = vpop.f32.mrf.mxu1  ;;  %6210 = vst [vmem:[%s8897_s19 + $0x590] sm:$0xff] %v6178_v23 }
 0x3c9   : > { %v7692_v4 = vpop.f32.mrf.mxu0 }
 0x3ca   : > { %v7749_v42 = vpop.f32.mrf.mxu1 }
 0x3cb   : > { %v5570_v45 = vpop.f32.mrf.mxu0 }
 0x3cc   : > { %v5806_v44 = vpop.f32.mrf.mxu1 }
 0x3cd   : > { %v7693_v63 = vpop.f32.mrf.mxu0 }
 0x3ce   : > { %v7752_v30 = vpop.f32.mrf.mxu1  ;;  %v5660_v63 = vld [vmem:[#allocation2 + $0x3c] sm:$0xf] }
 0x3cf   : > { %v5572_v17 = vpop.f32.mrf.mxu0 }
 0x3d0   : > { %v5816_v54 = vpop.f32.mrf.mxu1 }
 0x3d1   : > { %v7696_v61 = vpop.f32.mrf.mxu0 }
 0x3d2   : > { %v7753_v15 = vpop.f32.mrf.mxu1  ;;  %v5659_v61 = vld [vmem:[#allocation2 + $0x2c] sm:$0xf] }
 0x3d3   : > { %v5582_v62 = vpop.f32.mrf.mxu0 }
 0x3d4   : > { %v5818_v2 = vpop.f32.mrf.mxu1 }
 0x3d5   : > { %v7697_v8 = vpop.f32.mrf.mxu0 }
 0x3d6   : > { %v7756_v19 = vpop.f32.mrf.mxu1 }
 0x3d7   : > { %v5584_v46 = vpop.f32.mrf.mxu0 }
 0x3d8   : > { %v5828_v41 = vpop.f32.mrf.mxu1 }
 0x3d9   : > { %v7700_v10 = vpop.f32.mrf.mxu0 }
 0x3da   : > { %v7757_v52 = vpop.f32.mrf.mxu1 }
 0x3db   : > { %v5594_v3 = vpop.f32.mrf.mxu0 }
 0x3dc   : > { %v5830_v24 = vpop.f32.mrf.mxu1 }
 0x3dd   : > { %v7701_v39 = vpop.f32.mrf.mxu0 }
 0x3de   : > { %v7760_v43 = vpop.f32.mrf.mxu1 }
 0x3df   : > { %v5881_v53 = vadd.f32 %v7760_v43, %v5873_v56  ;;  %v5596_v50 = vpop.f32.mrf.mxu0 }
 0x3e0   : > { %v5840_v59 = vpop.f32.mrf.mxu1 }
 0x3e1   : > { %5889 = vst [vmem:[#allocation2 + $0x10] sm:$0xff] %v5881_v53  ;;  %v5879_v27 = vadd.f32 %v5871_v51, %v5840_v59  ;;  %v7704_v34 = vpop.f32.mrf.mxu0 }
 0x3e2   : > { %v7761_v26 = vpop.f32.mrf.mxu1 }
 0x3e3   : > { %5887 = vst [vmem:[#allocation2] sm:$0xff] %v5879_v27  ;;  %v5606_v60 = vpop.f32.mrf.mxu0 }
 0x3e4   : > { %v9927_v0 = vpop.f32.mrf.mxu1 }
 0x3e5   : > { %v7705_v25 = vpop.f32.mrf.mxu0 }
 0x3e6   : > { %v7764_v37 = vpop.f32.mrf.mxu1 }
 0x3e7   : > { %v5885_v58 = vadd.f32 %v7764_v37, %v5877_v35  ;;  %v5608_v49 = vpop.f32.mrf.mxu0 }
 0x3e8   : > { %v5856_v7 = vpop.f32.mrf.mxu1  ;;  %v6094_v55 = vld [vmem:[#allocation2 + $0x10] sm:$0xf] }
 0x3e9   : > { %5893 = vst [vmem:[#allocation2 + $0x30] sm:$0xff] %v5885_v58  ;;  %v5883_v18 = vadd.f32 %v5875_v40, %v5856_v7  ;;  %v7708_v32 = vpop.f32.mrf.mxu0 }
 0x3ea   : > { %v9929_v1 = vpop.f32.mrf.mxu1  ;;  %v6093_v13 = vld [vmem:[#allocation2] sm:$0xf] }
 0x3eb   : > { %5891 = vst [vmem:[#allocation2 + $0x20] sm:$0xff] %v5883_v18  ;;  %v5618_v22 = vpop.f32.mrf.mxu0 }
 0x3ec   : > { %v9931_v9 = vpop.f32.mrf.mxu1 }
 0x3ed   : > { %v7709_v57 = vpop.f32.mrf.mxu0 }
 0x3ee   : > { %v7808_v5 = vpop.f32.mrf.mxu1 }
 0x3ef   : > { %v5620_v29 = vpop.f32.mrf.mxu0 }
 0x3f0   : > { %v6066_v12 = vpop.f32.mrf.mxu1  ;;  %v6096_v54 = vld [vmem:[#allocation2 + $0x30] sm:$0xf] }
 0x3f1   : > { %v7712_v20 = vpop.f32.mrf.mxu0 }
 0x3f2   : > { %v7809_v16 = vpop.f32.mrf.mxu1  ;;  %v5662_v14 = vadd.f32 %v7712_v20, %v5658_v11  ;;  %v6095_v46 = vld [vmem:[#allocation2 + $0x20] sm:$0xf] }
 0x3f3   : > { %v6102_v38 = vrot.slane %v7809_v16, 4  ;;  %v5630_v21 = vpop.f32.mrf.mxu0 }
 0x3f4   : > { %v6068_v33 = vpop.f32.mrf.mxu1  ;;  %5666 = vst [vmem:[#allocation2 + $0x1c] sm:$0xf] %v5662_v14  ;;  %v5661_v36 = vadd.f32 %v5657_v47, %v5630_v21 }
 0x3f5   : > { %v6110_v28 = vadd.f32 %v6102_v38, %v6094_v55  ;;  %v6101_v48 = vrot.slane %v6068_v33, 4  ;;  %v7713_v31 = vpop.f32.mrf.mxu0 }
 0x3f6   : > { %v7812_v6 = vpop.f32.mrf.mxu1  ;;  %5665 = vst [vmem:[#allocation2 + $0xc] sm:$0xf] %v5661_v36 }
 0x3f7   : > { %6114 = vst [vmem:[#allocation2 + $0x10] sm:$0xf] %v6110_v28  ;;  %v6109_v23 = vadd.f32 %v6101_v48, %v6093_v13  ;;  %v5633_v4 = vpop.f32.mrf.mxu0 }
 0x3f8   : > { %v6080_v42 = vpop.f32.mrf.mxu1 }
 0x3f9   : > { %6113 = vst [vmem:[#allocation2] sm:$0xf] %v6109_v23  ;;  %v7716_v30 = vpop.f32.mrf.mxu0 }
 0x3fa   : > { %v7813_v44 = vpop.f32.mrf.mxu1  ;;  %v5664_v15 = vadd.f32 %v7716_v30, %v5660_v63 }
 0x3fb   : > { %v6104_v45 = vrot.slane %v7813_v44, 4  ;;  %v5874_v19 = vld [vmem:[#allocation2 + $0x18] sm:$0xff]  ;;  %v5644_v8 = vpop.f32.mrf.mxu0 }
 0x3fc   : > { %v6082_v17 = vpop.f32.mrf.mxu1  ;;  %v5882_v52 = vadd.f32 %v7761_v26, %v5874_v19  ;;  %5668 = vst [vmem:[#allocation2 + $0x3c] sm:$0xf] %v5664_v15  ;;  %v5663_v10 = vadd.f32 %v5659_v61, %v5644_v8 }
 0x3fd   : > { %v6112_v2 = vadd.f32 %v6104_v45, %v6096_v54  ;;  %v6103_v62 = vrot.slane %v6082_v17, 4  ;;  %v5872_v43 = vld [vmem:[#allocation2 + $0x8] sm:$0xff]  ;;  %v7717_v56 = vpop.f32.mrf.mxu0 }
 0x3fe   : > { %v6119_v41 = vld [vmem:[#allocation2 + $0x10] sm:$0xff]  ;;  %5890 = vst [vmem:[#allocation2 + $0x18] sm:$0xff] %v5882_v52  ;;  %v6152_v39 = vmax.f32 %v5882_v52, 0.0  ;;  %v5880_v59 = vadd.f32 %v5872_v43, %v9927_v0  ;;  %5667 = vst [vmem:[#allocation2 + $0x2c] sm:$0xf] %v5663_v10 }
 0x3ff   : > { %v6151_v24 = vmax.f32 %v6119_v41, 0.0  ;;  %6116 = vst [vmem:[#allocation2 + $0x30] sm:$0xf] %v6112_v2  ;;  %v6111_v3 = vadd.f32 %v6103_v62, %v6095_v46  ;;  %v5647_v27 = vpop.f32.mrf.mxu0 }
 0x400   : > { %v6117_v53 = vld [vmem:[#allocation2] sm:$0xff]  ;;  %6184 = vst [vmem:[%s8897_s19 + $0xb0] sm:$0xff] %v6152_v39  ;;  %5888 = vst [vmem:[#allocation2 + $0x8] sm:$0xff] %v5880_v59  ;;  %v6150_v50 = vmax.f32 %v5880_v59, 0.0 }
 0x401   : > { %6183 = vst [vmem:[%s8897_s19 + $0x80] sm:$0xff] %v6151_v24  ;;  %v6149_v51 = vmax.f32 %v6117_v53, 0.0  ;;  %6115 = vst [vmem:[#allocation2 + $0x20] sm:$0xf] %v6111_v3  ;;  %v7784_v26 = vpop.f32.mrf.mxu0 }
 0x402   : > { %6182 = vst [vmem:[%s8897_s19 + $0x50] sm:$0xff] %v6150_v50 }
 0x403   : > { %6181 = vst [vmem:[%s8897_s19 + $0x20] sm:$0xff] %v6149_v51  ;;  %v5878_v34 = vld [vmem:[#allocation2 + $0x38] sm:$0xff]  ;;  %v5994_v60 = vpop.f32.mrf.mxu0 }
 0x404   : > { %v5886_v0 = vadd.f32 %v9929_v1, %v5878_v34 }
 0x405   : > { %v5876_v58 = vld [vmem:[#allocation2 + $0x28] sm:$0xff]  ;;  %v7785_v25 = vpop.f32.mrf.mxu0 }
 0x406   : > { %v6123_v37 = vld [vmem:[#allocation2 + $0x30] sm:$0xff]  ;;  %5894 = vst [vmem:[#allocation2 + $0x38] sm:$0xff] %v5886_v0  ;;  %v6156_v40 = vmax.f32 %v5886_v0, 0.0  ;;  %v5884_v18 = vadd.f32 %v5876_v58, %v9931_v9 }
 0x407   : > { %v6155_v35 = vmax.f32 %v6123_v37, 0.0  ;;  %v5996_v32 = vpop.f32.mrf.mxu0 }
 0x408   : > { %v6121_v7 = vld [vmem:[#allocation2 + $0x20] sm:$0xff]  ;;  %6188 = vst [vmem:[%s8897_s19 + $0x170] sm:$0xff] %v6156_v40  ;;  %5892 = vst [vmem:[#allocation2 + $0x28] sm:$0xff] %v5884_v18  ;;  %v6154_v1 = vmax.f32 %v5884_v18, 0.0 }
 0x409   : > { %6187 = vst [vmem:[%s8897_s19 + $0x140] sm:$0xff] %v6155_v35  ;;  %v6153_v49 = vmax.f32 %v6121_v7, 0.0  ;;  %v7788_v22 = vpop.f32.mrf.mxu0 }
 0x40a   : > { %6186 = vst [vmem:[%s8897_s19 + $0x110] sm:$0xff] %v6154_v1 }
 0x40b   : > { %6185 = vst [vmem:[%s8897_s19 + $0xe0] sm:$0xff] %v6153_v49  ;;  %v6006_v9 = vpop.f32.mrf.mxu0 }
 0x40c   : > { %8289 = shalt.err (!%p8286_p10)
}
 0x40d   : > { %s8290_s19 = scalar_lea.hbm %s9946_s28, 24576  ;;  %s8294_s10 = scalar_lea.hbm %s10001_s7, 49152 }
 0x40e   : > { %p8291_p6 = scmp.ne.s32.totalorder %s9946_s28, %s8290_s19  ;;  %p8295_p0 = scmp.lt.s32.totalorder %s9946_s28, %s10001_s7 }
 0x40f   : > { %p8296_p2 = scmp.lt.s32.totalorder %s8294_s10, %s8290_s19 }
 0x410   : > { %p8292_p12 = pnand %p8291_p6, %p10081_p4 }
 0x411   : > { %p8297_p8 = por %p8296_p2, %p8295_p0 }
 0x412   : > { %p8293_p13 = pneg %p8292_p12 }
 0x414   : > { %p8298_p9 = pnand %p8297_p8, %p8293_p13 }
 0x416   : > { %8301 = shalt.err (!%p8298_p9)
}
 0x417   : > { %s8370_s16 = smov 768   ;;  %s8371_s30 = smov 48   ;;  %v7789_v5 = vpop.f32.mrf.mxu0 }
 0x418   : > { %7854 = dma.vmem_to_hbm [thread:$0]  (%p10081_p4), %s9948_s23, 24576, %s9946_s28, %s6278_s2, %s8370_s16, %s8370_s16, %s8371_s30  }
 0x419   : > { %v6008_v57 = vpop.f32.mrf.mxu0 }
 0x41b   : > { %v7792_v12 = vpop.f32.mrf.mxu0 }
 0x41d   : > { %v6018_v29 = vpop.f32.mrf.mxu0 }
 0x41f   : > { %v7793_v16 = vpop.f32.mrf.mxu0 }
 0x421   : > { %v6020_v38 = vpop.f32.mrf.mxu0 }
 0x423   : > { %v7796_v20 = vpop.f32.mrf.mxu0 }
 0x425   : > { %v6030_v11 = vpop.f32.mrf.mxu0 }
 0x427   : > { %v7797_v55 = vpop.f32.mrf.mxu0 }
 0x429   : > { %v6032_v33 = vpop.f32.mrf.mxu0 }
 0x42b   : > { %v7800_v14 = vpop.f32.mrf.mxu0 }
 0x42d   : > { %v6042_v28 = vpop.f32.mrf.mxu0 }
 0x42f   : > { %v7801_v48 = vpop.f32.mrf.mxu0 }
 0x431   : > { %v6044_v21 = vpop.f32.mrf.mxu0 }
 0x433   : > { %v7804_v47 = vpop.f32.mrf.mxu0 }
 0x435   : > { %v6054_v13 = vpop.f32.mrf.mxu0 }
 0x437   : > { %v7805_v6 = vpop.f32.mrf.mxu0 }
 0x439   : > { %v6056_v36 = vpop.f32.mrf.mxu0 }
 0x43a PF: > { %s6306_s20 = sand.u32 1, %s8340_s24   ;;  %p10082_p4 = scmp.ne.s32.totalorder %s10017_s22, 0 }
 0x43b   : > { %p10083_p11 = scmp.ge.s32.totalorder %s8352_s27, 2  ;;  %s6307_s17 = scalar_lea.sflag [#allocation5], %s6306_s20 }
 0x43d   : > { %p7877_p7 = pnand %p10083_p11, %p10082_p4 }
 0x43f   : > { %p7878_p5 = pneg %p7877_p7 }
 0x441   : > { %8335 = dma.done.wait (%p7878_p5), %s6307_s17, 24576  }
 0x442   : > { %8337 = vsyncadd (%p7878_p5), %s6307_s17, 4294942720  ;;  %p23_p1 = scmp.ge.s32.totalorder %s8507_s11, 4   ;;  %s10084_s24 = smov %s8344_s25 }
 0x443   : > { %s10085_s25 = smov %s8348_s26  ;;  %s10086_s26 = smov %s8519_s18 }
 0x444   : > { %s10087_s27 = smov %s8507_s11  ;;  %25 = sbr.rel (!%p23_p1) target bundleno = 10 (0xa), region = 132 }
 0x449   :  { %6312 = vsyncpa [#allocation4], 1 }
 0x44a   :  { %6314 = vsyncpa [#allocation4 + $0x1], 1 }
 0x44b   :  { %6315 = vsyncpa [#allocation7], 1 }
 0x44c   :  { %6316 = vsyncpa [#allocation10], 1 }
 0x44d   :  { %6317 = vsyncpa [#allocation13], 1 }
 0x44e   :  { %6318 = vsyncpa [#allocation5], 1 }
 0x44f   :  { %6320 = vsyncpa [#allocation5 + $0x1], 1 }

</bundles_post_ra>
